<compile_context>
chip_gen: v5e
topology: v5e:2x2
jax: 0.10.0
libtpu: 0.0.40
codegen_flags: <defaults>
</compile_context>

<pallas_src>
import functools

import numpy as np
import jax
import jax.numpy as jnp
from jax.experimental import pallas as pl
from jax.experimental.pallas import tpu as pltpu


# ---------------------------------------------------------------------------
# Trace-time helpers (pure numpy; results become kernel operands/constants).
# ---------------------------------------------------------------------------
def _gaussian_taps(window_size: int, sigma: float) -> np.ndarray:
    coords = np.arange(window_size, dtype=np.float32) - (window_size // 2)
    g = np.exp(-(coords ** 2) / (2.0 * float(sigma) ** 2))
    return (g / g.sum()).astype(np.float32)


def _band_matrix(dim: int, taps: np.ndarray, pad: int) -> np.ndarray:
    """(dim, dim) band matrix M s.t. (x @ M)[o] == zero-padded 'same' 1D conv."""
    ws = taps.shape[0]
    m = np.zeros((dim, dim), np.float32)
    for o in range(dim):
        for t in range(ws):
            i = o + t - pad
            if 0 <= i < dim:
                m[i, o] += taps[t]
    return m


def _vmem_limit_bytes() -> int:
    """Generation-aware scoped-VMEM limit (leave headroom for Mosaic scratch)."""
    cap = 64 * 1024 * 1024  # conservative default (v7x per-TC VMEM)
    try:
        info = pltpu.get_tpu_info()
        cap = int(getattr(info, "vmem_capacity_bytes", cap))
    except Exception:
        pass
    return min(int(cap * 0.75), 100 * 1024 * 1024)


def _planes_per_block(n_planes: int, H: int, W: int, in_itemsize: int,
                      vmem_limit: int) -> int:
    """Largest plane-block P whose working set fits ~60% of the scoped VMEM."""
    budget = int(vmem_limit * 0.6) - 4 * 4 * (H * H + W * W)  # band mats, 2x buf
    budget = max(budget, 1)
    # Per-plane bytes: double-buffered inputs (2 arrays x 2 bufs) + stacked base
    # maps (5) + row/transposed/filtered intermediates (15) + ~4 elementwise tmps.
    per_plane = H * W * (4 * in_itemsize + 4 * (5 + 15 + 4))
    p = max(1, min(n_planes, budget // max(per_plane, 1), 512))
    if n_planes >= 2:
        # Keep at least 2 grid steps: lets dimension_semantics=("parallel",)
        # shard across both v7x TensorCores; negligible overhead elsewhere.
        p = min(p, -(-n_planes // 2))
    return int(max(1, p))


# ---------------------------------------------------------------------------
# Pallas kernel: one grid step = one block of P image planes.
# ---------------------------------------------------------------------------
def _combined_kernel(aw_ref, ah_ref, x1_ref, x2_ref, o_ref, *,
                     P, H, W, C1, C2, N):
    """
    aw_ref : (W, W) band matrix for the row (W-axis) Gaussian conv, VMEM
    ah_ref : (H, H) band matrix for the column (H-axis) Gaussian conv, VMEM
    x1_ref : (P, H, W) block of img1 planes, VMEM (f32 or bf16)
    x2_ref : (P, H, W) block of img2 planes, VMEM
    o_ref  : (1, 8, 128) per-step partial sums (row 0 = SSIM, row 1 = L1)
    """
    x1 = x1_ref[...].astype(jnp.float32)                 # (P, H, W)
    x2 = x2_ref[...].astype(jnp.float32)

    # L1 partial sum (tail padding is zero -> contributes 0, no mask needed).
    l1_part = jnp.sum(jnp.abs(x1 - x2))

    # Validity mask for the zero-padded tail block (padded planes would give
    # ssim == 1 per pixel, so they must be masked out of the SSIM sum).
    base = pl.program_id(0) * P
    plane_ids = jax.lax.broadcasted_iota(jnp.int32, (P, 1, 1), 0) + base
    valid = (plane_ids < N).astype(jnp.float32)           # (P, 1, 1)

    # --- batched separable Gaussian filtering of the 5 base maps -----------
    stacked = jnp.concatenate([x1, x2, x1 * x1, x2 * x2, x1 * x2], axis=0)

    # Row conv over W: one big MXU matmul (5P*H, W) @ (W, W).
    zr = jnp.dot(stacked.reshape(5 * P * H, W), aw_ref[...],
                 preferred_element_type=jnp.float32,
                 precision=jax.lax.Precision.HIGHEST).reshape(5 * P, H, W)

    # Single XLU transpose to (5P, W, H), then column conv over H as one big
    # MXU matmul (5P*W, H) @ (H, H).  All results stay in (P, W, H) layout —
    # the SSIM elementwise math and the final sums are orientation-agnostic.
    zt = jnp.transpose(zr, (0, 2, 1)).reshape(5 * P * W, H)
    filt = jnp.dot(zt, ah_ref[...],
                   preferred_element_type=jnp.float32,
                   precision=jax.lax.Precision.HIGHEST).reshape(5, P, W, H)

    # --- SSIM map (short elementwise chain; sigmas built in place) ---------
    mu1 = filt[0]
    mu2 = filt[1]
    mu1_sq = mu1 * mu1
    mu2_sq = mu2 * mu2
    mu12 = mu1 * mu2
    num = (2.0 * mu12 + C1) * (2.0 * (filt[4] - mu12) + C2)
    den = (mu1_sq + mu2_sq + C1) * ((filt[2] - mu1_sq) + (filt[3] - mu2_sq) + C2)

    # EUP reciprocal + one Newton–Raphson refinement (keeps f32 parity while
    # keeping the divide off the VALU critical slot).
    inv = pl.reciprocal(den, approx=True)
    inv = inv * (2.0 - den * inv)
    ssim_part = jnp.sum(num * inv * valid)

    # Lane-dense (8, 128) output tile: row 0 <- SSIM partial, row 1 <- L1.
    row = jax.lax.broadcasted_iota(jnp.int32, (8, 128), 0)
    tile = jnp.where(row == 0, ssim_part,
                     jnp.where(row == 1, l1_part, 0.0)).astype(jnp.float32)
    o_ref[0] = tile


# ---------------------------------------------------------------------------
# Wrapper: CombinedLoss forward.
# ---------------------------------------------------------------------------
def combined_loss(output, target, alpha=0.5, window_size=11, sigma=1.5,
                  val_range=1.0):
    orig_dtype = output.dtype

    # Pass bf16 through (halves DMA traffic); anything else computes in f32.
    passthrough = (output.dtype == target.dtype and
                   output.dtype in (jnp.float32, jnp.bfloat16))
    in_dtype = output.dtype if passthrough else jnp.float32

    B, C, H, W = output.shape
    N = B * C
    x1 = output.astype(in_dtype).reshape(N, H, W)
    x2 = target.astype(in_dtype).reshape(N, H, W)

    pad = window_size // 2
    taps = _gaussian_taps(window_size, sigma)
    aw = jnp.asarray(_band_matrix(W, taps, pad))   # row conv (right-multiply)
    ah = jnp.asarray(_band_matrix(H, taps, pad))   # col conv (right-multiply on (.,H))

    vmem_limit = _vmem_limit_bytes()
    in_itemsize = jnp.dtype(in_dtype).itemsize
    P = _planes_per_block(N, H, W, in_itemsize, vmem_limit)
    G = pl.cdiv(N, P)
    N_pad = G * P
    if N_pad > N:                                   # zero-padded tail block
        x1 = jnp.pad(x1, ((0, N_pad - N), (0, 0), (0, 0)))
        x2 = jnp.pad(x2, ((0, N_pad - N), (0, 0), (0, 0)))

    C1 = (0.01 * val_range) ** 2
    C2 = (0.03 * val_range) ** 2

    kernel = functools.partial(_combined_kernel, P=P, H=H, W=W,
                               C1=C1, C2=C2, N=N)

    partials = pl.pallas_call(
        kernel,
        out_shape=jax.ShapeDtypeStruct((G, 8, 128), jnp.float32),
        grid_spec=pltpu.PrefetchScalarGridSpec(
            num_scalar_prefetch=0,
            grid=(G,),
            in_specs=[
                # Small band matrices: constant block index -> VMEM-resident.
                pl.BlockSpec((W, W), lambda n: (0, 0)),
                pl.BlockSpec((H, H), lambda n: (0, 0)),
                # P unpadded image planes per grid step.
                pl.BlockSpec((P, H, W), lambda n: (n, 0, 0)),
                pl.BlockSpec((P, H, W), lambda n: (n, 0, 0)),
            ],
            out_specs=pl.BlockSpec((1, 8, 128), lambda n: (n, 0, 0)),
        ),
        compiler_params=pltpu.CompilerParams(
            dimension_semantics=("parallel",),      # independent per-block partials
            vmem_limit_bytes=int(vmem_limit),
        ),
    )(aw, ah, x1, x2)

    total = float(N * H * W)
    ssim_val = jnp.sum(partials[:, 0, 0]) / total   # size_average=True mean
    l1_val = jnp.sum(partials[:, 1, 0]) / total     # nn.L1Loss() (mean)

    if orig_dtype != jnp.float32 and orig_dtype == target.dtype:
        ssim_val = ssim_val.astype(orig_dtype)
        l1_val = l1_val.astype(orig_dtype)

    return alpha * (1.0 - ssim_val) + (1.0 - alpha) * l1_val


class CombinedLoss:
    """JAX/Pallas equivalent of the PyTorch CombinedLoss module (forward only)."""

    def __init__(self, alpha=0.5, window_size=11, sigma=1.5, val_range=1.0):
        self.alpha = alpha
        self.window_size = window_size
        self.sigma = sigma
        self.val_range = val_range

    def __call__(self, output, target):
        return combined_loss(output, target, self.alpha, self.window_size,
                             self.sigma, self.val_range)


# ---------------------------------------------------------------------------
# Pure-JAX reference (same math, no Pallas) for a lightweight parity check.
# ---------------------------------------------------------------------------
def _reference_loss(output, target, alpha=0.5, window_size=11, sigma=1.5,
                    val_range=1.0):
    x1 = output.astype(jnp.float32)
    x2 = target.astype(jnp.float32)
    B, C, H, W = x1.shape
    x1 = x1.reshape(B * C, H, W)
    x2 = x2.reshape(B * C, H, W)
    pad = window_size // 2
    taps = _gaussian_taps(window_size, sigma)
    aw = jnp.asarray(_band_matrix(W, taps, pad))
    ah = jnp.asarray(_band_matrix(H, taps, pad))

    def filt(x):
        y = jnp.einsum('nhw,wv->nhv', x, aw, precision=jax.lax.Precision.HIGHEST)
        return jnp.einsum('nhv,hk->nkv', y, ah, precision=jax.lax.Precision.HIGHEST)

    mu1, mu2 = filt(x1), filt(x2)
    s11, s22, s12 = filt(x1 * x1), filt(x2 * x2), filt(x1 * x2)
    C1 = (0.01 * val_range) ** 2
    C2 = (0.03 * val_range) ** 2
    num = (2 * mu1 * mu2 + C1) * (2 * (s12 - mu1 * mu2) + C2)
    den = (mu1 ** 2 + mu2 ** 2 + C1) * ((s11 - mu1 ** 2) + (s22 - mu2 ** 2) + C2)
    ssim_val = jnp.mean(num / den)
    l1_val = jnp.mean(jnp.abs(x1 - x2))
    return alpha * (1.0 - ssim_val) + (1.0 - alpha) * l1_val


if __name__ == "__main__":
    key = jax.random.PRNGKey(0)
    k1, k2 = jax.random.split(key)

    shape = (2, 4, 16, 16)  # (batch, channel, height, width)
    output = jax.random.uniform(k1, shape, dtype=jnp.float32)
    target = jnp.clip(output + 0.05 * jax.random.normal(k2, shape,
                                                        dtype=jnp.float32),
                      0.0, 1.0)

    loss_mod = CombinedLoss(alpha=0.5, window_size=11, sigma=1.5, val_range=1.0)
    loss = loss_mod(output, target)
    loss = jax.block_until_ready(loss)

    ref = jax.block_until_ready(_reference_loss(output, target))
    assert np.allclose(np.asarray(loss), np.asarray(ref), rtol=1e-4, atol=1e-4), \
        (float(loss), float(ref))

    print("KERNEL_OK")
</pallas_src>

<mosaic_0001>
module attributes {stable_mosaic.version = 11 : i64} {
  func.func @_combined_kernel(%arg0: i32, %arg1: memref<16x16xf32, #tpu.memory_space<vmem>>, %arg2: memref<16x16xf32, #tpu.memory_space<vmem>>, %arg3: memref<4x16x16xf32, #tpu.memory_space<vmem>>, %arg4: memref<4x16x16xf32, #tpu.memory_space<vmem>>, %arg5: memref<1x8x128xf32, #tpu.memory_space<vmem>>) attributes {dimension_semantics = [#tpu.dimension_semantics<parallel>], iteration_bounds = array<i64: 2>, scalar_prefetch = 0 : i64, scratch_operands = 0 : i64, tpu.core_type = #tpu.core_type<tc>, window_params = [{pipeline_mode = #tpu.pipeline_mode<synchronous>, transform_indices = @transform_0, window_bounds = array<i64: 16, 16>}, {pipeline_mode = #tpu.pipeline_mode<synchronous>, transform_indices = @transform_1, window_bounds = array<i64: 16, 16>}, {transform_indices = @transform_2, window_bounds = array<i64: 4, 16, 16>}, {transform_indices = @transform_3, window_bounds = array<i64: 4, 16, 16>}, {transform_indices = @transform_4, window_bounds = array<i64: 1, 8, 128>}]} {
    %c0 = arith.constant 0 : index
    %c0_0 = arith.constant 0 : index
    %c0_1 = arith.constant 0 : index
    %0 = vector.load %arg3[%c0, %c0_0, %c0_1] : memref<4x16x16xf32, #tpu.memory_space<vmem>>, vector<4x16x16xf32>
    %c0_2 = arith.constant 0 : index
    %c0_3 = arith.constant 0 : index
    %c0_4 = arith.constant 0 : index
    %1 = vector.load %arg4[%c0_2, %c0_3, %c0_4] : memref<4x16x16xf32, #tpu.memory_space<vmem>>, vector<4x16x16xf32>
    %2 = arith.subf %0, %1 : vector<4x16x16xf32>
    %3 = math.absf %2 : vector<4x16x16xf32>
    %4 = vector.shape_cast %3 : vector<4x16x16xf32> to vector<1x4x16x16xf32>
    %cst = arith.constant dense<0.000000e+00> : vector<1xf32>
    %5 = vector.multi_reduction <add>, %4, %cst [1, 2, 3] : vector<1x4x16x16xf32> to vector<1xf32>
    %6 = vector.shape_cast %5 : vector<1xf32> to vector<1x1x1x1xf32>
    %7 = vector.extract %6[0, 0, 0, 0] : f32 from vector<1x1x1x1xf32>
    %c4_i32 = arith.constant 4 : i32
    %8 = arith.muli %arg0, %c4_i32 : i32
    %9 = tpu.iota {dimensions = array<i32: 0>} : vector<4x1x1xi32>
    %10 = vector.broadcast %8 : i32 to vector<4x1x1xi32>
    %11 = arith.addi %9, %10 : vector<4x1x1xi32>
    %c8_i32 = arith.constant 8 : i32
    %12 = vector.broadcast %c8_i32 : i32 to vector<4x1x1xi32>
    %13 = arith.cmpi slt, %11, %12 : vector<4x1x1xi32>
    %14 = arith.extui %13 : vector<4x1x1xi1> to vector<4x1x1xi32>
    %15 = arith.sitofp %14 : vector<4x1x1xi32> to vector<4x1x1xf32>
    %16 = arith.mulf %0, %0 : vector<4x16x16xf32>
    %17 = arith.mulf %1, %1 : vector<4x16x16xf32>
    %18 = arith.mulf %0, %1 : vector<4x16x16xf32>
    %19 = tpu.concatenate %0, %1, %16, %17, %18 in 0 : vector<4x16x16xf32>, vector<4x16x16xf32>, vector<4x16x16xf32>, vector<4x16x16xf32>, vector<4x16x16xf32> -> vector<20x16x16xf32>
    %20 = vector.shape_cast %19 : vector<20x16x16xf32> to vector<320x16xf32>
    %c0_5 = arith.constant 0 : index
    %c0_6 = arith.constant 0 : index
    %21 = vector.load %arg1[%c0_5, %c0_6] : memref<16x16xf32, #tpu.memory_space<vmem>>, vector<16x16xf32>
    %cst_7 = arith.constant dense<0.000000e+00> : vector<320x16xf32>
    %22 = tpu.matmul %20, %21, %cst_7 {dimension_numbers = #tpu.dot_dimension_numbers<[1], [0], [0], [1], [0, 0, 1, 1], [], []>, precision = #tpu.contract_precision<fp32>} : vector<320x16xf32>, vector<16x16xf32>, vector<320x16xf32> -> vector<320x16xf32>
    %23 = vector.shape_cast %22 : vector<320x16xf32> to vector<20x16x16xf32>
    %24 = tpu.transpose %23, [0, 2, 1] : vector<20x16x16xf32> -> vector<20x16x16xf32>
    %25 = vector.shape_cast %24 : vector<20x16x16xf32> to vector<320x16xf32>
    %c0_8 = arith.constant 0 : index
    %c0_9 = arith.constant 0 : index
    %26 = vector.load %arg2[%c0_8, %c0_9] : memref<16x16xf32, #tpu.memory_space<vmem>>, vector<16x16xf32>
    %cst_10 = arith.constant dense<0.000000e+00> : vector<320x16xf32>
    %27 = tpu.matmul %25, %26, %cst_10 {dimension_numbers = #tpu.dot_dimension_numbers<[1], [0], [0], [1], [0, 0, 1, 1], [], []>, precision = #tpu.contract_precision<fp32>} : vector<320x16xf32>, vector<16x16xf32>, vector<320x16xf32> -> vector<320x16xf32>
    %28 = vector.shape_cast %27 : vector<320x16xf32> to vector<5x4x16x16xf32>
    %29 = vector.extract_strided_slice %28 {offsets = [0, 0, 0, 0], sizes = [1, 4, 16, 16], strides = [1, 1, 1, 1]} : vector<5x4x16x16xf32> to vector<1x4x16x16xf32>
    %30 = vector.shape_cast %29 : vector<1x4x16x16xf32> to vector<4x16x16xf32>
    %31 = vector.extract_strided_slice %28 {offsets = [1, 0, 0, 0], sizes = [1, 4, 16, 16], strides = [1, 1, 1, 1]} : vector<5x4x16x16xf32> to vector<1x4x16x16xf32>
    %32 = vector.shape_cast %31 : vector<1x4x16x16xf32> to vector<4x16x16xf32>
    %33 = arith.mulf %30, %30 : vector<4x16x16xf32>
    %34 = arith.mulf %32, %32 : vector<4x16x16xf32>
    %35 = arith.mulf %30, %32 : vector<4x16x16xf32>
    %cst_11 = arith.constant 2.000000e+00 : f32
    %36 = vector.broadcast %cst_11 : f32 to vector<4x16x16xf32>
    %37 = arith.mulf %36, %35 : vector<4x16x16xf32>
    %cst_12 = arith.constant 9.99999974E-5 : f32
    %38 = vector.broadcast %cst_12 : f32 to vector<4x16x16xf32>
    %39 = arith.addf %37, %38 : vector<4x16x16xf32>
    %40 = vector.extract_strided_slice %28 {offsets = [4, 0, 0, 0], sizes = [1, 4, 16, 16], strides = [1, 1, 1, 1]} : vector<5x4x16x16xf32> to vector<1x4x16x16xf32>
    %41 = vector.shape_cast %40 : vector<1x4x16x16xf32> to vector<4x16x16xf32>
    %42 = arith.subf %41, %35 : vector<4x16x16xf32>
    %cst_13 = arith.constant 2.000000e+00 : f32
    %43 = vector.broadcast %cst_13 : f32 to vector<4x16x16xf32>
    %44 = arith.mulf %43, %42 : vector<4x16x16xf32>
    %cst_14 = arith.constant 8.99999984E-4 : f32
    %45 = vector.broadcast %cst_14 : f32 to vector<4x16x16xf32>
    %46 = arith.addf %44, %45 : vector<4x16x16xf32>
    %47 = arith.mulf %39, %46 : vector<4x16x16xf32>
    %48 = arith.addf %33, %34 : vector<4x16x16xf32>
    %cst_15 = arith.constant 9.99999974E-5 : f32
    %49 = vector.broadcast %cst_15 : f32 to vector<4x16x16xf32>
    %50 = arith.addf %48, %49 : vector<4x16x16xf32>
    %51 = vector.extract_strided_slice %28 {offsets = [2, 0, 0, 0], sizes = [1, 4, 16, 16], strides = [1, 1, 1, 1]} : vector<5x4x16x16xf32> to vector<1x4x16x16xf32>
    %52 = vector.shape_cast %51 : vector<1x4x16x16xf32> to vector<4x16x16xf32>
    %53 = arith.subf %52, %33 : vector<4x16x16xf32>
    %54 = vector.extract_strided_slice %28 {offsets = [3, 0, 0, 0], sizes = [1, 4, 16, 16], strides = [1, 1, 1, 1]} : vector<5x4x16x16xf32> to vector<1x4x16x16xf32>
    %55 = vector.shape_cast %54 : vector<1x4x16x16xf32> to vector<4x16x16xf32>
    %56 = arith.subf %55, %34 : vector<4x16x16xf32>
    %57 = arith.addf %53, %56 : vector<4x16x16xf32>
    %cst_16 = arith.constant 8.99999984E-4 : f32
    %58 = vector.broadcast %cst_16 : f32 to vector<4x16x16xf32>
    %59 = arith.addf %57, %58 : vector<4x16x16xf32>
    %60 = arith.mulf %50, %59 : vector<4x16x16xf32>
    %61 = tpu.reciprocal %60 {approx = true} : vector<4x16x16xf32> -> vector<4x16x16xf32>
    %62 = arith.mulf %60, %61 : vector<4x16x16xf32>
    %cst_17 = arith.constant 2.000000e+00 : f32
    %63 = vector.broadcast %cst_17 : f32 to vector<4x16x16xf32>
    %64 = arith.subf %63, %62 : vector<4x16x16xf32>
    %65 = arith.mulf %61, %64 : vector<4x16x16xf32>
    %66 = arith.mulf %47, %65 : vector<4x16x16xf32>
    %67 = vector.broadcast %15 : vector<4x1x1xf32> to vector<4x16x16xf32>
    %68 = arith.mulf %66, %67 : vector<4x16x16xf32>
    %69 = vector.shape_cast %68 : vector<4x16x16xf32> to vector<1x4x16x16xf32>
    %cst_18 = arith.constant dense<0.000000e+00> : vector<1xf32>
    %70 = vector.multi_reduction <add>, %69, %cst_18 [1, 2, 3] : vector<1x4x16x16xf32> to vector<1xf32>
    %71 = vector.shape_cast %70 : vector<1xf32> to vector<1x1x1x1xf32>
    %72 = vector.extract %71[0, 0, 0, 0] : f32 from vector<1x1x1x1xf32>
    %73 = tpu.iota {dimensions = array<i32: 0>} : vector<8x128xi32>
    %c0_i32 = arith.constant 0 : i32
    %74 = vector.broadcast %c0_i32 : i32 to vector<8x128xi32>
    %75 = arith.cmpi eq, %73, %74 : vector<8x128xi32>
    %c1_i32 = arith.constant 1 : i32
    %76 = vector.broadcast %c1_i32 : i32 to vector<8x128xi32>
    %77 = arith.cmpi eq, %73, %76 : vector<8x128xi32>
    %cst_19 = arith.constant 0.000000e+00 : f32
    %78 = vector.broadcast %7 : f32 to vector<8x128xf32>
    %79 = vector.broadcast %cst_19 : f32 to vector<8x128xf32>
    %80 = arith.select %77, %78, %79 : vector<8x128xi1>, vector<8x128xf32>
    %81 = vector.broadcast %72 : f32 to vector<8x128xf32>
    %82 = arith.select %75, %81, %80 : vector<8x128xi1>, vector<8x128xf32>
    %c0_20 = arith.constant 0 : index
    %c0_21 = arith.constant 0 : index
    %c0_22 = arith.constant 0 : index
    %83 = vector.load %arg5[%c0_20, %c0_21, %c0_22] : memref<1x8x128xf32, #tpu.memory_space<vmem>>, vector<1x8x128xf32>
    %84 = vector.shape_cast %83 : vector<1x8x128xf32> to vector<8x128xf32>
    %85 = vector.shape_cast %82 : vector<8x128xf32> to vector<1x8x128xf32>
    tpu.vector_store %arg5[%c0_20, %c0_21, %c0_22], %85 {strides = array<i32>} : memref<1x8x128xf32, #tpu.memory_space<vmem>>, vector<1x8x128xf32>,
    return
  }
  func.func @transform_0(%arg0: i32) -> (i32, i32) {
    %c0_i32 = arith.constant 0 : i32
    %c0_i32_0 = arith.constant 0 : i32
    %c0_i32_1 = arith.constant 0 : i32
    return %c0_i32, %c0_i32_0 : i32, i32
  }
  func.func @transform_1(%arg0: i32) -> (i32, i32) {
    %c0_i32 = arith.constant 0 : i32
    %c0_i32_0 = arith.constant 0 : i32
    %c0_i32_1 = arith.constant 0 : i32
    return %c0_i32, %c0_i32_0 : i32, i32
  }
  func.func @transform_2(%arg0: i32) -> (i32, i32, i32) {
    %c0_i32 = arith.constant 0 : i32
    %c0_i32_0 = arith.constant 0 : i32
    %c0_i32_1 = arith.constant 0 : i32
    return %arg0, %c0_i32, %c0_i32_0 : i32, i32, i32
  }
  func.func @transform_3(%arg0: i32) -> (i32, i32, i32) {
    %c0_i32 = arith.constant 0 : i32
    %c0_i32_0 = arith.constant 0 : i32
    %c0_i32_1 = arith.constant 0 : i32
    return %arg0, %c0_i32, %c0_i32_0 : i32, i32, i32
  }
  func.func @transform_4(%arg0: i32) -> (i32, i32, i32) {
    %c0_i32 = arith.constant 0 : i32
    %c0_i32_0 = arith.constant 0 : i32
    %c0_i32_1 = arith.constant 0 : i32
    return %arg0, %c0_i32, %c0_i32_0 : i32, i32, i32
  }
}

</mosaic_0001>

<bundles_post_ra>
// kernel: tpu_custom_call.1
= control target key start
LH: loop header
LB: loop body
LE: loop exit
PB: predicated region body
PF: predicated region fallthrough
CT: control target
= control target key end

     0   :  { %s6450_s0 = inlined_call_operand.hbm [shape: f32[16,16], index: 0, kind: input, shape index: {}]   ;;  %s6451_s1 = inlined_call_operand.hbm [shape: f32[16,16], index: 1, kind: input, shape index: {}]   ;;  %s6452_s2 = inlined_call_operand.hbm [shape: f32[8,16,16], index: 2, kind: input, shape index: {}]   ;;  %s6453_s3 = inlined_call_operand.hbm [shape: f32[8,16,16], index: 3, kind: input, shape index: {}]   ;;  %s6454_s4 = inlined_call_operand.hbm [shape: f32[2,8,128], index: 4, kind: output, shape index: {}]  }
   0x1   :  { %6520 = sst [smem:[#allocation71_spill]] %s6450_s0 }
   0x2   :  { %6521 = sst [smem:[#allocation72_spill]] %s6451_s1 }
   0x3   :  { %6522 = sst [smem:[#allocation73_spill]] %s6452_s2 }
   0x4   :  { %9 = vsyncpa [#allocation3], 0 }
   0x5   :  { %10 = vsyncpa [#allocation6], 0 }
   0x6   :  { %11 = vsyncpa [#allocation4], 0 }
   0x7   :  { %13 = vsyncpa [#allocation4 + $0x1], 0  ;;  %s4713_s15 = smov 0   ;;  %s4715_s16 = smov 0  }
   0x8   :  { %s4717_s17 = smov 0   ;;  %s4719_s18 = smov 0  }
   0x9 LB: > { %s4734_s19 = sadd.s32 4294967295, %s4681_s18   ;;  %s4344_s20 = sadd.s32 4294967294, %s4681_s18   ;;  %s4681_s18 = sphi %s4719_s18, %s6743_s18   ;;  %s4677_s17 = sphi %s4717_s17, %s6742_s17   ;;  %s4673_s16 = sphi %s4715_s16, %s6741_s16   ;;  %s4669_s15 = sphi %s4713_s15, %s6740_s15  }
   0xa   : > { %p81_p0 = scmp.ne.s32.totalorder %s4673_s16, %s4669_s15  ;;  %p6460_p1 = scmp.eq.s32.totalorder %s4734_s19, 0 }
   0xb   : > { %p131_p2 = scmp.eq.s32.totalorder %s4734_s19, 1  ;;  %p137_p3 = scmp.eq.s32.totalorder %s4344_s20, 1 }
   0xc   : > { %p4743_p4 = por %p6460_p1, %p81_p0  ;;  %p4345_p5 = scmp.ge.s32.totalorder %s4681_s18, 1 }
   0xd   : > { %p4748_p6 = por %p137_p3, %p81_p0  ;;  %p144_p7 = scmp.lt.s32.totalorder %s4681_s18, 3 }
   0xe   : > { %s6525_s0 = sld [smem:[#allocation71_spill]]  ;;  %s4683_s27 = smov [#allocation2]  }
   0xf   : > { %p4756_p8 = pnand %p4345_p5, %p144_p7  ;;  %s157_s28 = sshll.u32 %s4683_s27, 4  ;;  %s158_s28 = int_to_ptr.vmem [resolvable:$true] %s157_s28 }
  0x10   : > { %s4770_s30 = sadd.s32 1, %s4681_s18   ;;  %s6455_s5 = smov 128  }
  0x11   : > { %p4394_p9 = pneg %p4756_p8  ;;  %s6457_s6 = smov 8  }
  0x12   : > { %s65_s7 = ssub.s32 %s4681_s18, %s4770_s30  ;;  %s68_s8 = sadd.s32 1, %s4677_s17 }
  0x13   : > { %p4764_p10 = pnand %p4394_p9, %p6460_p1  ;;  %p66_p12 = scmp.eq.s32.totalorder %s65_s7, 0 }
  0x14   : > { %s155_s25 = sshll.u32 %s6525_s0, 4  ;;  %p75_p13 = scmp.ne.s32.totalorder %s4677_s17, %s4673_s16  ;;  %s156_s25 = int_to_ptr.hbm [resolvable:$true] %s155_s25 }
  0x15   : > { %4397 = dma.hbm_to_vmem [thread:$0]  (!%p4764_p10), %s156_s25, 256, %s158_s28, [#allocation3], %s6455_s5, %s6455_s5, %s6457_s6  }
  0x16   : > { %p76_p0 = scmp.eq.s32.totalorder %s4681_s18, 0  ;;  %p4414_p3 = scmp.lt.s32.totalorder %s4681_s18, 2 }
  0x17   : > { %s4785_s9 = scalar_select %p66_p12, %s4677_s17, %s68_s8  }
  0x18   : > { %p77_p5 = por %p76_p0, %p75_p13  ;;  %p4789_p7 = por %p131_p2, %p75_p13 }
  0x19   : > { %6528 = sst [smem:[#allocation14_spill]] %s4785_s9  ;;  %s185_s11 = sand.u32 1, %s4681_s18  }
  0x1a   : > { %s187_s12 = sand.u32 1, %s4677_s17   ;;  %s6459_s14 = sshll.u32 %s4681_s18, 6 }
  0x1b   : > { %s4795_s13 = sshll.u32 %s187_s12, 6  ;;  %s6530_s2 = sld [smem:[#allocation73_spill]] }
  0x1c   : > { %s189_s25 = scalar_lea.vmem [#allocation7], %s4795_s13  ;;  %p4806_p2 = pnand %p4414_p3, %p77_p5 }
  0x1d   : > { %s198_s27 = sshll.u32 %s189_s25, 4  ;;  %s6532_s1 = sld [smem:[#allocation72_spill]]  ;;  %s199_s27 = int_to_ptr.vmem [resolvable:$true] %s198_s27 }
  0x1e   : > { %s4813_s6 = scalar_lea.sflag [#allocation3], %s185_s11  ;;  %p4521_p12 = pneg %p4806_p2 }
  0x21   : > { %s195_s24 = scalar_lea.hbm %s6530_s2, %s6459_s14  ;;  %s4524_s8 = scalar_lea.hbm %s6530_s2, 128 }
  0x22   : > { %s196_s28 = sshll.u32 %s195_s24, 4  ;;  %s197_s28 = int_to_ptr.hbm [resolvable:$true] %s196_s28 }
  0x23   : > { %s169_s5 = sshll.u32 %s6532_s1, 4  ;;  %s4517_s20 = sshra.s32 %s197_s28, 4  ;;  %s170_s5 = int_to_ptr.hbm [resolvable:$true] %s169_s5  ;;  %s4518_s20 = int_to_ptr.hbm [resolvable:$true] %s4517_s20 }
  0x24   : > { %s4519_s23 = scalar_lea.hbm %s4518_s20, 64  ;;  %p4525_p3 = scmp.lt.s32.totalorder %s4518_s20, %s6530_s2 }
  0x25   : > { %p4520_p9 = scmp.ne.s32.totalorder %s4518_s20, %s4519_s23  ;;  %p4526_p5 = scmp.lt.s32.totalorder %s4524_s8, %s4519_s23 }
  0x27   : > { %p4522_p13 = pnand %p4521_p12, %p4520_p9  ;;  %p4527_p11 = por %p4526_p5, %p4525_p3 }
  0x29   : > { %p4523_p0 = pneg %p4522_p13 }
  0x2b   : > { %p4528_p1 = pnand %p4527_p11, %p4523_p0 }
  0x2d   : > { %4531 = shalt.err (!%p4528_p1)
}
  0x2e   : > { %s6533_s11 = smov 8   ;;  %s6534_s0 = smov 128  }
  0x2f   : > { %4404 = dma.hbm_to_vmem [thread:$0]  (!%p4806_p2), %s197_s28, 1024, %s199_s27, %s4813_s6, %s6534_s0, %s6534_s0, %s6533_s11  }
  0x30   : > { %s4686_s24 = smov [#allocation5]   ;;  %s6535_s14 = sshll.u32 %s4681_s18, 6 }
  0x31   : > { %s171_s25 = sshll.u32 %s4686_s24, 4  ;;  %s218_s8 = scalar_lea.hbm %s6453_s3, %s6535_s14  ;;  %s172_s25 = int_to_ptr.vmem [resolvable:$true] %s171_s25 }
  0x32   : > { %4400 = dma.hbm_to_vmem [thread:$0]  (!%p4764_p10), %s170_s5, 256, %s172_s25, [#allocation6], %s6534_s0, %s6534_s0, %s6533_s11  }
  0x33   : > { %s219_s12 = sshll.u32 %s218_s8, 4  ;;  %s212_s1 = scalar_lea.vmem [#allocation8], %s4795_s13  ;;  %s220_s12 = int_to_ptr.hbm [resolvable:$true] %s219_s12 }
  0x34   : > { %s221_s2 = sshll.u32 %s212_s1, 4  ;;  %s4577_s9 = sshra.s32 %s220_s12, 4  ;;  %s222_s2 = int_to_ptr.vmem [resolvable:$true] %s221_s2  ;;  %s4578_s9 = int_to_ptr.hbm [resolvable:$true] %s4577_s9 }
  0x35   : > { %s4579_s27 = scalar_lea.hbm %s4578_s9, 64  ;;  %s4584_s29 = scalar_lea.hbm %s6453_s3, 128 }
  0x36   : > { %p4580_p1 = scmp.ne.s32.totalorder %s4578_s9, %s4579_s27  ;;  %p4585_p10 = scmp.lt.s32.totalorder %s4578_s9, %s6453_s3 }
  0x37   : > { %p4586_p13 = scmp.lt.s32.totalorder %s4584_s29, %s4579_s27 }
  0x38   : > { %p4582_p11 = pnand %p4580_p1, %p4521_p12 }
  0x39   : > { %p4587_p0 = por %p4586_p13, %p4585_p10 }
  0x3a   : > { %p4583_p9 = pneg %p4582_p11 }
  0x3c   : > { %p4588_p3 = pnand %p4587_p0, %p4583_p9 }
  0x3e   : > { %4591 = shalt.err (!%p4588_p3)
}
  0x3f   : > { %4407 = dma.hbm_to_vmem [thread:$0]  (!%p4806_p2), %s220_s12, 1024, %s222_s2, %s4813_s6, %s6534_s0, %s6534_s0, %s6533_s11  }
  0x40   : > { %233 = sbr.rel (%p4756_p8) target bundleno = 1685 (0x695), region = 36 }
  0x45   : > { %p6536_p12 = scmp.eq.s32.totalorder %s4734_s19, 0 }
  0x47   : > { %4652 = dma.done.wait (%p6536_p12), [#allocation3], 256   ;;  %p6537_p5 = pmov %p6536_p12 }
  0x49   : > { %4654 = vsyncadd (%p6537_p5), [#allocation3], 4294967040  ;;  %p6538_p1 = pmov %p6537_p5 }
  0x4b   : > { %4656 = dma.done.wait (%p6538_p1), [#allocation6], 256   ;;  %p6539_p11 = pmov %p6538_p1 }
  0x4c   : > { %s245_s1 = sand.u32 1, %s4734_s19   ;;  %s4870_s0 = sand.u32 1, %s4673_s16  }
  0x4d   : > { %4658 = vsyncadd (%p6539_p11), [#allocation6], 4294967040  ;;  %s4360_s2 = sshll.u32 %s4870_s0, 6  ;;  %s246_s26 = scalar_lea.sflag [#allocation3], %s245_s1 }
  0x4e   : > { %s4875_s5 = scalar_lea.vmem [#allocation7], %s4360_s2 }
  0x4f   : > { %4660 = dma.done.wait (%p4743_p4), %s246_s26, 2048  }
  0x50   : > { %4662 = vsyncadd (%p4743_p4), %s246_s26, 4294965248  ;;  %vm324_vm0 = vcmask 130048   ;;  %v391_v0 = vld [vmem:[#allocation2 + $0x8] sm:$0xff]  ;;  %v390_v1 = vld [vmem:[#allocation2] sm:$0xff]  ;;  %s4951_s21 = scalar_lea.vmem [#allocation8], %s4360_s2  ;;  %s4363_s6 = sshll.u32 %s4734_s19, 2 }
  0x51   : > { %v4882_v2 = vld [vmem:[%s4875_s5] sm:$0xff]  ;;  %v526_v3 = vand.u32 4294901760, %v391_v0  ;;  %v528_v4 = vand.u32 4294901760, %v390_v1  ;;  %v4887_v6 = vld [vmem:[%s4875_s5 + $0x8] sm:$0xff]  ;;  %v4894_v9 = vld [vmem:[%s4875_s5 + $0x10] sm:$0xff]  ;;  %s4362_s9 = sshll.u32 %s4870_s0, 3 }
  0x52   : > { %v393_v5 = vsel %vm324_vm0, %v4882_v2, 0  ;;  %v396_v8 = vsel %vm324_vm0, %v4887_v6, 0  ;;  %v399_v17 = vsel %vm324_vm0, %v4894_v9, 0  ;;  %v4905_v27 = vld [vmem:[%s4875_s5 + $0x18] sm:$0xff]  ;;  %v4914_v34 = vld [vmem:[%s4875_s5 + $0x20] sm:$0xff]  ;;  %v4923_v41 = vld [vmem:[%s4875_s5 + $0x28] sm:$0xff] }
  0x53   : > { %v4889_v7 = vand.u32 4294901760, %v393_v5  ;;  %v866_v10 = vsub.f32 %v391_v0, %v526_v3  ;;  %527 = vmatpush.msra.mxu0 %v526_v3  ;;  %v872_v11 = vsub.f32 %v390_v1, %v528_v4  ;;  %1274 = vmatpush.msra.mxu3 %v526_v3  ;;  %v4896_v12 = vand.u32 4294901760, %v396_v8  ;;  %v4932_v48 = vld [vmem:[%s4875_s5 + $0x30] sm:$0xff]  ;;  %v4941_v55 = vld [vmem:[%s4875_s5 + $0x38] sm:$0xff]  ;;  %v4954_v62 = vld [vmem:[%s4951_s21] sm:$0xff]  ;;  %s4369_s13 = sshll.u32 %s4734_s19, 3 }
  0x54   : > { %v4902_v23 = vand.u32 4294901760, %v399_v17  ;;  %v402_v30 = vsel %vm324_vm0, %v4905_v27, 0  ;;  %v405_v37 = vsel %vm324_vm0, %v4914_v34, 0  ;;  %v408_v44 = vsel %vm324_vm0, %v4923_v41, 0  ;;  %s4230_s23 = scalar_lea.hbm %s6454_s4, %s4369_s13  ;;  %s289_s8 = scalar_lea.vmem [#allocation9], %s4362_s9 }
  0x55   : > { %v531_v13 = vsub.f32 %v393_v5, %v4889_v7  ;;  %1054 = vmatpush.msra.mxu2 %v866_v10  ;;  %529 = vmatpush.msra.mxu0 %v528_v4  ;;  %v867_v14 = vand.u32 4294901760, %v866_v10  ;;  %v873_v15 = vand.u32 4294901760, %v872_v11  ;;  %v539_v16 = vsub.f32 %v396_v8, %v4896_v12  ;;  %v4963_v8 = vld [vmem:[%s4951_s21 + $0x8] sm:$0xff]  ;;  %s4232_s12 = sshll.u32 %s289_s8, 4  ;;  %s4234_s27 = sshll.u32 %s4230_s23, 4  ;;  %s4233_s12 = int_to_ptr.vmem [resolvable:$true] %s4232_s12  ;;  %s4235_s27 = int_to_ptr.hbm [resolvable:$true] %s4234_s27 }
  0x56   : > { %1276 = vmatpush.msra.mxu3 %v528_v4  ;;  %v547_v29 = vsub.f32 %v399_v17, %v4902_v23  ;;  %v4911_v33 = vand.u32 4294901760, %v402_v30  ;;  %v4920_v40 = vand.u32 4294901760, %v405_v37  ;;  %v4929_v47 = vand.u32 4294901760, %v408_v44  ;;  %v4972_v17 = vld [vmem:[%s4951_s21 + $0x10] sm:$0xff]  ;;  %s4220_s19 = scalar_lea.sflag [#allocation4], %s4870_s0  ;;  %s4621_s24 = sshra.s32 %s4235_s27, 4  ;;  %s4622_s24 = int_to_ptr.hbm [resolvable:$true] %s4621_s24 }
  0x57   : > { %v532_v18 = vand.u32 4294901760, %v531_v13  ;;  %1057 = vmatpush.msra.mxu2 %v872_v11  ;;  %v868_v19 = vsub.f32 %v866_v10, %v867_v14  ;;  %1535 = vmatpush.msrb.mxu0 %v867_v14  ;;  %v874_v20 = vsub.f32 %v872_v11, %v873_v15  ;;  %v540_v22 = vand.u32 4294901760, %v539_v16  ;;  %s4623_s29 = scalar_lea.hbm %s4622_s24, 8  ;;  %s4627_s1 = scalar_lea.hbm %s6454_s4, 16 }
  0x58   : > { %1060 = vmatmul.f32.vlgmr.msra.gmra.mxu2 %v531_v13  ;;  %v548_v32 = vand.u32 4294901760, %v547_v29  ;;  %v555_v36 = vsub.f32 %v402_v30, %v4911_v33  ;;  %v563_v43 = vsub.f32 %v405_v37, %v4920_v40  ;;  %v571_v50 = vsub.f32 %v408_v44, %v4929_v47  ;;  %v4999_v44 = vld [vmem:[%s4951_s21 + $0x28] sm:$0xff]  ;;  %p4624_p4 = scmp.ne.s32.totalorder %s4622_s24, %s4623_s29  ;;  %p4628_p9 = scmp.lt.s32.totalorder %s4622_s24, %s6454_s4 }
  0x59   : > { %v533_v21 = vsub.f32 %v531_v13, %v532_v18  ;;  %1280 = vmatmul.f32.vlgmr.msra.gmra.mxu3 %v532_v18  ;;  %v869_v24 = vand.u32 4294901760, %v868_v19  ;;  %v875_v25 = vand.u32 4294901760, %v874_v20  ;;  %1539 = vmatpush.msrb.mxu0 %v873_v15  ;;  %v541_v28 = vsub.f32 %v539_v16, %v540_v22  ;;  %p4629_p10 = scmp.lt.s32.totalorder %s4627_s1, %s4623_s29 }
  0x5a   : > { %v549_v35 = vsub.f32 %v547_v29, %v548_v32  ;;  %v556_v39 = vand.u32 4294901760, %v555_v36  ;;  %v564_v46 = vand.u32 4294901760, %v563_v43  ;;  %v411_v51 = vsel %vm324_vm0, %v4932_v48, 0  ;;  %p4625_p8 = pnand %p4624_p4, %p4789_p7 }
  0x5b   : > { %v534_v26 = vand.u32 4294901760, %v533_v21  ;;  %870 = vmatpush.msra.mxu1 %v869_v24  ;;  %v542_v31 = vand.u32 4294901760, %v541_v28  ;;  %v572_v53 = vand.u32 4294901760, %v571_v50  ;;  %v4938_v54 = vand.u32 4294901760, %v411_v51  ;;  %p4630_p13 = por %p4629_p10, %p4628_p9 }
  0x5c   : > { %v550_v38 = vand.u32 4294901760, %v549_v35  ;;  %v557_v42 = vsub.f32 %v555_v36, %v556_v39  ;;  %v565_v49 = vsub.f32 %v563_v43, %v564_v46  ;;  %v414_v58 = vsel %vm324_vm0, %v4941_v55, 0  ;;  %v4990_v35 = vld [vmem:[%s4951_s21 + $0x20] sm:$0xff]  ;;  %p4626_p2 = pneg %p4625_p8 }
  0x5d   : > { %535 = vmatmul.f32.vlgmr.msra.gmra.mxu0 %v534_v26  ;;  %876 = vmatpush.msra.mxu1 %v875_v25  ;;  %v573_v56 = vsub.f32 %v571_v50, %v572_v53  ;;  %v579_v57 = vsub.f32 %v411_v51, %v4938_v54  ;;  %v4947_v61 = vand.u32 4294901760, %v414_v58  ;;  %v417_v1 = vsel %vm324_vm0, %v4954_v62, 0  ;;  %v4981_v25 = vld [vmem:[%s4951_s21 + $0x18] sm:$0xff] }
  0x5e   : > { %878 = vmatmul.f32.vlgmr.msra.gmra.mxu1 %v4889_v7  ;;  %v558_v45 = vand.u32 4294901760, %v557_v42  ;;  %v566_v52 = vand.u32 4294901760, %v565_v49  ;;  %v4960_v5 = vand.u32 4294901760, %v417_v1  ;;  %v420_v13 = vsel %vm324_vm0, %v4963_v8, 0  ;;  %p4631_p0 = pnand %p4630_p13, %p4626_p2 }
  0x5f   : > { %1716 = vmatpush.msrb.mxu1 %v526_v3  ;;  %v574_v59 = vand.u32 4294901760, %v573_v56  ;;  %v580_v60 = vand.u32 4294901760, %v579_v57  ;;  %v587_v0 = vsub.f32 %v414_v58, %v4947_v61  ;;  %v423_v20 = vsel %vm324_vm0, %v4972_v17, 0 }
  0x60   : > { %1065 = vmatmul.f32.gmra.mxu2 %v539_v16  ;;  %v595_v11 = vsub.f32 %v417_v1, %v4960_v5  ;;  %v4969_v16 = vand.u32 4294901760, %v420_v13  ;;  %v4978_v24 = vand.u32 4294901760, %v423_v20  ;;  %v432_v49 = vsel %vm324_vm0, %v4999_v44, 0 }
  0x61   : > { %1286 = vmatmul.f32.gmra.mxu3 %v540_v22  ;;  %1718 = vmatpush.msrb.mxu1 %v528_v4  ;;  %v581_v63 = vsub.f32 %v579_v57, %v580_v60  ;;  %v588_v4 = vand.u32 4294901760, %v587_v0 }
  0x62   : > { %v596_v15 = vand.u32 4294901760, %v595_v11  ;;  %v603_v19 = vsub.f32 %v420_v13, %v4969_v16  ;;  %v611_v28 = vsub.f32 %v423_v20, %v4978_v24 }
  0x63   : > { %v582_v3 = vand.u32 4294901760, %v581_v63  ;;  %v589_v10 = vsub.f32 %v587_v0, %v588_v4 }
  0x64   : > { %v597_v18 = vsub.f32 %v595_v11, %v596_v15  ;;  %v604_v22 = vand.u32 4294901760, %v603_v19 }
  0x65   : > { %543 = vmatmul.f32.gmra.mxu0 %v542_v31  ;;  %v590_v14 = vand.u32 4294901760, %v589_v10  ;;  %v612_v31 = vand.u32 4294901760, %v611_v28 }
  0x66   : > { %882 = vmatmul.f32.gmra.mxu1 %v4896_v12  ;;  %v598_v21 = vand.u32 4294901760, %v597_v18  ;;  %v605_v26 = vsub.f32 %v603_v19, %v604_v22 }
  0x68   : > { %1070 = vmatmul.f32.gmra.mxu2 %v547_v29  ;;  %v426_v29 = vsel %vm324_vm0, %v4981_v25, 0  ;;  %v606_v30 = vand.u32 4294901760, %v605_v26  ;;  %v367_v26 = vmul.f32 %v4887_v6, %v4887_v6 }
  0x69   : > { %1292 = vmatmul.f32.gmra.mxu3 %v548_v32  ;;  %v4987_v32 = vand.u32 4294901760, %v426_v29 }
  0x6b   : > { %v619_v37 = vsub.f32 %v426_v29, %v4987_v32 }
  0x6d   : > { %551 = vmatmul.f32.gmra.mxu0 %v550_v38  ;;  %v429_v38 = vsel %vm324_vm0, %v4990_v35, 0  ;;  %v620_v42 = vand.u32 4294901760, %v619_v37 }
  0x6e   : > { %886 = vmatmul.f32.gmra.mxu1 %v4902_v23 }
  0x70   : > { %1075 = vmatmul.f32.gmra.mxu2 %v555_v36  ;;  %v613_v36 = vsub.f32 %v611_v28, %v612_v31 }
  0x71   : > { %1298 = vmatmul.f32.gmra.mxu3 %v556_v39 }
  0x72   : > { %v614_v39 = vand.u32 4294901760, %v613_v36 }
  0x75   : > { %559 = vmatmul.f32.gmra.mxu0 %v558_v45  ;;  %v621_v45 = vsub.f32 %v619_v37, %v620_v42 }
  0x76   : > { %890 = vmatmul.f32.gmra.mxu1 %v4911_v33 }
  0x78   : > { %1080 = vmatmul.f32.gmra.mxu2 %v563_v43  ;;  %v4996_v43 = vand.u32 4294901760, %v429_v38 }
  0x79   : > { %1304 = vmatmul.f32.gmra.mxu3 %v564_v46 }
  0x7a   : > { %v627_v46 = vsub.f32 %v429_v38, %v4996_v43  ;;  %v368_v38 = vmul.f32 %v4894_v9, %v4894_v9 }
  0x7c   : > { %v628_v51 = vand.u32 4294901760, %v627_v46 }
  0x7d   : > { %567 = vmatmul.f32.gmra.mxu0 %v566_v52  ;;  %v5005_v52 = vand.u32 4294901760, %v432_v49 }
  0x7e   : > { %894 = vmatmul.f32.gmra.mxu1 %v4920_v40  ;;  %v629_v56 = vsub.f32 %v627_v46, %v628_v51 }
  0x80   : > { %1085 = vmatmul.f32.gmra.mxu2 %v571_v50  ;;  %v622_v50 = vand.u32 4294901760, %v621_v45  ;;  %v447_v45 = vsel %vm324_vm0, %v368_v38, 0 }
  0x81   : > { %1310 = vmatmul.f32.gmra.mxu3 %v572_v53  ;;  %v5008_v53 = vld [vmem:[%s4951_s21 + $0x30] sm:$0xff] }
  0x82   : > { %v435_v58 = vsel %vm324_vm0, %v5008_v53, 0 }
  0x83   : > { %v5014_v63 = vand.u32 4294901760, %v435_v58 }
  0x85   : > { %575 = vmatmul.f32.gmra.mxu0 %v574_v59  ;;  %v630_v59 = vand.u32 4294901760, %v629_v56  ;;  %v369_v56 = vmul.f32 %v4905_v27, %v4905_v27 }
  0x86   : > { %898 = vmatmul.f32.gmra.mxu1 %v4929_v47 }
  0x88   : > { %1090 = vmatmul.f32.gmra.mxu2 %v579_v57  ;;  %v635_v57 = vsub.f32 %v432_v49, %v5005_v52 }
  0x89   : > { %1316 = vmatmul.f32.gmra.mxu3 %v580_v60 }
  0x8a   : > { %v636_v60 = vand.u32 4294901760, %v635_v57 }
  0x8c   : > { %v637_v1 = vsub.f32 %v635_v57, %v636_v60 }
  0x8d   : > { %583 = vmatmul.f32.gmra.mxu0 %v582_v3  ;;  %v643_v3 = vsub.f32 %v435_v58, %v5014_v63 }
  0x8e   : > { %902 = vmatmul.f32.gmra.mxu1 %v4938_v54  ;;  %v638_v10 = vand.u32 4294901760, %v637_v1 }
  0x90   : > { %1095 = vmatmul.f32.gmra.mxu2 %v587_v0  ;;  %v5017_v0 = vld [vmem:[%s4951_s21 + $0x38] sm:$0xff] }
  0x91   : > { %1322 = vmatmul.f32.gmra.mxu3 %v588_v4  ;;  %v438_v4 = vsel %vm324_vm0, %v5017_v0, 0 }
  0x92   : > { %v5023_v13 = vand.u32 4294901760, %v438_v4 }
  0x94   : > { %v651_v18 = vsub.f32 %v438_v4, %v5023_v13  ;;  %v450_v4 = vsel %vm324_vm0, %v369_v56, 0 }
  0x95   : > { %591 = vmatmul.f32.gmra.mxu0 %v590_v14  ;;  %v366_v14 = vmul.f32 %v4882_v2, %v4882_v2 }
  0x96   : > { %906 = vmatmul.f32.gmra.mxu1 %v4947_v61 }
  0x98   : > { %1100 = vmatmul.f32.gmra.mxu2 %v595_v11  ;;  %v644_v11 = vand.u32 4294901760, %v643_v3 }
  0x99   : > { %1328 = vmatmul.f32.gmra.mxu3 %v596_v15 }
  0x9a   : > { %v645_v15 = vsub.f32 %v643_v3, %v644_v11 }
  0x9c   : > { %v646_v20 = vand.u32 4294901760, %v645_v15 }
  0x9d   : > { %599 = vmatmul.f32.gmra.mxu0 %v598_v21  ;;  %v652_v21 = vand.u32 4294901760, %v651_v18 }
  0x9e   : > { %910 = vmatmul.f32.gmra.mxu1 %v4960_v5 }
  0xa0   : > { %1105 = vmatmul.f32.gmra.mxu2 %v603_v19  ;;  %v441_v19 = vsel %vm324_vm0, %v366_v14, 0 }
  0xa1   : > { %1334 = vmatmul.f32.gmra.mxu3 %v604_v22  ;;  %v5030_v22 = vand.u32 4294901760, %v441_v19 }
  0xa3   : > { %v659_v29 = vsub.f32 %v441_v19, %v5030_v22 }
  0xa5   : > { %607 = vmatmul.f32.gmra.mxu0 %v606_v30  ;;  %v444_v30 = vsel %vm324_vm0, %v367_v26, 0  ;;  %v660_v36 = vand.u32 4294901760, %v659_v29 }
  0xa6   : > { %914 = vmatmul.f32.gmra.mxu1 %v4969_v16 }
  0xa8   : > { %1110 = vmatmul.f32.gmra.mxu2 %v611_v28  ;;  %v653_v28 = vsub.f32 %v651_v18, %v652_v21 }
  0xa9   : > { %1340 = vmatmul.f32.gmra.mxu3 %v612_v31 }
  0xaa   : > { %v654_v31 = vand.u32 4294901760, %v653_v28 }
  0xad   : > { %615 = vmatmul.f32.gmra.mxu0 %v614_v39  ;;  %v661_v39 = vsub.f32 %v659_v29, %v660_v36 }
  0xae   : > { %918 = vmatmul.f32.gmra.mxu1 %v4978_v24 }
  0xb0   : > { %1115 = vmatmul.f32.gmra.mxu2 %v619_v37  ;;  %v5037_v37 = vand.u32 4294901760, %v444_v30 }
  0xb1   : > { %1346 = vmatmul.f32.gmra.mxu3 %v620_v42 }
  0xb2   : > { %v667_v42 = vsub.f32 %v444_v30, %v5037_v37 }
  0xb4   : > { %v668_v49 = vand.u32 4294901760, %v667_v42 }
  0xb5   : > { %623 = vmatmul.f32.gmra.mxu0 %v622_v50  ;;  %v5044_v50 = vand.u32 4294901760, %v447_v45 }
  0xb6   : > { %922 = vmatmul.f32.gmra.mxu1 %v4987_v32  ;;  %v669_v1 = vsub.f32 %v667_v42, %v668_v49 }
  0xb8   : > { %1120 = vmatmul.f32.gmra.mxu2 %v627_v46  ;;  %v662_v46 = vand.u32 4294901760, %v661_v39  ;;  %v670_v14 = vand.u32 4294901760, %v669_v1 }
  0xb9   : > { %1352 = vmatmul.f32.gmra.mxu3 %v628_v51 }
  0xbd   : > { %631 = vmatmul.f32.gmra.mxu0 %v630_v59 }
  0xbe   : > { %926 = vmatmul.f32.gmra.mxu1 %v4996_v43 }
  0xc0   : > { %1125 = vmatmul.f32.gmra.mxu2 %v635_v57 }
  0xc1   : > { %1358 = vmatmul.f32.gmra.mxu3 %v636_v60 }
  0xc5   : > { %639 = vmatmul.f32.gmra.mxu0 %v638_v10 }
  0xc6   : > { %930 = vmatmul.f32.gmra.mxu1 %v5005_v52 }
  0xc8   : > { %1130 = vmatmul.f32.gmra.mxu2 %v643_v3  ;;  %v675_v3 = vsub.f32 %v447_v45, %v5044_v50 }
  0xc9   : > { %1364 = vmatmul.f32.gmra.mxu3 %v644_v11 }
  0xca   : > { %v676_v15 = vand.u32 4294901760, %v675_v3 }
  0xcc   : > { %v677_v30 = vsub.f32 %v675_v3, %v676_v15 }
  0xcd   : > { %647 = vmatmul.f32.gmra.mxu0 %v646_v20  ;;  %v370_v20 = vmul.f32 %v4914_v34, %v4914_v34 }
  0xce   : > { %934 = vmatmul.f32.gmra.mxu1 %v5014_v63 }
  0xd0   : > { %1135 = vmatmul.f32.gmra.mxu2 %v651_v18  ;;  %v5053_v18 = vand.u32 4294901760, %v450_v4 }
  0xd1   : > { %1370 = vmatmul.f32.gmra.mxu3 %v652_v21 }
  0xd5   : > { %655 = vmatmul.f32.gmra.mxu0 %v654_v31  ;;  %v683_v31 = vsub.f32 %v450_v4, %v5053_v18 }
  0xd6   : > { %938 = vmatmul.f32.gmra.mxu1 %v5023_v13 }
  0xd7   : > { %v684_v45 = vand.u32 4294901760, %v683_v31 }
  0xd8   : > { %1140 = vmatmul.f32.gmra.mxu2 %v659_v29 }
  0xd9   : > { %1376 = vmatmul.f32.gmra.mxu3 %v660_v36  ;;  %v453_v36 = vsel %vm324_vm0, %v370_v20, 0 }
  0xda   : > { %v536_v51 = vpop.f32.mrf.mxu0 }
  0xdb   : > { %v879_v57 = vpop.f32.mrf.mxu1  ;;  %v1061_v58 = vpop.f32.mrf.mxu2 }
  0xdc   : > { %v880_v59 = vadd.f32 %v879_v57, %v536_v51  ;;  %v1281_v60 = vpop.f32.mrf.mxu3  ;;  %v371_v51 = vmul.f32 %v4923_v41, %v4923_v41 }
  0xdd   : > { %663 = vmatmul.f32.gmra.mxu0 %v662_v46  ;;  %v5062_v46 = vand.u32 4294901760, %v453_v36 }
  0xde   : > { %v1062_v10 = vadd.f32 %v1061_v58, %v880_v59  ;;  %942 = vmatmul.f32.gmra.mxu1 %v5030_v22  ;;  %v456_v4 = vsel %vm324_vm0, %v371_v51, 0 }
  0xdf   : > { %v691_v1 = vsub.f32 %v453_v36, %v5062_v46 }
  0xe0   : > { %v5051_v11 = vadd.f32 %v1281_v60, %v1062_v10  ;;  %1145 = vmatmul.f32.gmra.mxu2 %v667_v42  ;;  %v678_v42 = vand.u32 4294901760, %v677_v30  ;;  %v685_v60 = vsub.f32 %v683_v31, %v684_v45 }
  0xe1   : > { %1382 = vmatmul.f32.gmra.mxu3 %v668_v49 }
  0xe2   : > { %v544_v19 = vpop.f32.mrf.mxu0 }
  0xe3   : > { %v883_v21 = vpop.f32.mrf.mxu1  ;;  %v1066_v26 = vpop.f32.mrf.mxu2 }
  0xe4   : > { %v884_v28 = vadd.f32 %v883_v21, %v544_v19  ;;  %v1287_v29 = vpop.f32.mrf.mxu3  ;;  %v5071_v19 = vand.u32 4294901760, %v456_v4  ;;  %v372_v21 = vmul.f32 %v4932_v48, %v4932_v48 }
  0xe5   : > { %671 = vmatmul.f32.gmra.mxu0 %v670_v14  ;;  %v686_v14 = vand.u32 4294901760, %v685_v60 }
  0xe6   : > { %v1067_v38 = vadd.f32 %v1066_v26, %v884_v28  ;;  %946 = vmatmul.f32.gmra.mxu1 %v5037_v37  ;;  %6540 = vst [vmem:[#allocation15_spill] sm:$0xff] %v5071_v19 }
  0xe8   : > { %v5060_v39 = vadd.f32 %v1287_v29, %v1067_v38  ;;  %1150 = vmatmul.f32.gmra.mxu2 %v675_v3  ;;  %v699_v38 = vsub.f32 %v456_v4, %v5071_v19 }
  0xe9   : > { %1388 = vmatmul.f32.gmra.mxu3 %v676_v15  ;;  %v692_v15 = vand.u32 4294901760, %v691_v1 }
  0xea   : > { %v552_v49 = vpop.f32.mrf.mxu0  ;;  %v700_v51 = vand.u32 4294901760, %v699_v38 }
  0xeb   : > { %v887_v56 = vpop.f32.mrf.mxu1  ;;  %v1071_v57 = vpop.f32.mrf.mxu2  ;;  %v693_v36 = vsub.f32 %v691_v1, %v692_v15 }
  0xec   : > { %v888_v58 = vadd.f32 %v887_v56, %v552_v49  ;;  %v1293_v59 = vpop.f32.mrf.mxu3 }
  0xed   : > { %679 = vmatmul.f32.gmra.mxu0 %v678_v42  ;;  %v459_v42 = vsel %vm324_vm0, %v372_v21, 0  ;;  %v694_v49 = vand.u32 4294901760, %v693_v36  ;;  %v374_v36 = vmul.f32 %v4954_v62, %v4954_v62 }
  0xee   : > { %v1072_v3 = vadd.f32 %v1071_v57, %v888_v58  ;;  %950 = vmatmul.f32.gmra.mxu1 %v5044_v50  ;;  %v5080_v56 = vand.u32 4294901760, %v459_v42  ;;  %v373_v58 = vmul.f32 %v4941_v55, %v4941_v55 }
  0xf0   : > { %v5069_v10 = vadd.f32 %v1293_v59, %v1072_v3  ;;  %1155 = vmatmul.f32.gmra.mxu2 %v683_v31  ;;  %6541 = vst [vmem:[#allocation16_spill] sm:$0xff] %v5080_v56  ;;  %v462_v21 = vsel %vm324_vm0, %v373_v58, 0 }
  0xf1   : > { %1394 = vmatmul.f32.gmra.mxu3 %v684_v45 }
  0xf2   : > { %v560_v20 = vpop.f32.mrf.mxu0 }
  0xf3   : > { %v891_v26 = vpop.f32.mrf.mxu1  ;;  %v1076_v28 = vpop.f32.mrf.mxu2 }
  0xf4   : > { %v892_v29 = vadd.f32 %v891_v26, %v560_v20  ;;  %v1299_v30 = vpop.f32.mrf.mxu3  ;;  %v707_v20 = vsub.f32 %v459_v42, %v5080_v56 }
  0xf5   : > { %687 = vmatmul.f32.gmra.mxu0 %v686_v14  ;;  %v701_v14 = vsub.f32 %v699_v38, %v700_v51 }
  0xf6   : > { %v1077_v31 = vadd.f32 %v1076_v28, %v892_v29  ;;  %954 = vmatmul.f32.gmra.mxu1 %v5053_v18  ;;  %v708_v28 = vand.u32 4294901760, %v707_v20  ;;  %v5089_v29 = vand.u32 4294901760, %v462_v21 }
  0xf7   : > { %v702_v26 = vand.u32 4294901760, %v701_v14 }
  0xf8   : > { %v5078_v45 = vadd.f32 %v1299_v30, %v1077_v31  ;;  %1160 = vmatmul.f32.gmra.mxu2 %v691_v1  ;;  %6542 = vst [vmem:[#allocation17_spill] sm:$0xff] %v5089_v29  ;;  %v709_v58 = vsub.f32 %v707_v20, %v708_v28 }
  0xf9   : > { %1400 = vmatmul.f32.gmra.mxu3 %v692_v15 }
  0xfa   : > { %v568_v57 = vpop.f32.mrf.mxu0 }
  0xfb   : > { %v895_v59 = vpop.f32.mrf.mxu1  ;;  %v1081_v60 = vpop.f32.mrf.mxu2 }
  0xfc   : > { %v896_v4 = vadd.f32 %v895_v59, %v568_v57  ;;  %v1305_v3 = vpop.f32.mrf.mxu3  ;;  %v715_v59 = vsub.f32 %v462_v21, %v5089_v29 }
  0xfd   : > { %695 = vmatmul.f32.gmra.mxu0 %v694_v49 }
  0xfe   : > { %v1082_v1 = vadd.f32 %v1081_v60, %v896_v4  ;;  %958 = vmatmul.f32.gmra.mxu1 %v5062_v46  ;;  %v465_v60 = vsel %vm324_vm0, %v374_v36, 0  ;;  %v710_v4 = vand.u32 4294901760, %v709_v58 }
  0xff   : > { %v5098_v14 = vand.u32 4294901760, %v465_v60 }
 0x100   : > { %v5087_v15 = vadd.f32 %v1305_v3, %v1082_v1  ;;  %1165 = vmatmul.f32.gmra.mxu2 %v699_v38  ;;  %v716_v3 = vand.u32 4294901760, %v715_v59 }
 0x101   : > { %1406 = vmatmul.f32.gmra.mxu3 %v700_v51  ;;  %6544 = vst [vmem:[#allocation19_spill] sm:$0xff] %v5098_v14 }
 0x102   : > { %v576_v30 = vpop.f32.mrf.mxu0 }
 0x103   : > { %v899_v31 = vpop.f32.mrf.mxu1  ;;  %v1086_v49 = vpop.f32.mrf.mxu2 }
 0x104   : > { %v900_v42 = vadd.f32 %v899_v31, %v576_v30  ;;  %v1311_v57 = vpop.f32.mrf.mxu3 }
 0x105   : > { %703 = vmatmul.f32.gmra.mxu0 %v702_v26  ;;  %v375_v26 = vmul.f32 %v4963_v8, %v4963_v8 }
 0x106   : > { %v1087_v38 = vadd.f32 %v1086_v49, %v900_v42  ;;  %962 = vmatmul.f32.gmra.mxu1 %v5071_v19  ;;  %v717_v49 = vsub.f32 %v715_v59, %v716_v3  ;;  %v723_v42 = vsub.f32 %v465_v60, %v5098_v14 }
 0x108   : > { %v5096_v51 = vadd.f32 %v1311_v57, %v1087_v38  ;;  %1170 = vmatmul.f32.gmra.mxu2 %v707_v20  ;;  %v468_v57 = vsel %vm324_vm0, %v375_v26, 0  ;;  %v718_v58 = vand.u32 4294901760, %v717_v49  ;;  %v724_v38 = vand.u32 4294901760, %v723_v42 }
 0x109   : > { %1412 = vmatmul.f32.gmra.mxu3 %v708_v28  ;;  %v5107_v19 = vand.u32 4294901760, %v468_v57 }
 0x10a   : > { %6543 = vst [vmem:[#allocation18_spill] sm:$0xff] %v5096_v51  ;;  %v584_v1 = vpop.f32.mrf.mxu0 }
 0x10b   : > { %v903_v30 = vpop.f32.mrf.mxu1  ;;  %v1091_v31 = vpop.f32.mrf.mxu2  ;;  %6546 = vst [vmem:[#allocation21_spill] sm:$0xff] %v5107_v19 }
 0x10c   : > { %v904_v21 = vadd.f32 %v903_v30, %v584_v1  ;;  %v1317_v36 = vpop.f32.mrf.mxu3 }
 0x10d   : > { %711 = vmatmul.f32.gmra.mxu0 %v710_v4  ;;  %v376_v4 = vmul.f32 %v4972_v17, %v4972_v17 }
 0x10e   : > { %v1092_v20 = vadd.f32 %v1091_v31, %v904_v21  ;;  %966 = vmatmul.f32.gmra.mxu1 %v5080_v56  ;;  %v725_v31 = vsub.f32 %v723_v42, %v724_v38  ;;  %v731_v21 = vsub.f32 %v468_v57, %v5107_v19 }
 0x110   : > { %v5105_v28 = vadd.f32 %v1317_v36, %v1092_v20  ;;  %1175 = vmatmul.f32.gmra.mxu2 %v715_v59  ;;  %v471_v36 = vsel %vm324_vm0, %v376_v4, 0  ;;  %v726_v49 = vand.u32 4294901760, %v725_v31  ;;  %v732_v20 = vand.u32 4294901760, %v731_v21 }
 0x111   : > { %1418 = vmatmul.f32.gmra.mxu3 %v716_v3  ;;  %v5116_v56 = vand.u32 4294901760, %v471_v36 }
 0x112   : > { %6545 = vst [vmem:[#allocation20_spill] sm:$0xff] %v5105_v28  ;;  %v592_v51 = vpop.f32.mrf.mxu0 }
 0x113   : > { %v907_v1 = vpop.f32.mrf.mxu1  ;;  %v1096_v30 = vpop.f32.mrf.mxu2  ;;  %6548 = vst [vmem:[#allocation23_spill] sm:$0xff] %v5116_v56 }
 0x114   : > { %v908_v60 = vadd.f32 %v907_v1, %v592_v51  ;;  %v1323_v26 = vpop.f32.mrf.mxu3  ;;  %v377_v51 = vmul.f32 %v4981_v25, %v4981_v25 }
 0x115   : > { %719 = vmatmul.f32.gmra.mxu0 %v718_v58 }
 0x116   : > { %v1097_v59 = vadd.f32 %v1096_v30, %v908_v60  ;;  %970 = vmatmul.f32.gmra.mxu1 %v5089_v29  ;;  %v733_v30 = vsub.f32 %v731_v21, %v732_v20  ;;  %v739_v60 = vsub.f32 %v471_v36, %v5116_v56 }
 0x118   : > { %v5114_v3 = vadd.f32 %v1323_v26, %v1097_v59  ;;  %1180 = vmatmul.f32.gmra.mxu2 %v723_v42  ;;  %v474_v26 = vsel %vm324_vm0, %v377_v51, 0  ;;  %v734_v31 = vand.u32 4294901760, %v733_v30  ;;  %v740_v59 = vand.u32 4294901760, %v739_v60 }
 0x119   : > { %1424 = vmatmul.f32.gmra.mxu3 %v724_v38  ;;  %v5125_v29 = vand.u32 4294901760, %v474_v26 }
 0x11a   : > { %6547 = vst [vmem:[#allocation22_spill] sm:$0xff] %v5114_v3  ;;  %v600_v28 = vpop.f32.mrf.mxu0 }
 0x11b   : > { %v911_v58 = vpop.f32.mrf.mxu1  ;;  %v1101_v1 = vpop.f32.mrf.mxu2  ;;  %6550 = vst [vmem:[#allocation25_spill] sm:$0xff] %v5125_v29 }
 0x11c   : > { %v912_v57 = vadd.f32 %v911_v58, %v600_v28  ;;  %v1329_v4 = vpop.f32.mrf.mxu3  ;;  %v378_v28 = vmul.f32 %v4990_v35, %v4990_v35 }
 0x11d   : > { %727 = vmatmul.f32.gmra.mxu0 %v726_v49 }
 0x11e   : > { %v1102_v42 = vadd.f32 %v1101_v1, %v912_v57  ;;  %974 = vmatmul.f32.gmra.mxu1 %v5098_v14  ;;  %v741_v1 = vsub.f32 %v739_v60, %v740_v59  ;;  %v747_v57 = vsub.f32 %v474_v26, %v5125_v29 }
 0x120   : > { %v5123_v38 = vadd.f32 %v1329_v4, %v1102_v42  ;;  %1185 = vmatmul.f32.gmra.mxu2 %v731_v21  ;;  %v477_v4 = vsel %vm324_vm0, %v378_v28, 0  ;;  %v742_v30 = vand.u32 4294901760, %v741_v1  ;;  %v748_v42 = vand.u32 4294901760, %v747_v57 }
 0x121   : > { %1430 = vmatmul.f32.gmra.mxu3 %v732_v20  ;;  %v5134_v14 = vand.u32 4294901760, %v477_v4 }
 0x122   : > { %6549 = vst [vmem:[#allocation24_spill] sm:$0xff] %v5123_v38  ;;  %v608_v3 = vpop.f32.mrf.mxu0 }
 0x123   : > { %v915_v49 = vpop.f32.mrf.mxu1  ;;  %v1106_v58 = vpop.f32.mrf.mxu2 }
 0x124   : > { %v916_v36 = vadd.f32 %v915_v49, %v608_v3  ;;  %v1335_v51 = vpop.f32.mrf.mxu3  ;;  %v379_v3 = vmul.f32 %v4999_v44, %v4999_v44 }
 0x125   : > { %735 = vmatmul.f32.gmra.mxu0 %v734_v31 }
 0x126   : > { %v1107_v21 = vadd.f32 %v1106_v58, %v916_v36  ;;  %978 = vmatmul.f32.gmra.mxu1 %v5107_v19  ;;  %v749_v58 = vsub.f32 %v747_v57, %v748_v42  ;;  %v755_v36 = vsub.f32 %v477_v4, %v5134_v14 }
 0x128   : > { %v5132_v20 = vadd.f32 %v1335_v51, %v1107_v21  ;;  %1190 = vmatmul.f32.gmra.mxu2 %v739_v60  ;;  %v480_v51 = vsel %vm324_vm0, %v379_v3, 0  ;;  %v750_v1 = vand.u32 4294901760, %v749_v58  ;;  %v756_v21 = vand.u32 4294901760, %v755_v36 }
 0x129   : > { %1436 = vmatmul.f32.gmra.mxu3 %v740_v59  ;;  %v5143_v19 = vand.u32 4294901760, %v480_v51 }
 0x12a   : > { %6551 = vst [vmem:[#allocation26_spill] sm:$0xff] %v5132_v20  ;;  %v616_v38 = vpop.f32.mrf.mxu0 }
 0x12b   : > { %v919_v31 = vpop.f32.mrf.mxu1  ;;  %v1111_v49 = vpop.f32.mrf.mxu2 }
 0x12c   : > { %v920_v26 = vadd.f32 %v919_v31, %v616_v38  ;;  %v1341_v28 = vpop.f32.mrf.mxu3  ;;  %v380_v38 = vmul.f32 %v5008_v53, %v5008_v53 }
 0x12d   : > { %743 = vmatmul.f32.gmra.mxu0 %v742_v30 }
 0x12e   : > { %v1112_v60 = vadd.f32 %v1111_v49, %v920_v26  ;;  %982 = vmatmul.f32.gmra.mxu1 %v5116_v56  ;;  %v757_v49 = vsub.f32 %v755_v36, %v756_v21  ;;  %v763_v26 = vsub.f32 %v480_v51, %v5143_v19 }
 0x130   : > { %v5141_v59 = vadd.f32 %v1341_v28, %v1112_v60  ;;  %1195 = vmatmul.f32.gmra.mxu2 %v747_v57  ;;  %v483_v28 = vsel %vm324_vm0, %v380_v38, 0  ;;  %v758_v58 = vand.u32 4294901760, %v757_v49  ;;  %v764_v60 = vand.u32 4294901760, %v763_v26 }
 0x131   : > { %1442 = vmatmul.f32.gmra.mxu3 %v748_v42  ;;  %v5152_v56 = vand.u32 4294901760, %v483_v28 }
 0x132   : > { %6552 = vst [vmem:[#allocation27_spill] sm:$0xff] %v5141_v59  ;;  %v624_v20 = vpop.f32.mrf.mxu0 }
 0x133   : > { %v923_v30 = vpop.f32.mrf.mxu1  ;;  %v1116_v31 = vpop.f32.mrf.mxu2 }
 0x134   : > { %v924_v4 = vadd.f32 %v923_v30, %v624_v20  ;;  %v1347_v3 = vpop.f32.mrf.mxu3  ;;  %v381_v20 = vmul.f32 %v5017_v0, %v5017_v0 }
 0x135   : > { %751 = vmatmul.f32.gmra.mxu0 %v750_v1 }
 0x136   : > { %v1117_v57 = vadd.f32 %v1116_v31, %v924_v4  ;;  %986 = vmatmul.f32.gmra.mxu1 %v5125_v29  ;;  %v765_v31 = vsub.f32 %v763_v26, %v764_v60  ;;  %v771_v4 = vsub.f32 %v483_v28, %v5152_v56 }
 0x138   : > { %v5150_v42 = vadd.f32 %v1347_v3, %v1117_v57  ;;  %1200 = vmatmul.f32.gmra.mxu2 %v755_v36  ;;  %v486_v3 = vsel %vm324_vm0, %v381_v20, 0  ;;  %v766_v49 = vand.u32 4294901760, %v765_v31  ;;  %v772_v57 = vand.u32 4294901760, %v771_v4 }
 0x139   : > { %1448 = vmatmul.f32.gmra.mxu3 %v756_v21  ;;  %v5161_v29 = vand.u32 4294901760, %v486_v3 }
 0x13a   : > { %6553 = vst [vmem:[#allocation28_spill] sm:$0xff] %v5150_v42  ;;  %v632_v59 = vpop.f32.mrf.mxu0 }
 0x13b   : > { %v927_v1 = vpop.f32.mrf.mxu1  ;;  %v1121_v30 = vpop.f32.mrf.mxu2 }
 0x13c   : > { %v928_v51 = vadd.f32 %v927_v1, %v632_v59  ;;  %v1353_v38 = vpop.f32.mrf.mxu3  ;;  %v382_v59 = vmul.f32 %v4954_v62, %v4882_v2 }
 0x13d   : > { %759 = vmatmul.f32.gmra.mxu0 %v758_v58 }
 0x13e   : > { %v1122_v36 = vadd.f32 %v1121_v30, %v928_v51  ;;  %990 = vmatmul.f32.gmra.mxu1 %v5134_v14  ;;  %v773_v30 = vsub.f32 %v771_v4, %v772_v57  ;;  %v779_v51 = vsub.f32 %v486_v3, %v5161_v29 }
 0x140   : > { %v5159_v21 = vadd.f32 %v1353_v38, %v1122_v36  ;;  %1205 = vmatmul.f32.gmra.mxu2 %v763_v26  ;;  %v489_v38 = vsel %vm324_vm0, %v382_v59, 0  ;;  %v774_v31 = vand.u32 4294901760, %v773_v30  ;;  %v780_v36 = vand.u32 4294901760, %v779_v51 }
 0x141   : > { %1454 = vmatmul.f32.gmra.mxu3 %v764_v60  ;;  %v5170_v2 = vand.u32 4294901760, %v489_v38 }
 0x142   : > { %v640_v42 = vpop.f32.mrf.mxu0 }
 0x143   : > { %v931_v58 = vpop.f32.mrf.mxu1  ;;  %v1126_v1 = vpop.f32.mrf.mxu2 }
 0x144   : > { %v932_v28 = vadd.f32 %v931_v58, %v640_v42  ;;  %v1359_v20 = vpop.f32.mrf.mxu3  ;;  %v383_v42 = vmul.f32 %v4963_v8, %v4887_v6 }
 0x145   : > { %767 = vmatmul.f32.gmra.mxu0 %v766_v49 }
 0x146   : > { %v1127_v26 = vadd.f32 %v1126_v1, %v932_v28  ;;  %994 = vmatmul.f32.gmra.mxu1 %v5143_v19  ;;  %v781_v1 = vsub.f32 %v779_v51, %v780_v36  ;;  %v787_v28 = vsub.f32 %v489_v38, %v5170_v2 }
 0x148   : > { %v5168_v60 = vadd.f32 %v1359_v20, %v1127_v26  ;;  %1210 = vmatmul.f32.gmra.mxu2 %v771_v4  ;;  %v492_v20 = vsel %vm324_vm0, %v383_v42, 0  ;;  %v782_v30 = vand.u32 4294901760, %v781_v1  ;;  %v788_v26 = vand.u32 4294901760, %v787_v28 }
 0x149   : > { %1460 = vmatmul.f32.gmra.mxu3 %v772_v57  ;;  %v5179_v6 = vand.u32 4294901760, %v492_v20 }
 0x14a   : > { %v648_v62 = vpop.f32.mrf.mxu0  ;;  %v789_v42 = vsub.f32 %v787_v28, %v788_v26 }
 0x14b   : > { %v935_v49 = vpop.f32.mrf.mxu1  ;;  %v1131_v58 = vpop.f32.mrf.mxu2 }
 0x14c   : > { %v936_v3 = vadd.f32 %v935_v49, %v648_v62  ;;  %v1365_v59 = vpop.f32.mrf.mxu3  ;;  %v790_v1 = vand.u32 4294901760, %v789_v42 }
 0x14d   : > { %775 = vmatmul.f32.gmra.mxu0 %v774_v31  ;;  %v384_v31 = vmul.f32 %v4972_v17, %v4894_v9 }
 0x14e   : > { %v1132_v4 = vadd.f32 %v1131_v58, %v936_v3  ;;  %998 = vmatmul.f32.gmra.mxu1 %v5152_v56  ;;  %v795_v58 = vsub.f32 %v492_v20, %v5179_v6 }
 0x150   : > { %v5177_v57 = vadd.f32 %v1365_v59, %v1132_v4  ;;  %1215 = vmatmul.f32.gmra.mxu2 %v779_v51  ;;  %v495_v59 = vsel %vm324_vm0, %v384_v31, 0  ;;  %v796_v4 = vand.u32 4294901760, %v795_v58 }
 0x151   : > { %1466 = vmatmul.f32.gmra.mxu3 %v780_v36  ;;  %v5188_v9 = vand.u32 4294901760, %v495_v59 }
 0x152   : > { %v656_v8 = vpop.f32.mrf.mxu0 }
 0x153   : > { %v939_v62 = vpop.f32.mrf.mxu1  ;;  %v1136_v49 = vpop.f32.mrf.mxu2  ;;  %6554 = vst [vmem:[#allocation29_spill] sm:$0xff] %v5188_v9  ;;  %v803_v31 = vsub.f32 %v495_v59, %v5188_v9 }
 0x154   : > { %v940_v38 = vadd.f32 %v939_v62, %v656_v8  ;;  %v1371_v3 = vpop.f32.mrf.mxu3  ;;  %v797_v8 = vsub.f32 %v795_v58, %v796_v4 }
 0x155   : > { %783 = vmatmul.f32.gmra.mxu0 %v782_v30  ;;  %v385_v30 = vmul.f32 %v4981_v25, %v4905_v27  ;;  %v386_v27 = vmul.f32 %v4990_v35, %v4914_v34  ;;  %v387_v34 = vmul.f32 %v4999_v44, %v4923_v41  ;;  %v388_v44 = vmul.f32 %v5008_v53, %v4932_v48 }
 0x156   : > { %v1137_v51 = vadd.f32 %v1136_v49, %v940_v38  ;;  %1002 = vmatmul.f32.gmra.mxu1 %v5161_v29 }
 0x157   : > { %v498_v62 = vsel %vm324_vm0, %v385_v30, 0  ;;  %v501_v59 = vsel %vm324_vm0, %v386_v27, 0 }
 0x158   : > { %v5186_v36 = vadd.f32 %v1371_v3, %v1137_v51  ;;  %1220 = vmatmul.f32.gmra.mxu2 %v787_v28  ;;  %v798_v28 = vand.u32 4294901760, %v797_v8  ;;  %v5199_v49 = vand.u32 4294901760, %v498_v62 }
 0x159   : > { %1472 = vmatmul.f32.gmra.mxu3 %v788_v26  ;;  %v804_v26 = vand.u32 4294901760, %v803_v31 }
 0x15a   : > { %v5190_v17 = vpop.f32.mrf.mxu0  ;;  %6555 = vst [vmem:[#allocation30_spill] sm:$0xff] %v5199_v49  ;;  %v811_v3 = vsub.f32 %v498_v62, %v5199_v49  ;;  %v504_v62 = vsel %vm324_vm0, %v387_v34, 0 }
 0x15b   : > { %v5194_v20 = vpop.f32.mrf.mxu1  ;;  %v805_v42 = vsub.f32 %v803_v31, %v804_v26 }
 0x15c   : > { %v812_v51 = vand.u32 4294901760, %v811_v3 }
 0x15d   : > { %791 = vmatmul.f32.gmra.mxu0 %v790_v1  ;;  %v5210_v1 = vand.u32 4294901760, %v501_v59 }
 0x15e   : > { %1006 = vmatmul.f32.gmra.mxu1 %v5170_v2  ;;  %v813_v30 = vsub.f32 %v811_v3, %v812_v51 }
 0x15f   : > { %v819_v8 = vsub.f32 %v501_v59, %v5210_v1 }
 0x160   : > { %1225 = vmatmul.f32.gmra.mxu2 %v795_v58  ;;  %v806_v58 = vand.u32 4294901760, %v805_v42  ;;  %v5223_v42 = vand.u32 4294901760, %v504_v62 }
 0x161   : > { %1478 = vmatmul.f32.gmra.mxu3 %v796_v4  ;;  %v820_v27 = vand.u32 4294901760, %v819_v8 }
 0x162   : > { %v5201_v38 = vpop.f32.mrf.mxu0  ;;  %v827_v34 = vsub.f32 %v504_v62, %v5223_v42  ;;  %v389_v62 = vmul.f32 %v5017_v0, %v4941_v55 }
 0x163   : > { %v5205_v25 = vpop.f32.mrf.mxu1 }
 0x165   : > { %799 = vmatmul.f32.gmra.mxu0 %v798_v28 }
 0x166   : > { %1010 = vmatmul.f32.gmra.mxu1 %v5179_v6 }
 0x168   : > { %1230 = vmatmul.f32.gmra.mxu2 %v803_v31  ;;  %v2521_v31 = vld [vmem:[#allocation5 + $0x8] sm:$0xff] }
 0x169   : > { %1484 = vmatmul.f32.gmra.mxu3 %v804_v26  ;;  %v5221_v28 = vand.u32 4294901760, %v2521_v31  ;;  %v814_v26 = vand.u32 4294901760, %v813_v30  ;;  %v507_v30 = vsel %vm324_vm0, %v388_v44, 0 }
 0x16a   : > { %v5212_v4 = vpop.f32.mrf.mxu0 }
 0x16b   : > { %v5216_v35 = vpop.f32.mrf.mxu1  ;;  %2657 = vmatpush.msrb.mxu2 %v5221_v28  ;;  %v5231_v59 = vsub.f32 %v2521_v31, %v5221_v28  ;;  %3404 = vmatpush.msra.mxu1 %v5221_v28 }
 0x16d   : > { %807 = vmatmul.f32.gmra.mxu0 %v806_v58 }
 0x16e   : > { %1014 = vmatmul.f32.gmra.mxu1 %v5188_v9  ;;  %3184 = vmatpush.msra.mxu0 %v5231_v59  ;;  %v828_v9 = vand.u32 4294901760, %v827_v34 }
 0x170   : > { %1235 = vmatmul.f32.gmra.mxu2 %v811_v3  ;;  %v6477_v3 = vand.u32 4294901760, %v5231_v59  ;;  %v829_v44 = vsub.f32 %v827_v34, %v828_v9 }
 0x171   : > { %1490 = vmatmul.f32.gmra.mxu3 %v812_v51  ;;  %v821_v51 = vsub.f32 %v819_v8, %v820_v27 }
 0x172   : > { %v5225_v41 = vpop.f32.mrf.mxu0  ;;  %v2998_v48 = vsub.f32 %v5231_v59, %v6477_v3 }
 0x173   : > { %6556 = vst [vmem:[#allocation31_spill] sm:$0xff] %v5225_v41  ;;  %v5234_v58 = vpop.f32.mrf.mxu1  ;;  %v822_v31 = vand.u32 4294901760, %v821_v51 }
 0x174   : > { %6557 = vst [vmem:[#allocation32_spill] sm:$0xff] %v5234_v58  ;;  %v2999_v53 = vand.u32 4294901760, %v2998_v48  ;;  %v5244_v58 = vand.u32 4294901760, %v507_v30  ;;  %v510_v48 = vsel %vm324_vm0, %v389_v62, 0 }
 0x175   : > { %815 = vmatmul.f32.gmra.mxu0 %v814_v26  ;;  %v5255_v51 = vand.u32 4294901760, %v510_v48 }
 0x176   : > { %1018 = vmatmul.f32.gmra.mxu1 %v5199_v49  ;;  %3000 = vmatpush.msrb.mxu3 %v2999_v53  ;;  %v835_v3 = vsub.f32 %v507_v30, %v5244_v58 }
 0x177   : > { %v843_v0 = vsub.f32 %v510_v48, %v5255_v51 }
 0x178   : > { %1240 = vmatmul.f32.gmra.mxu2 %v819_v8  ;;  %v830_v8 = vand.u32 4294901760, %v829_v44 }
 0x179   : > { %1496 = vmatmul.f32.gmra.mxu3 %v820_v27  ;;  %v836_v27 = vand.u32 4294901760, %v835_v3 }
 0x17a   : > { %v5246_v41 = vpop.f32.mrf.mxu0 }
 0x17b   : > { %v5250_v26 = vpop.f32.mrf.mxu1  ;;  %v837_v55 = vsub.f32 %v835_v3, %v836_v27 }
 0x17d   : > { %823 = vmatmul.f32.gmra.mxu0 %v822_v31  ;;  %v838_v30 = vand.u32 4294901760, %v837_v55  ;;  %v844_v31 = vand.u32 4294901760, %v843_v0 }
 0x17e   : > { %1022 = vmatmul.f32.gmra.mxu1 %v5210_v1 }
 0x17f   : > { %v845_v62 = vsub.f32 %v843_v0, %v844_v31 }
 0x180   : > { %1245 = vmatmul.f32.gmra.mxu2 %v827_v34 }
 0x181   : > { %1502 = vmatmul.f32.gmra.mxu3 %v828_v9  ;;  %v846_v44 = vand.u32 4294901760, %v845_v62 }
 0x182   : > { %v5257_v53 = vpop.f32.mrf.mxu0 }
 0x183   : > { %v5259_v49 = vpop.f32.mrf.mxu1 }
 0x185   : > { %831 = vmatmul.f32.gmra.mxu0 %v830_v8 }
 0x186   : > { %1026 = vmatmul.f32.gmra.mxu1 %v5223_v42 }
 0x188   : > { %1250 = vmatmul.f32.gmra.mxu2 %v835_v3 }
 0x189   : > { %1508 = vmatmul.f32.gmra.mxu3 %v836_v27 }
 0x18a   : > { %v5263_v34 = vpop.f32.mrf.mxu0 }
 0x18b   : > { %v5265_v9 = vpop.f32.mrf.mxu1 }
 0x18d   : > { %839 = vmatmul.f32.gmra.mxu0 %v838_v30 }
 0x18e   : > { %1030 = vmatmul.f32.gmra.mxu1 %v5244_v58 }
 0x190   : > { %1255 = vmatmul.f32.gmra.mxu2 %v843_v0 }
 0x191   : > { %1514 = vmatmul.f32.gmra.mxu3 %v844_v31 }
 0x192   : > { %v5268_v8 = vpop.f32.mrf.mxu0 }
 0x193   : > { %v5270_v48 = vpop.f32.mrf.mxu1 }
 0x195   : > { %847 = vmatmul.f32.gmra.mxu0 %v846_v44 }
 0x196   : > { %1034 = vmatmul.f32.gmra.mxu1 %v5255_v51 }
 0x19a   : > { %v5273_v3 = vpop.f32.mrf.mxu0 }
 0x19b   : > { %v5275_v27 = vpop.f32.mrf.mxu1 }
 0x19d   : > { %1541 = vmatmul.f32.vlgmr.msrb.gmra.mxu0 %v4889_v7 }
 0x19e   : > { %1720 = vmatmul.f32.vlgmr.msrb.gmra.mxu1 %v4889_v7 }
 0x1a2   : > { %v5279_v55 = vpop.f32.mrf.mxu0 }
 0x1a3   : > { %v5281_v0 = vpop.f32.mrf.mxu1 }
 0x1a4   : > { %6558 = vst [vmem:[#allocation33_spill] sm:$0xff] %v5281_v0 }
 0x1a5   : > { %1545 = vmatmul.f32.gmra.mxu0 %v4896_v12 }
 0x1a6   : > { %1724 = vmatmul.f32.gmra.mxu1 %v4896_v12 }
 0x1aa   : > { %v5285_v30 = vpop.f32.mrf.mxu0 }
 0x1ab   : > { %v5287_v31 = vpop.f32.mrf.mxu1 }
 0x1ac   : > { %6559 = vst [vmem:[#allocation34_spill] sm:$0xff] %v5287_v31 }
 0x1ad   : > { %1549 = vmatmul.f32.gmra.mxu0 %v4902_v23 }
 0x1ae   : > { %1728 = vmatmul.f32.gmra.mxu1 %v4902_v23 }
 0x1b2   : > { %v5291_v62 = vpop.f32.mrf.mxu0 }
 0x1b3   : > { %v5293_v44 = vpop.f32.mrf.mxu1 }
 0x1b4   : > { %6560 = vst [vmem:[#allocation35_spill] sm:$0xff] %v5293_v44 }
 0x1b5   : > { %1553 = vmatmul.f32.gmra.mxu0 %v4911_v33 }
 0x1b6   : > { %1732 = vmatmul.f32.gmra.mxu1 %v4911_v33 }
 0x1ba   : > { %v5297_v7 = vpop.f32.mrf.mxu0 }
 0x1bb   : > { %v5299_v0 = vpop.f32.mrf.mxu1 }
 0x1bc   : > { %6561 = vst [vmem:[#allocation36_spill] sm:$0xff] %v5299_v0 }
 0x1bd   : > { %1557 = vmatmul.f32.gmra.mxu0 %v4920_v40 }
 0x1be   : > { %1736 = vmatmul.f32.gmra.mxu1 %v4920_v40 }
 0x1c2   : > { %v5303_v12 = vpop.f32.mrf.mxu0 }
 0x1c3   : > { %v5305_v31 = vpop.f32.mrf.mxu1 }
 0x1c4   : > { %6562 = vst [vmem:[#allocation37_spill] sm:$0xff] %v5305_v31 }
 0x1c5   : > { %1561 = vmatmul.f32.gmra.mxu0 %v4929_v47 }
 0x1c6   : > { %1740 = vmatmul.f32.gmra.mxu1 %v4929_v47 }
 0x1ca   : > { %v5309_v23 = vpop.f32.mrf.mxu0 }
 0x1cb   : > { %v5311_v44 = vpop.f32.mrf.mxu1 }
 0x1cc   : > { %6563 = vst [vmem:[#allocation38_spill] sm:$0xff] %v5311_v44 }
 0x1cd   : > { %1565 = vmatmul.f32.gmra.mxu0 %v4938_v54 }
 0x1ce   : > { %1744 = vmatmul.f32.gmra.mxu1 %v4938_v54 }
 0x1d2   : > { %v5315_v33 = vpop.f32.mrf.mxu0 }
 0x1d3   : > { %v5317_v0 = vpop.f32.mrf.mxu1 }
 0x1d4   : > { %6564 = vst [vmem:[#allocation39_spill] sm:$0xff] %v5317_v0 }
 0x1d5   : > { %1569 = vmatmul.f32.gmra.mxu0 %v4947_v61 }
 0x1d6   : > { %1748 = vmatmul.f32.gmra.mxu1 %v4947_v61 }
 0x1da   : > { %v5321_v40 = vpop.f32.mrf.mxu0 }
 0x1db   : > { %v5323_v31 = vpop.f32.mrf.mxu1 }
 0x1dc   : > { %6565 = vst [vmem:[#allocation40_spill] sm:$0xff] %v5323_v31 }
 0x1dd   : > { %1573 = vmatmul.f32.gmra.mxu0 %v4960_v5 }
 0x1de   : > { %1752 = vmatmul.f32.gmra.mxu1 %v4960_v5 }
 0x1e2   : > { %v5327_v47 = vpop.f32.mrf.mxu0 }
 0x1e3   : > { %v5329_v44 = vpop.f32.mrf.mxu1 }
 0x1e4   : > { %6566 = vst [vmem:[#allocation41_spill] sm:$0xff] %v5329_v44 }
 0x1e5   : > { %1577 = vmatmul.f32.gmra.mxu0 %v4969_v16 }
 0x1e6   : > { %1756 = vmatmul.f32.gmra.mxu1 %v4969_v16 }
 0x1ea   : > { %v5333_v54 = vpop.f32.mrf.mxu0 }
 0x1eb   : > { %v5335_v0 = vpop.f32.mrf.mxu1 }
 0x1ec   : > { %6567 = vst [vmem:[#allocation42_spill] sm:$0xff] %v5335_v0 }
 0x1ed   : > { %1581 = vmatmul.f32.gmra.mxu0 %v4978_v24 }
 0x1ee   : > { %1760 = vmatmul.f32.gmra.mxu1 %v4978_v24 }
 0x1f2   : > { %v5339_v61 = vpop.f32.mrf.mxu0 }
 0x1f3   : > { %v5341_v31 = vpop.f32.mrf.mxu1 }
 0x1f4   : > { %6568 = vst [vmem:[#allocation43_spill] sm:$0xff] %v5341_v31 }
 0x1f5   : > { %1585 = vmatmul.f32.gmra.mxu0 %v4987_v32 }
 0x1f6   : > { %1764 = vmatmul.f32.gmra.mxu1 %v4987_v32  ;;  %v2520_v32 = vld [vmem:[#allocation5] sm:$0xff] }
 0x1fa   : > { %v5345_v5 = vpop.f32.mrf.mxu0 }
 0x1fb   : > { %6569 = vst [vmem:[#allocation44_spill] sm:$0xff] %v5345_v5  ;;  %v5347_v44 = vpop.f32.mrf.mxu1 }
 0x1fc   : > { %6570 = vst [vmem:[#allocation45_spill] sm:$0xff] %v5347_v44  ;;  %v2658_v44 = vand.u32 4294901760, %v2520_v32 }
 0x1fd   : > { %1589 = vmatmul.f32.gmra.mxu0 %v4996_v43 }
 0x1fe   : > { %1768 = vmatmul.f32.gmra.mxu1 %v4996_v43  ;;  %2659 = vmatpush.msrb.mxu2 %v2658_v44  ;;  %v3002_v43 = vsub.f32 %v2520_v32, %v2658_v44 }
 0x1ff   : > { %3406 = vmatpush.msra.mxu1 %v2658_v44 }
 0x200   : > { %3187 = vmatpush.msra.mxu0 %v3002_v43 }
 0x202   : > { %v5351_v16 = vpop.f32.mrf.mxu0 }
 0x203   : > { %6571 = vst [vmem:[#allocation46_spill] sm:$0xff] %v5351_v16  ;;  %v5353_v0 = vpop.f32.mrf.mxu1 }
 0x204   : > { %6572 = vst [vmem:[#allocation47_spill] sm:$0xff] %v5353_v0  ;;  %v6576_v0 = vand.u32 4294901760, %v5231_v59 }
 0x205   : > { %1593 = vmatmul.f32.gmra.mxu0 %v5005_v52 }
 0x206   : > { %1772 = vmatmul.f32.gmra.mxu1 %v5005_v52  ;;  %3665 = vmatpush.msra.mxu2 %v6576_v0  ;;  %v3003_v52 = vand.u32 4294901760, %v3002_v43 }
 0x208   : > { %3669 = vmatpush.msra.mxu2 %v3003_v52 }
 0x20a   : > { %v5357_v24 = vpop.f32.mrf.mxu0 }
 0x20b   : > { %6573 = vst [vmem:[#allocation48_spill] sm:$0xff] %v5357_v24  ;;  %v5359_v31 = vpop.f32.mrf.mxu1 }
 0x20c   : > { %6574 = vst [vmem:[#allocation49_spill] sm:$0xff] %v5359_v31  ;;  %v3004_v31 = vsub.f32 %v3002_v43, %v3003_v52 }
 0x20d   : > { %1597 = vmatmul.f32.gmra.mxu0 %v5014_v63 }
 0x20e   : > { %1776 = vmatmul.f32.gmra.mxu1 %v5014_v63  ;;  %v3005_v63 = vand.u32 4294901760, %v3004_v31 }
 0x210   : > { %3006 = vmatpush.msrb.mxu3 %v3005_v63 }
 0x212   : > { %v5363_v5 = vpop.f32.mrf.mxu0  ;;  %3846 = vmatpush.msra.mxu3 %v5221_v28 }
 0x213   : > { %6575 = vst [vmem:[#allocation50_spill] sm:$0xff] %v5363_v5  ;;  %v5367_v16 = vpop.f32.mrf.mxu1 }
 0x214   : > { %3848 = vmatpush.msra.mxu3 %v2658_v44 }
 0x215   : > { %1601 = vmatmul.f32.gmra.mxu0 %v5023_v13 }
 0x216   : > { %1780 = vmatmul.f32.gmra.mxu1 %v5023_v13 }
 0x21a   : > { %v1542_v24 = vpop.f32.mrf.mxu0 }
 0x21b   : > { %v1543_v5 = vadd.f32 %v1542_v24, %v5051_v11  ;;  %v1721_v32 = vpop.f32.mrf.mxu1 }
 0x21d   : > { %1605 = vmatmul.f32.gmra.mxu0 %v5030_v22  ;;  %v1722_v59 = vadd.f32 %v1721_v32, %v1543_v5 }
 0x21e   : > { %1784 = vmatmul.f32.gmra.mxu1 %v5030_v22 }
 0x21f   : > { %1880 = vxpose.xlu0.b32.start [1/2] (short) (narrow) %v1722_v59, 16  ;;  %v6577_v59 = vld [vmem:[#allocation18_spill] sm:$0xff] }
 0x222   : > { %v1546_v0 = vpop.f32.mrf.mxu0 }
 0x223   : > { %v1547_v43 = vadd.f32 %v1546_v0, %v5060_v39  ;;  %v1725_v52 = vpop.f32.mrf.mxu1 }
 0x225   : > { %1609 = vmatmul.f32.gmra.mxu0 %v5037_v37  ;;  %v1726_v13 = vadd.f32 %v1725_v52, %v1547_v43  ;;  %v6578_v43 = vld [vmem:[#allocation15_spill] sm:$0xff] }
 0x226   : > { %1788 = vmatmul.f32.gmra.mxu1 %v5037_v37 }
 0x227   : > { %1881 = vxpose.xlu0.b32.end [2/2] (short) (narrow) %v1726_v13, 16  ;;  %v6579_v13 = vld [vmem:[#allocation20_spill] sm:$0xff] }
 0x22a   : > { %v1550_v11 = vpop.f32.mrf.mxu0 }
 0x22b   : > { %v1551_v28 = vadd.f32 %v1550_v11, %v5069_v10  ;;  %v1729_v31 = vpop.f32.mrf.mxu1 }
 0x22d   : > { %1613 = vmatmul.f32.gmra.mxu0 %v5044_v50  ;;  %v1730_v44 = vadd.f32 %v1729_v31, %v1551_v28  ;;  %v6580_v28 = vld [vmem:[#allocation16_spill] sm:$0xff] }
 0x22e   : > { %1792 = vmatmul.f32.gmra.mxu1 %v5044_v50 }
 0x22f   : > { %1912 = vxpose.xlu1.b32.start [1/2] (short) (narrow) %v1730_v44, 16  ;;  %v6581_v44 = vld [vmem:[#allocation22_spill] sm:$0xff] }
 0x232   : > { %v1554_v22 = vpop.f32.mrf.mxu0 }
 0x233   : > { %v1555_v39 = vadd.f32 %v1554_v22, %v5078_v45  ;;  %v1733_v5 = vpop.f32.mrf.mxu1 }
 0x235   : > { %1617 = vmatmul.f32.gmra.mxu0 %v5053_v18  ;;  %v1734_v24 = vadd.f32 %v1733_v5, %v1555_v39 }
 0x236   : > { %1796 = vmatmul.f32.gmra.mxu1 %v5053_v18 }
 0x237   : > { %1913 = vxpose.xlu1.b32.end [2/2] (short) (narrow) %v1734_v24, 16  ;;  %v6582_v24 = vld [vmem:[#allocation17_spill] sm:$0xff] }
 0x23a   : > { %v1558_v37 = vpop.f32.mrf.mxu0 }
 0x23b   : > { %v1559_v10 = vadd.f32 %v1558_v37, %v5087_v15  ;;  %v1737_v63 = vpop.f32.mrf.mxu1 }
 0x23d   : > { %1621 = vmatmul.f32.gmra.mxu0 %v5062_v46  ;;  %v1738_v32 = vadd.f32 %v1737_v63, %v1559_v10  ;;  %v6583_v10 = vld [vmem:[#allocation24_spill] sm:$0xff] }
 0x23e   : > { %1800 = vmatmul.f32.gmra.mxu1 %v5062_v46 }
 0x23f   : > { %1944 = vxpose.xlu2.b32.start [1/2] (short) (narrow) %v1738_v32, 16 }
 0x242   : > { %v1562_v50 = vpop.f32.mrf.mxu0 }
 0x243   : > { %v1563_v45 = vadd.f32 %v1562_v50, %v6577_v59  ;;  %v1741_v0 = vpop.f32.mrf.mxu1  ;;  %v5397_v50 = vpop.f32.mrf.mxu3  ;;  %v6584_v59 = vld [vmem:[#allocation19_spill] sm:$0xff] }
 0x245   : > { %1625 = vmatmul.f32.gmra.mxu0 %v6578_v43  ;;  %v1742_v52 = vadd.f32 %v1741_v0, %v1563_v45 }
 0x246   : > { %1804 = vmatmul.f32.gmra.mxu1 %v6578_v43  ;;  %v6585_v43 = vld [vmem:[#allocation26_spill] sm:$0xff] }
 0x247   : > { %1945 = vxpose.xlu2.b32.end [2/2] (short) (narrow) %v1742_v52, 16 }
 0x24a   : > { %v1566_v18 = vpop.f32.mrf.mxu0 }
 0x24b   : > { %v1567_v15 = vadd.f32 %v1566_v18, %v6579_v13  ;;  %v1745_v11 = vpop.f32.mrf.mxu1  ;;  %v1141_v18 = vpop.f32.mrf.mxu2 }
 0x24d   : > { %1629 = vmatmul.f32.gmra.mxu0 %v6580_v28  ;;  %v1746_v31 = vadd.f32 %v1745_v11, %v1567_v15  ;;  %v6586_v11 = vld [vmem:[#allocation21_spill] sm:$0xff] }
 0x24e   : > { %1808 = vmatmul.f32.gmra.mxu1 %v6580_v28  ;;  %v5403_v28 = vpop.f32.mrf.mxu3 }
 0x24f   : > { %1976 = vxpose.xlu0.b32.start [1/2] (short) (narrow) %v1746_v31, 16 }
 0x252   : > { %v1570_v46 = vpop.f32.mrf.mxu0 }
 0x253   : > { %v1571_v22 = vadd.f32 %v1570_v46, %v6581_v44  ;;  %v1749_v39 = vpop.f32.mrf.mxu1  ;;  %v6587_v46 = vld [vmem:[#allocation27_spill] sm:$0xff] }
 0x255   : > { %v1750_v5 = vadd.f32 %v1749_v39, %v1571_v22  ;;  %1633 = vmatmul.f32.gmra.mxu0 %v6582_v24  ;;  %v6588_v39 = vld [vmem:[#allocation23_spill] sm:$0xff] }
 0x256   : > { %1812 = vmatmul.f32.gmra.mxu1 %v6582_v24  ;;  %v1146_v24 = vpop.f32.mrf.mxu2 }
 0x257   : > { %1977 = vxpose.xlu0.b32.end [2/2] (short) (narrow) %v1750_v5, 16 }
 0x25a   : > { %v1574_v37 = vpop.f32.mrf.mxu0 }
 0x25b   : > { %v1575_v63 = vadd.f32 %v1574_v37, %v6583_v10  ;;  %v1753_v32 = vpop.f32.mrf.mxu1  ;;  %v5409_v37 = vpop.f32.mrf.mxu3 }
 0x25d   : > { %1637 = vmatmul.f32.gmra.mxu0 %v6584_v59  ;;  %v1754_v45 = vadd.f32 %v1753_v32, %v1575_v63  ;;  %v6589_v63 = vld [vmem:[#allocation28_spill] sm:$0xff] }
 0x25e   : > { %1816 = vmatmul.f32.gmra.mxu1 %v6584_v59 }
 0x25f   : > { %2008 = vxpose.xlu1.b32.start [1/2] (short) (narrow) %v1754_v45, 16 }
 0x262   : > { %v1578_v0 = vpop.f32.mrf.mxu0 }
 0x263   : > { %v1579_v52 = vadd.f32 %v1578_v0, %v6585_v43  ;;  %v1757_v13 = vpop.f32.mrf.mxu1  ;;  %v6590_v0 = vld [vmem:[#allocation25_spill] sm:$0xff]  ;;  %v1151_v43 = vpop.f32.mrf.mxu2 }
 0x265   : > { %v1758_v15 = vadd.f32 %v1757_v13, %v1579_v52  ;;  %1641 = vmatmul.f32.gmra.mxu0 %v6586_v11  ;;  %v5414_v13 = vpop.f32.mrf.mxu3 }
 0x266   : > { %1820 = vmatmul.f32.gmra.mxu1 %v6586_v11 }
 0x267   : > { %2009 = vxpose.xlu1.b32.end [2/2] (short) (narrow) %v1758_v15, 16 }
 0x26a   : > { %v1582_v31 = vpop.f32.mrf.mxu0 }
 0x26b   : > { %v1583_v44 = vadd.f32 %v1582_v31, %v6587_v46  ;;  %v1761_v22 = vpop.f32.mrf.mxu1  ;;  %v1156_v46 = vpop.f32.mrf.mxu2 }
 0x26d   : > { %1645 = vmatmul.f32.gmra.mxu0 %v6588_v39  ;;  %v1762_v5 = vadd.f32 %v1761_v22, %v1583_v44 }
 0x26e   : > { %1824 = vmatmul.f32.gmra.mxu1 %v6588_v39 }
 0x26f   : > { %2040 = vxpose.xlu2.b32.start [1/2] (short) (narrow) %v1762_v5, 16  ;;  %v5420_v5 = vpop.f32.mrf.mxu3 }
 0x272   : > { %v1586_v10 = vpop.f32.mrf.mxu0 }
 0x273   : > { %v1587_v32 = vadd.f32 %v1586_v10, %v6589_v63  ;;  %v1765_v59 = vpop.f32.mrf.mxu1 }
 0x275   : > { %v1766_v45 = vadd.f32 %v1765_v59, %v1587_v32  ;;  %1649 = vmatmul.f32.gmra.mxu0 %v6590_v0  ;;  %v1161_v32 = vpop.f32.mrf.mxu2 }
 0x276   : > { %1828 = vmatmul.f32.gmra.mxu1 %v6590_v0 }
 0x277   : > { %2041 = vxpose.xlu2.b32.end [2/2] (short) (narrow) %v1766_v45, 16  ;;  %v5426_v45 = vpop.f32.mrf.mxu3 }
 0x27a   : > { %v1590_v52 = vpop.f32.mrf.mxu0 }
 0x27b   : > { %v1591_v15 = vadd.f32 %v1590_v52, %v5159_v21  ;;  %v1769_v11 = vpop.f32.mrf.mxu1 }
 0x27d   : > { %1653 = vmatmul.f32.gmra.mxu0 %v5134_v14  ;;  %v1770_v31 = vadd.f32 %v1769_v11, %v1591_v15 }
 0x27e   : > { %1832 = vmatmul.f32.gmra.mxu1 %v5134_v14 }
 0x27f   : > { %2072 = vxpose.xlu0.b32.start [1/2] (short) (narrow) %v1770_v31, 16 }
 0x282   : > { %v1594_v44 = vpop.f32.mrf.mxu0 }
 0x283   : > { %v1595_v22 = vadd.f32 %v1594_v44, %v5168_v60  ;;  %v1773_v39 = vpop.f32.mrf.mxu1  ;;  %v944_v60 = vadd.f32 %v5194_v20, %v5190_v17  ;;  %v5437_v44 = vpop.f32.mrf.mxu3 }
 0x285   : > { %v1774_v10 = vadd.f32 %v1773_v39, %v1595_v22  ;;  %1657 = vmatmul.f32.gmra.mxu0 %v5143_v19  ;;  %v1142_v15 = vadd.f32 %v1141_v18, %v944_v60 }
 0x286   : > { %1836 = vmatmul.f32.gmra.mxu1 %v5143_v19 }
 0x287   : > { %2073 = vxpose.xlu0.b32.end [2/2] (short) (narrow) %v1774_v10, 16  ;;  %v1378_v31 = vadd.f32 %v5397_v50, %v1142_v15  ;;  %v952_v50 = vadd.f32 %v5216_v35, %v5212_v4  ;;  %v6593_v15 = vld [vmem:[#allocation29_spill] sm:$0xff] }
 0x28a   : > { %v1598_v21 = vpop.f32.mrf.mxu0 }
 0x28b   : > { %v1599_v63 = vadd.f32 %v1598_v21, %v5177_v57  ;;  %v1777_v59 = vpop.f32.mrf.mxu1  ;;  %v1166_v57 = vpop.f32.mrf.mxu2 }
 0x28d   : > { %1661 = vmatmul.f32.gmra.mxu0 %v5152_v56  ;;  %v1778_v14 = vadd.f32 %v1777_v59, %v1599_v63  ;;  %v1152_v63 = vadd.f32 %v1151_v43, %v952_v50 }
 0x28e   : > { %1840 = vmatmul.f32.gmra.mxu1 %v5152_v56  ;;  %v948_v56 = vadd.f32 %v5205_v25, %v5201_v38  ;;  %v5444_v38 = vpop.f32.mrf.mxu3 }
 0x28f   : > { %2104 = vxpose.xlu1.b32.start [1/2] (short) (narrow) %v1778_v14, 16  ;;  %v6592_v14 = vld [vmem:[#allocation32_spill] sm:$0xff] }
 0x292   : > { %v1602_v0 = vpop.f32.mrf.mxu0 }
 0x293   : > { %v1603_v19 = vadd.f32 %v1602_v0, %v5186_v36  ;;  %v1781_v52 = vpop.f32.mrf.mxu1  ;;  %v1147_v36 = vadd.f32 %v1146_v24, %v948_v56  ;;  %v1171_v39 = vpop.f32.mrf.mxu2  ;;  %v6591_v24 = vld [vmem:[#allocation31_spill] sm:$0xff] }
 0x295   : > { %v1782_v11 = vadd.f32 %v1781_v52, %v1603_v19  ;;  %1665 = vmatmul.f32.gmra.mxu0 %v5161_v29 }
 0x296   : > { %1844 = vmatmul.f32.gmra.mxu1 %v5161_v29  ;;  %v1384_v29 = vadd.f32 %v5403_v28, %v1147_v36  ;;  %v956_v28 = vadd.f32 %v6592_v14, %v6591_v24  ;;  %v5451_v52 = vpop.f32.mrf.mxu3 }
 0x297   : > { %2105 = vxpose.xlu1.b32.end [2/2] (short) (narrow) %v1782_v11, 16 }
 0x298   : > { %v1157_v19 = vadd.f32 %v1156_v46, %v956_v28 }
 0x29a   : > { %v1606_v17 = vpop.f32.mrf.mxu0 }
 0x29b   : > { %v1607_v20 = vadd.f32 %v1606_v17, %v1378_v31  ;;  %v1785_v22 = vpop.f32.mrf.mxu1  ;;  %v1176_v60 = vpop.f32.mrf.mxu2 }
 0x29d   : > { %1669 = vmatmul.f32.gmra.mxu0 %v5170_v2  ;;  %v1786_v18 = vadd.f32 %v1785_v22, %v1607_v20  ;;  %v6594_v22 = vld [vmem:[#allocation30_spill] sm:$0xff] }
 0x29e   : > { %1848 = vmatmul.f32.gmra.mxu1 %v5170_v2  ;;  %v1390_v2 = vadd.f32 %v5409_v37, %v1152_v63  ;;  %v960_v37 = vadd.f32 %v5250_v26, %v5246_v41  ;;  %v5461_v36 = vpop.f32.mrf.mxu3 }
 0x29f   : > { %2136 = vxpose.xlu2.b32.start [1/2] (short) (narrow) %v1786_v18, 16 }
 0x2a0   : > { %v1162_v20 = vadd.f32 %v1161_v32, %v960_v37 }
 0x2a2   : > { %v1610_v10 = vpop.f32.mrf.mxu0  ;;  %v1402_v18 = vadd.f32 %v5420_v5, %v1162_v20  ;;  %v968_v5 = vadd.f32 %v5265_v9, %v5263_v34 }
 0x2a3   : > { %v1611_v25 = vadd.f32 %v1610_v10, %v1384_v29  ;;  %v1789_v21 = vpop.f32.mrf.mxu1  ;;  %v5458_v56 = vpop.f32.mrf.mxu2 }
 0x2a5   : > { %v1790_v59 = vadd.f32 %v1789_v21, %v1611_v25  ;;  %1673 = vmatmul.f32.gmra.mxu0 %v5179_v6 }
 0x2a6   : > { %1852 = vmatmul.f32.gmra.mxu1 %v5179_v6  ;;  %v1396_v6 = vadd.f32 %v5414_v13, %v1157_v19  ;;  %v964_v13 = vadd.f32 %v5259_v49, %v5257_v53  ;;  %v5474_v21 = vpop.f32.mrf.mxu3 }
 0x2a7   : > { %2137 = vxpose.xlu2.b32.end [2/2] (short) (narrow) %v1790_v59, 16 }
 0x2a8   : > { %v1167_v50 = vadd.f32 %v1166_v57, %v964_v13 }
 0x2aa   : > { %v1614_v0 = vpop.f32.mrf.mxu0  ;;  %v1408_v25 = vadd.f32 %v5426_v45, %v1167_v50  ;;  %v972_v45 = vadd.f32 %v5270_v48, %v5268_v8  ;;  %v6595_v50 = vld [vmem:[#allocation33_spill] sm:$0xff] }
 0x2ab   : > { %v1615_v4 = vadd.f32 %v1614_v0, %v1390_v2  ;;  %v1793_v35 = vpop.f32.mrf.mxu1  ;;  %v5468_v10 = vpop.f32.mrf.mxu2  ;;  %v1172_v2 = vadd.f32 %v1171_v39, %v968_v5 }
 0x2ad   : > { %1677 = vmatmul.f32.gmra.mxu0 %v6593_v15  ;;  %v1794_v43 = vadd.f32 %v1793_v35, %v1615_v4  ;;  %v1414_v9 = vadd.f32 %v5437_v44, %v1172_v2 }
 0x2ae   : > { %1856 = vmatmul.f32.gmra.mxu1 %v6593_v15  ;;  %v5491_v0 = vpop.f32.mrf.mxu3 }
 0x2af   : > { %2168 = vxpose.xlu0.b32.start [1/2] (short) (narrow) %v1794_v43, 16  ;;  %v1177_v43 = vadd.f32 %v1176_v60, %v972_v45  ;;  %v976_v60 = vadd.f32 %v5275_v27, %v5273_v3 }
 0x2b1   : > { %v1420_v48 = vadd.f32 %v5444_v38, %v1177_v43  ;;  %v1182_v13 = vadd.f32 %v5458_v56, %v976_v60 }
 0x2b2   : > { %v1618_v11 = vpop.f32.mrf.mxu0 }
 0x2b3   : > { %v1619_v31 = vadd.f32 %v1618_v11, %v1396_v6  ;;  %v1797_v17 = vpop.f32.mrf.mxu1  ;;  %v5484_v34 = vpop.f32.mrf.mxu2  ;;  %v1426_v56 = vadd.f32 %v5451_v52, %v1182_v13 }
 0x2b5   : > { %v1798_v46 = vadd.f32 %v1797_v17, %v1619_v31  ;;  %1681 = vmatmul.f32.gmra.mxu0 %v6594_v22 }
 0x2b6   : > { %1860 = vmatmul.f32.gmra.mxu1 %v6594_v22 }
 0x2b7   : > { %2169 = vxpose.xlu0.b32.end [2/2] (short) (narrow) %v1798_v46, 16 }
 0x2ba   : > { %v1622_v41 = vpop.f32.mrf.mxu0 }
 0x2bb   : > { %v1623_v26 = vadd.f32 %v1622_v41, %v1402_v18  ;;  %v1801_v29 = vpop.f32.mrf.mxu1  ;;  %v5507_v31 = vpop.f32.mrf.mxu2 }
 0x2bc   : > { %v5512_v41 = vpop.f32.mrf.mxu3 }
 0x2bd   : > { %1685 = vmatmul.f32.gmra.mxu0 %v5210_v1  ;;  %v1802_v32 = vadd.f32 %v1801_v29, %v1623_v26 }
 0x2be   : > { %1864 = vmatmul.f32.gmra.mxu1 %v5210_v1 }
 0x2bf   : > { %2200 = vxpose.xlu1.b32.start [1/2] (short) (narrow) %v1802_v32, 16  ;;  %v980_v32 = vadd.f32 %v6595_v50, %v5279_v55 }
 0x2c2   : > { %v1626_v49 = vpop.f32.mrf.mxu0 }
 0x2c3   : > { %v1627_v53 = vadd.f32 %v1626_v49, %v1408_v25  ;;  %v1896_v63 = vpop.trf.xlu0  ;;  %v1805_v59 = vpop.f32.mrf.mxu1 }
 0x2c4   : > { %v2523_v57 = vsel %vm324_vm0, %v1896_v63, 0 }
 0x2c5   : > { %v5477_v24 = vand.u32 4294901760, %v2523_v57  ;;  %v1806_v14 = vadd.f32 %v1805_v59, %v1627_v53  ;;  %1689 = vmatmul.f32.gmra.mxu0 %v5223_v42 }
 0x2c6   : > { %1868 = vmatmul.f32.gmra.mxu1 %v5223_v42 }
 0x2c7   : > { %v5481_v1 = vsub.f32 %v2523_v57, %v5477_v24  ;;  %2201 = vxpose.xlu1.b32.end [2/2] (short) (narrow) %v1806_v14, 16  ;;  %3008 = vmatmul.f32.vlgmr.msrb.gmra.mxu3 %v5477_v24  ;;  %v1187_v14 = vadd.f32 %v5468_v10, %v980_v32 }
 0x2c9   : > { %v2662_v39 = vand.u32 4294901760, %v5481_v1  ;;  %v1432_v10 = vadd.f32 %v5461_v36, %v1187_v14 }
 0x2ca   : > { %v1630_v28 = vpop.f32.mrf.mxu0 }
 0x2cb   : > { %v2663_v4 = vsub.f32 %v5481_v1, %v2662_v39  ;;  %v1631_v35 = vadd.f32 %v1630_v28, %v1414_v9  ;;  %v1897_v19 = vpop.trf.xlu0  ;;  %v1809_v15 = vpop.f32.mrf.mxu1 }
 0x2cc   : > { %v2526_v42 = vsel %vm324_vm0, %v1897_v19, 0  ;;  %v5537_v28 = vpop.f32.mrf.mxu3  ;;  %v6596_v19 = vld [vmem:[#allocation34_spill] sm:$0xff] }
 0x2cd   : > { %v2664_v6 = vand.u32 4294901760, %v2663_v4  ;;  %v5495_v37 = vand.u32 4294901760, %v2526_v42  ;;  %1693 = vmatmul.f32.gmra.mxu0 %v5244_v58  ;;  %v1810_v44 = vadd.f32 %v1809_v15, %v1631_v35 }
 0x2ce   : > { %1872 = vmatmul.f32.gmra.mxu1 %v5244_v58 }
 0x2cf   : > { %v5499_v8 = vsub.f32 %v2526_v42, %v5495_v37  ;;  %2232 = vxpose.xlu2.b32.start [1/2] (short) (narrow) %v1810_v44, 16  ;;  %2665 = vmatmul.f32.vlgmr.msrb.gmra.mxu2 %v2664_v6  ;;  %v984_v42 = vadd.f32 %v6596_v19, %v5285_v30 }
 0x2d0   : > { %3012 = vmatmul.f32.gmra.mxu3 %v5495_v37 }
 0x2d1   : > { %v2670_v11 = vand.u32 4294901760, %v5499_v8 }
 0x2d2   : > { %v1634_v17 = vpop.f32.mrf.mxu0 }
 0x2d3   : > { %v1635_v20 = vadd.f32 %v1634_v17, %v1420_v48  ;;  %v1928_v46 = vpop.trf.xlu1  ;;  %v2671_v22 = vsub.f32 %v5499_v8, %v2670_v11  ;;  %v1813_v18 = vpop.f32.mrf.mxu1 }
 0x2d4   : > { %v2529_v58 = vsel %vm324_vm0, %v1928_v46, 0 }
 0x2d5   : > { %v5514_v38 = vand.u32 4294901760, %v2529_v58  ;;  %v1814_v26 = vadd.f32 %v1813_v18, %v1635_v20  ;;  %1697 = vmatmul.f32.gmra.mxu0 %v5255_v51  ;;  %v2672_v3 = vand.u32 4294901760, %v2671_v22 }
 0x2d6   : > { %1876 = vmatmul.f32.gmra.mxu1 %v5255_v51  ;;  %v5528_v51 = vpop.f32.mrf.mxu2 }
 0x2d7   : > { %v5518_v27 = vsub.f32 %v2529_v58, %v5514_v38  ;;  %2233 = vxpose.xlu2.b32.end [2/2] (short) (narrow) %v1814_v26, 16  ;;  %2673 = vmatmul.f32.gmra.mxu2 %v2672_v3  ;;  %v6597_v58 = vld [vmem:[#allocation35_spill] sm:$0xff] }
 0x2d8   : > { %3016 = vmatmul.f32.gmra.mxu3 %v5514_v38  ;;  %v1960_v29 = vpop.trf.xlu2  ;;  %v988_v18 = vadd.f32 %v6597_v58, %v5291_v62 }
 0x2d9   : > { %v2678_v25 = vand.u32 4294901760, %v5518_v27  ;;  %v2535_v63 = vsel %vm324_vm0, %v1960_v29, 0 }
 0x2da   : > { %v1638_v5 = vpop.f32.mrf.mxu0  ;;  %v5535_v45 = vand.u32 4294901760, %v2535_v63 }
 0x2db   : > { %v1639_v49 = vadd.f32 %v1638_v5, %v1426_v56  ;;  %v1929_v53 = vpop.trf.xlu1  ;;  %v2679_v57 = vsub.f32 %v5518_v27, %v2678_v25  ;;  %v1817_v2 = vpop.f32.mrf.mxu1  ;;  %v6598_v5 = vld [vmem:[#allocation36_spill] sm:$0xff] }
 0x2dc   : > { %v2532_v59 = vsel %vm324_vm0, %v1929_v53, 0  ;;  %v5545_v15 = vsub.f32 %v2535_v63, %v5535_v45 }
 0x2dd   : > { %v5532_v52 = vand.u32 4294901760, %v2532_v59  ;;  %3190 = vmatmul.f32.vlgmr.msra.gmra.mxu0 %v5481_v1  ;;  %v1818_v55 = vadd.f32 %v1817_v2, %v1639_v49  ;;  %v2680_v9 = vand.u32 4294901760, %v2679_v57  ;;  %v992_v49 = vadd.f32 %v6598_v5, %v5297_v7 }
 0x2de   : > { %3410 = vmatmul.f32.vlgmr.msra.gmra.mxu1 %v2662_v39  ;;  %v1192_v39 = vadd.f32 %v5484_v34, %v984_v42  ;;  %v1206_v36 = vpop.f32.mrf.mxu2  ;;  %v2694_v46 = vand.u32 4294901760, %v5545_v15  ;;  %v5557_v34 = vpop.f32.mrf.mxu3 }
 0x2df   : > { %v2685_v4 = vsub.f32 %v2532_v59, %v5532_v52  ;;  %2264 = vxpose.xlu0.b32.start [1/2] (short) (narrow) %v1818_v55, 16  ;;  %2681 = vmatmul.f32.gmra.mxu2 %v2680_v9  ;;  %v1202_v2 = vadd.f32 %v5528_v51, %v992_v49  ;;  %v6601_v49 = vld [vmem:[#allocation39_spill] sm:$0xff] }
 0x2e0   : > { %3020 = vmatmul.f32.gmra.mxu3 %v5532_v52  ;;  %v1961_v35 = vpop.trf.xlu2  ;;  %v1438_v22 = vadd.f32 %v5474_v21, %v1192_v39  ;;  %v2695_v26 = vsub.f32 %v5545_v15, %v2694_v46 }
 0x2e1   : > { %v2686_v1 = vand.u32 4294901760, %v2685_v4  ;;  %v2538_v44 = vsel %vm324_vm0, %v1961_v35, 0  ;;  %v1450_v9 = vadd.f32 %v5512_v41, %v1202_v2  ;;  %v6599_v35 = vld [vmem:[#allocation37_spill] sm:$0xff] }
 0x2e2   : > { %v1642_v43 = vpop.f32.mrf.mxu0  ;;  %v5551_v30 = vand.u32 4294901760, %v2538_v44  ;;  %v2696_v50 = vand.u32 4294901760, %v2695_v26 }
 0x2e3   : > { %v1643_v6 = vadd.f32 %v1642_v43, %v1432_v10  ;;  %v2687_v48 = vsub.f32 %v2685_v4, %v2686_v1  ;;  %v1821_v60 = vpop.f32.mrf.mxu1  ;;  %v996_v10 = vadd.f32 %v6599_v35, %v5303_v12 }
 0x2e5   : > { %v1822_v17 = vadd.f32 %v1821_v60, %v1643_v6  ;;  %3195 = vmatmul.f32.gmra.mxu0 %v5499_v8  ;;  %v2688_v20 = vand.u32 4294901760, %v2687_v48  ;;  %v5560_v8 = vsub.f32 %v2538_v44, %v5551_v30 }
 0x2e6   : > { %3416 = vmatmul.f32.gmra.mxu1 %v2670_v11  ;;  %v1197_v11 = vadd.f32 %v5507_v31, %v988_v18  ;;  %v1211_v62 = vpop.f32.mrf.mxu2 }
 0x2e7   : > { %2265 = vxpose.xlu0.b32.end [2/2] (short) (narrow) %v1822_v17, 16  ;;  %2689 = vmatmul.f32.gmra.mxu2 %v2688_v20  ;;  %v2702_v21 = vand.u32 4294901760, %v5560_v8 }
 0x2e8   : > { %3024 = vmatmul.f32.gmra.mxu3 %v5535_v45  ;;  %v1444_v32 = vadd.f32 %v5491_v0, %v1197_v11 }
 0x2e9   : > { %v2703_v31 = vsub.f32 %v5560_v8, %v2702_v21 }
 0x2ea   : > { %v1646_v13 = vpop.f32.mrf.mxu0 }
 0x2eb   : > { %v1647_v3 = vadd.f32 %v1646_v13, %v1438_v22  ;;  %v1825_v29 = vpop.f32.mrf.mxu1  ;;  %v2704_v55 = vand.u32 4294901760, %v2703_v31 }
 0x2ed   : > { %3200 = vmatmul.f32.gmra.mxu0 %v5518_v27  ;;  %v1826_v56 = vadd.f32 %v1825_v29, %v1647_v3  ;;  %v5573_v27 = vpop.f32.mrf.mxu3 }
 0x2ee   : > { %3422 = vmatmul.f32.gmra.mxu1 %v2678_v25  ;;  %v1216_v19 = vpop.f32.mrf.mxu2 }
 0x2ef   : > { %2296 = vxpose.xlu1.b32.start [1/2] (short) (narrow) %v1826_v56, 16  ;;  %2697 = vmatmul.f32.gmra.mxu2 %v2696_v50 }
 0x2f0   : > { %3028 = vmatmul.f32.gmra.mxu3 %v5551_v30 }
 0x2f2   : > { %v1650_v53 = vpop.f32.mrf.mxu0 }
 0x2f3   : > { %v1651_v63 = vadd.f32 %v1650_v53, %v1444_v32  ;;  %v1992_v57 = vpop.trf.xlu0  ;;  %v1829_v59 = vpop.f32.mrf.mxu1  ;;  %v1004_v53 = vadd.f32 %v6601_v49, %v5315_v33 }
 0x2f4   : > { %v2541_v25 = vsel %vm324_vm0, %v1992_v57, 0 }
 0x2f5   : > { %v5577_v14 = vand.u32 4294901760, %v2541_v25  ;;  %v1830_v0 = vadd.f32 %v1829_v59, %v1651_v63  ;;  %3205 = vmatmul.f32.gmra.mxu0 %v2685_v4  ;;  %v5589_v60 = vpop.f32.mrf.mxu3 }
 0x2f6   : > { %3428 = vmatmul.f32.gmra.mxu1 %v2686_v1  ;;  %v1207_v1 = vadd.f32 %v1206_v36, %v996_v10  ;;  %v6600_v36 = vld [vmem:[#allocation38_spill] sm:$0xff]  ;;  %v1221_v3 = vpop.f32.mrf.mxu2 }
 0x2f7   : > { %v5580_v7 = vsub.f32 %v2541_v25, %v5577_v14  ;;  %2297 = vxpose.xlu1.b32.end [2/2] (short) (narrow) %v1830_v0, 16  ;;  %2705 = vmatmul.f32.gmra.mxu2 %v2704_v55  ;;  %v1000_v22 = vadd.f32 %v6600_v36, %v5309_v23  ;;  %v1217_v0 = vadd.f32 %v1216_v19, %v1004_v53  ;;  %v6602_v19 = vld [vmem:[#allocation40_spill] sm:$0xff] }
 0x2f8   : > { %3032 = vmatmul.f32.gmra.mxu3 %v5577_v14  ;;  %v1456_v20 = vadd.f32 %v5537_v28, %v1207_v1 }
 0x2f9   : > { %v2710_v51 = vand.u32 4294901760, %v5580_v7 }
 0x2fa   : > { %v1654_v42 = vpop.f32.mrf.mxu0 }
 0x2fb   : > { %v1655_v43 = vadd.f32 %v1654_v42, %v1450_v9  ;;  %v1993_v4 = vpop.trf.xlu0  ;;  %v2711_v6 = vsub.f32 %v5580_v7, %v2710_v51  ;;  %v1833_v48 = vpop.f32.mrf.mxu1 }
 0x2fc   : > { %v2544_v44 = vsel %vm324_vm0, %v1993_v4, 0  ;;  %v1008_v4 = vadd.f32 %v6602_v19, %v5321_v40 }
 0x2fd   : > { %v5591_v39 = vand.u32 4294901760, %v2544_v44  ;;  %3210 = vmatmul.f32.gmra.mxu0 %v5545_v15  ;;  %v1834_v41 = vadd.f32 %v1833_v48, %v1655_v43  ;;  %v2712_v12 = vand.u32 4294901760, %v2711_v6  ;;  %v5607_v32 = vpop.f32.mrf.mxu3  ;;  %v1468_v43 = vadd.f32 %v5573_v27, %v1217_v0 }
 0x2fe   : > { %3434 = vmatmul.f32.gmra.mxu1 %v2694_v46  ;;  %v1212_v46 = vadd.f32 %v1211_v62, %v1000_v22  ;;  %v1226_v33 = vpop.f32.mrf.mxu2 }
 0x2ff   : > { %v5595_v17 = vsub.f32 %v2544_v44, %v5591_v39  ;;  %2328 = vxpose.xlu2.b32.start [1/2] (short) (narrow) %v1834_v41, 16  ;;  %2713 = vmatmul.f32.gmra.mxu2 %v2712_v12 }
 0x300   : > { %3036 = vmatmul.f32.gmra.mxu3 %v5591_v39  ;;  %v1462_v62 = vadd.f32 %v5557_v34, %v1212_v46 }
 0x301   : > { %v2718_v58 = vand.u32 4294901760, %v5595_v17 }
 0x302   : > { %v1658_v18 = vpop.f32.mrf.mxu0 }
 0x303   : > { %v1659_v13 = vadd.f32 %v1658_v18, %v1456_v20  ;;  %v2024_v15 = vpop.trf.xlu1  ;;  %v2719_v26 = vsub.f32 %v5595_v17, %v2718_v58  ;;  %v1837_v11 = vpop.f32.mrf.mxu1  ;;  %v1222_v20 = vadd.f32 %v1221_v3, %v1008_v4 }
 0x304   : > { %v2547_v29 = vsel %vm324_vm0, %v2024_v15, 0  ;;  %v6603_v15 = vld [vmem:[#allocation41_spill] sm:$0xff] }
 0x305   : > { %v5604_v56 = vand.u32 4294901760, %v2547_v29  ;;  %v1838_v50 = vadd.f32 %v1837_v11, %v1659_v13  ;;  %3215 = vmatmul.f32.gmra.mxu0 %v5560_v8  ;;  %v2720_v28 = vand.u32 4294901760, %v2719_v26  ;;  %v1485_v6 = vpop.f32.mrf.mxu3  ;;  %v1474_v13 = vadd.f32 %v5589_v60, %v1222_v20  ;;  %v6604_v60 = vld [vmem:[#allocation42_spill] sm:$0xff] }
 0x306   : > { %3440 = vmatmul.f32.gmra.mxu1 %v2702_v21  ;;  %v1231_v40 = vpop.f32.mrf.mxu2  ;;  %v1012_v26 = vadd.f32 %v6603_v15, %v5327_v47  ;;  %v1016_v49 = vadd.f32 %v6604_v60, %v5333_v54 }
 0x307   : > { %v5610_v23 = vsub.f32 %v2547_v29, %v5604_v56  ;;  %2329 = vxpose.xlu2.b32.end [2/2] (short) (narrow) %v1838_v50, 16  ;;  %2721 = vmatmul.f32.gmra.mxu2 %v2720_v28 }
 0x308   : > { %3040 = vmatmul.f32.gmra.mxu3 %v5604_v56  ;;  %v2056_v5 = vpop.trf.xlu2  ;;  %v1227_v28 = vadd.f32 %v1226_v33, %v1012_v26 }
 0x309   : > { %v2726_v31 = vand.u32 4294901760, %v5610_v23  ;;  %v2553_v59 = vsel %vm324_vm0, %v2056_v5, 0 }
 0x30a   : > { %v1662_v63 = vpop.f32.mrf.mxu0  ;;  %v5625_v35 = vand.u32 4294901760, %v2553_v59  ;;  %v1480_v47 = vadd.f32 %v5607_v32, %v1227_v28 }
 0x30b   : > { %v1663_v57 = vadd.f32 %v1662_v63, %v1462_v62  ;;  %v2025_v25 = vpop.trf.xlu1  ;;  %v2727_v2 = vsub.f32 %v5610_v23, %v2726_v31  ;;  %v1841_v21 = vpop.f32.mrf.mxu1 }
 0x30c   : > { %v2550_v8 = vsel %vm324_vm0, %v2025_v25, 0  ;;  %v5633_v44 = vsub.f32 %v2553_v59, %v5625_v35 }
 0x30d   : > { %v5622_v55 = vand.u32 4294901760, %v2550_v8  ;;  %3220 = vmatmul.f32.gmra.mxu0 %v5580_v7  ;;  %v1842_v34 = vadd.f32 %v1841_v21, %v1663_v57  ;;  %v2728_v9 = vand.u32 4294901760, %v2727_v2  ;;  %v1491_v11 = vpop.f32.mrf.mxu3 }
 0x30e   : > { %3446 = vmatmul.f32.gmra.mxu1 %v2710_v51  ;;  %v2742_v27 = vand.u32 4294901760, %v5633_v44  ;;  %v1236_v53 = vpop.f32.mrf.mxu2 }
 0x30f   : > { %v2733_v10 = vsub.f32 %v2550_v8, %v5622_v55  ;;  %2360 = vxpose.xlu0.b32.start [1/2] (short) (narrow) %v1842_v34, 16  ;;  %2729 = vmatmul.f32.gmra.mxu2 %v2728_v9  ;;  %v6605_v9 = vld [vmem:[#allocation43_spill] sm:$0xff] }
 0x310   : > { %3044 = vmatmul.f32.gmra.mxu3 %v5622_v55  ;;  %v2057_v42 = vpop.trf.xlu2  ;;  %v2743_v29 = vsub.f32 %v5633_v44, %v2742_v27  ;;  %v1020_v33 = vadd.f32 %v6605_v9, %v5339_v61 }
 0x311   : > { %v2734_v7 = vand.u32 4294901760, %v2733_v10  ;;  %v2556_v41 = vsel %vm324_vm0, %v2057_v42, 0 }
 0x312   : > { %v1666_v48 = vpop.f32.mrf.mxu0  ;;  %v5638_v18 = vand.u32 4294901760, %v2556_v41  ;;  %v2744_v62 = vand.u32 4294901760, %v2743_v29 }
 0x313   : > { %v1667_v1 = vadd.f32 %v1666_v48, %v1468_v43  ;;  %v2735_v12 = vsub.f32 %v2733_v10, %v2734_v7  ;;  %v1845_v51 = vpop.f32.mrf.mxu1 }
 0x314   : > { %v5645_v3 = vsub.f32 %v2556_v41, %v5638_v18 }
 0x315   : > { %v1846_v36 = vadd.f32 %v1845_v51, %v1667_v1  ;;  %3225 = vmatmul.f32.gmra.mxu0 %v5595_v17  ;;  %v2736_v22 = vand.u32 4294901760, %v2735_v12  ;;  %v1497_v8 = vpop.f32.mrf.mxu3  ;;  %v1237_v12 = vadd.f32 %v1236_v53, %v1020_v33  ;;  %v6608_v53 = vld [vmem:[#allocation46_spill] sm:$0xff] }
 0x316   : > { %3452 = vmatmul.f32.gmra.mxu1 %v2718_v58  ;;  %v2750_v5 = vand.u32 4294901760, %v5645_v3  ;;  %v1241_v48 = vpop.f32.mrf.mxu2 }
 0x317   : > { %2361 = vxpose.xlu0.b32.end [2/2] (short) (narrow) %v1846_v36, 16  ;;  %2737 = vmatmul.f32.gmra.mxu2 %v2736_v22  ;;  %v1492_v36 = vadd.f32 %v1491_v11, %v1237_v12  ;;  %v6606_v22 = vld [vmem:[#allocation44_spill] sm:$0xff] }
 0x318   : > { %3048 = vmatmul.f32.gmra.mxu3 %v5625_v35 }
 0x31a   : > { %v1670_v17 = vpop.f32.mrf.mxu0 }
 0x31b   : > { %v1671_v46 = vadd.f32 %v1670_v17, %v1474_v13  ;;  %v1849_v50 = vpop.f32.mrf.mxu1 }
 0x31d   : > { %3230 = vmatmul.f32.gmra.mxu0 %v5610_v23  ;;  %v1850_v58 = vadd.f32 %v1849_v50, %v1671_v46  ;;  %v2751_v23 = vsub.f32 %v5645_v3, %v2750_v5  ;;  %v1503_v20 = vpop.f32.mrf.mxu3 }
 0x31e   : > { %3458 = vmatmul.f32.gmra.mxu1 %v2726_v31  ;;  %v1232_v31 = vadd.f32 %v1231_v40, %v1016_v49  ;;  %v6607_v40 = vld [vmem:[#allocation45_spill] sm:$0xff] }
 0x31f   : > { %2392 = vxpose.xlu1.b32.start [1/2] (short) (narrow) %v1850_v58, 16  ;;  %2745 = vmatmul.f32.gmra.mxu2 %v2744_v62  ;;  %v2752_v32 = vand.u32 4294901760, %v2751_v23  ;;  %v1024_v13 = vadd.f32 %v6607_v40, %v6606_v22  ;;  %v1246_v62 = vpop.f32.mrf.mxu2 }
 0x320   : > { %3052 = vmatmul.f32.gmra.mxu3 %v5638_v18  ;;  %v1486_v34 = vadd.f32 %v1485_v6, %v1232_v31 }
 0x321   : > { %v1242_v28 = vadd.f32 %v1241_v48, %v1024_v13 }
 0x322   : > { %v1674_v63 = vpop.f32.mrf.mxu0 }
 0x323   : > { %v1675_v57 = vadd.f32 %v1674_v63, %v1480_v47  ;;  %v2088_v25 = vpop.trf.xlu0  ;;  %v1853_v2 = vpop.f32.mrf.mxu1  ;;  %v1498_v49 = vadd.f32 %v1497_v8, %v1242_v28  ;;  %v6609_v63 = vld [vmem:[#allocation47_spill] sm:$0xff] }
 0x324   : > { %v2559_v59 = vsel %vm324_vm0, %v2088_v25, 0  ;;  %v1028_v23 = vadd.f32 %v6609_v63, %v6608_v53 }
 0x325   : > { %v5658_v21 = vand.u32 4294901760, %v2559_v59  ;;  %v1854_v0 = vadd.f32 %v1853_v2, %v1675_v57  ;;  %3235 = vmatmul.f32.gmra.mxu0 %v2733_v10  ;;  %v1509_v57 = vpop.f32.mrf.mxu3 }
 0x326   : > { %3464 = vmatmul.f32.gmra.mxu1 %v2734_v7 }
 0x327   : > { %v5661_v54 = vsub.f32 %v2559_v59, %v5658_v21  ;;  %2393 = vxpose.xlu1.b32.end [2/2] (short) (narrow) %v1854_v0, 16  ;;  %2753 = vmatmul.f32.gmra.mxu2 %v2752_v32 }
 0x328   : > { %3056 = vmatmul.f32.gmra.mxu3 %v5658_v21 }
 0x329   : > { %v2758_v42 = vand.u32 4294901760, %v5661_v54 }
 0x32a   : > { %v1678_v43 = vpop.f32.mrf.mxu0 }
 0x32b   : > { %v1679_v19 = vadd.f32 %v1678_v43, %v1486_v34  ;;  %v2089_v4 = vpop.trf.xlu0  ;;  %v2759_v10 = vsub.f32 %v5661_v54, %v2758_v42  ;;  %v1857_v41 = vpop.f32.mrf.mxu1  ;;  %v1247_v34 = vadd.f32 %v1246_v62, %v1028_v23 }
 0x32c   : > { %v2562_v1 = vsel %vm324_vm0, %v2089_v4, 0  ;;  %v1251_v4 = vpop.f32.mrf.mxu2 }
 0x32d   : > { %v5669_v7 = vand.u32 4294901760, %v2562_v1  ;;  %3240 = vmatmul.f32.gmra.mxu0 %v5633_v44  ;;  %v1858_v6 = vadd.f32 %v1857_v41, %v1679_v19  ;;  %v2760_v51 = vand.u32 4294901760, %v2759_v10  ;;  %v1504_v48 = vadd.f32 %v1503_v20, %v1247_v34  ;;  %v6611_v41 = vld [vmem:[#allocation49_spill] sm:$0xff] }
 0x32e   : > { %3470 = vmatmul.f32.gmra.mxu1 %v2742_v27 }
 0x32f   : > { %v5673_v61 = vsub.f32 %v2562_v1, %v5669_v7  ;;  %2424 = vxpose.xlu2.b32.start [1/2] (short) (narrow) %v1858_v6, 16  ;;  %2761 = vmatmul.f32.gmra.mxu2 %v2760_v51  ;;  %v6610_v1 = vld [vmem:[#allocation48_spill] sm:$0xff] }
 0x330   : > { %3060 = vmatmul.f32.gmra.mxu3 %v5669_v7  ;;  %v1032_v12 = vadd.f32 %v6611_v41, %v6610_v1 }
 0x331   : > { %v2766_v15 = vand.u32 4294901760, %v5673_v61 }
 0x332   : > { %v1682_v26 = vpop.f32.mrf.mxu0 }
 0x333   : > { %v1683_v17 = vadd.f32 %v1682_v26, %v1492_v36  ;;  %v2120_v44 = vpop.trf.xlu1  ;;  %v2767_v29 = vsub.f32 %v5673_v61, %v2766_v15  ;;  %v1861_v50 = vpop.f32.mrf.mxu1  ;;  %v1252_v26 = vadd.f32 %v1251_v4, %v1032_v12 }
 0x334   : > { %v2565_v46 = vsel %vm324_vm0, %v2120_v44, 0  ;;  %v1515_v36 = vpop.f32.mrf.mxu3 }
 0x335   : > { %v5681_v58 = vand.u32 4294901760, %v2565_v46  ;;  %v1862_v27 = vadd.f32 %v1861_v50, %v1683_v17  ;;  %3245 = vmatmul.f32.gmra.mxu0 %v5645_v3  ;;  %v2768_v11 = vand.u32 4294901760, %v2767_v29  ;;  %v6612_v50 = vld [vmem:[#allocation50_spill] sm:$0xff] }
 0x336   : > { %3476 = vmatmul.f32.gmra.mxu1 %v2750_v5  ;;  %v1036_v28 = vadd.f32 %v5367_v16, %v6612_v50 }
 0x337   : > { %v5685_v47 = vsub.f32 %v2565_v46, %v5681_v58  ;;  %2425 = vxpose.xlu2.b32.end [2/2] (short) (narrow) %v1862_v27, 16  ;;  %2769 = vmatmul.f32.gmra.mxu2 %v2768_v11  ;;  %v1510_v46 = vadd.f32 %v1509_v57, %v1252_v26  ;;  %v1256_v27 = vpop.f32.mrf.mxu2 }
 0x338   : > { %3064 = vmatmul.f32.gmra.mxu3 %v5681_v58  ;;  %v2152_v60 = vpop.trf.xlu2  ;;  %v1257_v63 = vadd.f32 %v1256_v27, %v1036_v28 }
 0x339   : > { %v2774_v25 = vand.u32 4294901760, %v5685_v47  ;;  %v2571_v0 = vsel %vm324_vm0, %v2152_v60, 0 }
 0x33a   : > { %v1686_v59 = vpop.f32.mrf.mxu0  ;;  %v5699_v43 = vand.u32 4294901760, %v2571_v0  ;;  %v1516_v16 = vadd.f32 %v1515_v36, %v1257_v63 }
 0x33b   : > { %v1687_v2 = vadd.f32 %v1686_v59, %v1498_v49  ;;  %v2121_v31 = vpop.trf.xlu1  ;;  %v2775_v32 = vsub.f32 %v5685_v47, %v2774_v25  ;;  %v1865_v5 = vpop.f32.mrf.mxu1 }
 0x33c   : > { %v2568_v3 = vsel %vm324_vm0, %v2121_v31, 0 }
 0x33d   : > { %v5696_v9 = vand.u32 4294901760, %v2568_v3  ;;  %3250 = vmatmul.f32.gmra.mxu0 %v5661_v54  ;;  %v1866_v8 = vadd.f32 %v1865_v5, %v1687_v2  ;;  %v2776_v33 = vand.u32 4294901760, %v2775_v32  ;;  %v5706_v54 = vsub.f32 %v2571_v0, %v5699_v43 }
 0x33e   : > { %3482 = vmatmul.f32.gmra.mxu1 %v2758_v42 }
 0x33f   : > { %v2781_v19 = vsub.f32 %v2568_v3, %v5696_v9  ;;  %2456 = vxpose.xlu0.b32.start [1/2] (short) (narrow) %v1866_v8, 16  ;;  %2777 = vmatmul.f32.gmra.mxu2 %v2776_v33  ;;  %v2790_v20 = vand.u32 4294901760, %v5706_v54 }
 0x340   : > { %3068 = vmatmul.f32.gmra.mxu3 %v5696_v9  ;;  %v2153_v10 = vpop.trf.xlu2 }
 0x341   : > { %v2782_v6 = vand.u32 4294901760, %v2781_v19  ;;  %v2574_v40 = vsel %vm324_vm0, %v2153_v10, 0 }
 0x342   : > { %v1690_v51 = vpop.f32.mrf.mxu0  ;;  %v5711_v29 = vand.u32 4294901760, %v2574_v40 }
 0x343   : > { %v1691_v22 = vadd.f32 %v1690_v51, %v1504_v48  ;;  %v2783_v13 = vsub.f32 %v2781_v19, %v2782_v6  ;;  %v1869_v42 = vpop.f32.mrf.mxu1 }
 0x344   : > { %v2797_v11 = vsub.f32 %v2574_v40, %v5711_v29 }
 0x345   : > { %v1870_v17 = vadd.f32 %v1869_v42, %v1691_v22  ;;  %3255 = vmatmul.f32.gmra.mxu0 %v5673_v61  ;;  %v2784_v44 = vand.u32 4294901760, %v2783_v13  ;;  %v2791_v61 = vsub.f32 %v5706_v54, %v2790_v20 }
 0x346   : > { %3488 = vmatmul.f32.gmra.mxu1 %v2766_v15  ;;  %v2798_v23 = vand.u32 4294901760, %v2797_v11 }
 0x347   : > { %2457 = vxpose.xlu0.b32.end [2/2] (short) (narrow) %v1870_v17, 16  ;;  %2785 = vmatmul.f32.gmra.mxu2 %v2784_v44  ;;  %v2792_v59 = vand.u32 4294901760, %v2791_v61 }
 0x348   : > { %3072 = vmatmul.f32.gmra.mxu3 %v5699_v43  ;;  %v2799_v2 = vsub.f32 %v2797_v11, %v2798_v23 }
 0x34a   : > { %v1694_v62 = vpop.f32.mrf.mxu0  ;;  %v3009_v49 = vpop.f32.mrf.mxu3 }
 0x34b   : > { %v1695_v60 = vadd.f32 %v1694_v62, %v1510_v46  ;;  %v1873_v53 = vpop.f32.mrf.mxu1 }
 0x34d   : > { %3260 = vmatmul.f32.gmra.mxu0 %v5685_v47  ;;  %v1874_v15 = vadd.f32 %v1873_v53, %v1695_v60 }
 0x34e   : > { %3494 = vmatmul.f32.gmra.mxu1 %v2774_v25  ;;  %v2800_v25 = vand.u32 4294901760, %v2799_v2 }
 0x34f   : > { %2488 = vxpose.xlu1.b32.start [1/2] (short) (narrow) %v1874_v15, 16  ;;  %2793 = vmatmul.f32.gmra.mxu2 %v2792_v59 }
 0x350   : > { %3076 = vmatmul.f32.gmra.mxu3 %v5711_v29 }
 0x352   : > { %v1698_v57 = vpop.f32.mrf.mxu0  ;;  %v2666_v0 = vpop.f32.mrf.mxu2 }
 0x353   : > { %v1699_v31 = vadd.f32 %v1698_v57, %v1516_v16  ;;  %v3013_v32 = vpop.f32.mrf.mxu3  ;;  %v5720_v3 = vadd.f32 %v3009_v49, %v2666_v0  ;;  %v2184_v5 = vpop.trf.xlu0 }
 0x354   : > { %v1877_v34 = vpop.f32.mrf.mxu1  ;;  %v2577_v47 = vsel %vm324_vm0, %v2184_v5, 0 }
 0x355   : > { %v1878_v8 = vadd.f32 %v1877_v34, %v1699_v31  ;;  %3265 = vmatmul.f32.gmra.mxu0 %v2781_v19  ;;  %v5723_v33 = vand.u32 4294901760, %v2577_v47 }
 0x356   : > { %3500 = vmatmul.f32.gmra.mxu1 %v2782_v6 }
 0x357   : > { %2489 = vxpose.xlu1.b32.end [2/2] (short) (narrow) %v1878_v8, 16  ;;  %v2805_v4 = vsub.f32 %v2577_v47, %v5723_v33  ;;  %2801 = vmatmul.f32.gmra.mxu2 %v2800_v25 }
 0x358   : > { %3080 = vmatmul.f32.gmra.mxu3 %v5723_v33 }
 0x359   : > { %v2806_v10 = vand.u32 4294901760, %v2805_v4 }
 0x35a   : > { %v5727_v48 = vpop.f32.mrf.mxu0  ;;  %v2674_v1 = vpop.f32.mrf.mxu2 }
 0x35b   : > { %v3017_v41 = vpop.f32.mrf.mxu3  ;;  %v5729_v12 = vadd.f32 %v3013_v32, %v2674_v1  ;;  %v2185_v51 = vpop.trf.xlu0  ;;  %v2807_v19 = vsub.f32 %v2805_v4, %v2806_v10 }
 0x35c   : > { %v5731_v36 = vpop.f32.mrf.mxu1  ;;  %v2580_v22 = vsel %vm324_vm0, %v2185_v51, 0 }
 0x35d   : > { %3270 = vmatmul.f32.gmra.mxu0 %v5706_v54  ;;  %v5735_v6 = vand.u32 4294901760, %v2580_v22  ;;  %v2808_v40 = vand.u32 4294901760, %v2807_v19 }
 0x35e   : > { %3506 = vmatmul.f32.gmra.mxu1 %v2790_v20 }
 0x35f   : > { %v2813_v13 = vsub.f32 %v2580_v22, %v5735_v6  ;;  %2809 = vmatmul.f32.gmra.mxu2 %v2808_v40 }
 0x360   : > { %3084 = vmatmul.f32.gmra.mxu3 %v5735_v6 }
 0x361   : > { %v2814_v42 = vand.u32 4294901760, %v2813_v13 }
 0x362   : > { %v5739_v26 = vpop.f32.mrf.mxu0  ;;  %v2682_v17 = vpop.f32.mrf.mxu2 }
 0x363   : > { %v3021_v44 = vpop.f32.mrf.mxu3  ;;  %v5741_v46 = vadd.f32 %v3017_v41, %v2682_v17  ;;  %v2216_v50 = vpop.trf.xlu1  ;;  %v2815_v54 = vsub.f32 %v2813_v13, %v2814_v42 }
 0x364   : > { %v5743_v28 = vpop.f32.mrf.mxu1  ;;  %v2583_v27 = vsel %vm324_vm0, %v2216_v50, 0 }
 0x365   : > { %3275 = vmatmul.f32.gmra.mxu0 %v2797_v11  ;;  %v5746_v20 = vand.u32 4294901760, %v2583_v27  ;;  %v2816_v62 = vand.u32 4294901760, %v2815_v54 }
 0x366   : > { %3512 = vmatmul.f32.gmra.mxu1 %v2798_v23 }
 0x367   : > { %v2821_v61 = vsub.f32 %v2583_v27, %v5746_v20  ;;  %2817 = vmatmul.f32.gmra.mxu2 %v2816_v62 }
 0x368   : > { %3088 = vmatmul.f32.gmra.mxu3 %v5746_v20  ;;  %v2248_v60 = vpop.trf.xlu2 }
 0x369   : > { %v2822_v49 = vand.u32 4294901760, %v2821_v61  ;;  %v2589_v59 = vsel %vm324_vm0, %v2248_v60, 0 }
 0x36a   : > { %v5750_v53 = vpop.f32.mrf.mxu0  ;;  %v2690_v63 = vpop.f32.mrf.mxu2  ;;  %v5760_v0 = vand.u32 4294901760, %v2589_v59 }
 0x36b   : > { %v3025_v15 = vpop.f32.mrf.mxu3  ;;  %v5753_v16 = vadd.f32 %v3021_v44, %v2690_v63  ;;  %v2217_v11 = vpop.trf.xlu1  ;;  %v2823_v2 = vsub.f32 %v2821_v61, %v2822_v49 }
 0x36c   : > { %v5755_v57 = vpop.f32.mrf.mxu1  ;;  %v2586_v23 = vsel %vm324_vm0, %v2217_v11, 0  ;;  %6613 = vst [vmem:[#allocation18_spill] sm:$0xff] %v5760_v0  ;;  %v2837_v8 = vsub.f32 %v2589_v59, %v5760_v0 }
 0x36d   : > { %3280 = vmatmul.f32.gmra.mxu0 %v2805_v4  ;;  %v5758_v31 = vand.u32 4294901760, %v2586_v23  ;;  %v2824_v32 = vand.u32 4294901760, %v2823_v2 }
 0x36e   : > { %3518 = vmatmul.f32.gmra.mxu1 %v2806_v10  ;;  %v2838_v22 = vand.u32 4294901760, %v2837_v8 }
 0x36f   : > { %v2829_v5 = vsub.f32 %v2586_v23, %v5758_v31  ;;  %2825 = vmatmul.f32.gmra.mxu2 %v2824_v32 }
 0x370   : > { %3092 = vmatmul.f32.gmra.mxu3 %v5758_v31  ;;  %v2249_v34 = vpop.trf.xlu2  ;;  %v2839_v54 = vsub.f32 %v2837_v8, %v2838_v22 }
 0x371   : > { %v2830_v47 = vand.u32 4294901760, %v2829_v5  ;;  %v2592_v4 = vsel %vm324_vm0, %v2249_v34, 0 }
 0x372   : > { %v5765_v25 = vpop.f32.mrf.mxu0  ;;  %v2698_v1 = vpop.f32.mrf.mxu2  ;;  %v5772_v40 = vand.u32 4294901760, %v2592_v4 }
 0x373   : > { %v3029_v41 = vpop.f32.mrf.mxu3  ;;  %v5768_v51 = vadd.f32 %v3025_v15, %v2698_v1  ;;  %v2831_v10 = vsub.f32 %v2829_v5, %v2830_v47  ;;  %v2840_v15 = vand.u32 4294901760, %v2839_v54 }
 0x374   : > { %v5770_v19 = vpop.f32.mrf.mxu1  ;;  %6614 = vst [vmem:[#allocation15_spill] sm:$0xff] %v5772_v40  ;;  %v2845_v44 = vsub.f32 %v2592_v4, %v5772_v40 }
 0x375   : > { %3285 = vmatmul.f32.gmra.mxu0 %v2813_v13  ;;  %v2832_v17 = vand.u32 4294901760, %v2831_v10 }
 0x376   : > { %3524 = vmatmul.f32.gmra.mxu1 %v2814_v42  ;;  %v2846_v13 = vand.u32 4294901760, %v2845_v44 }
 0x377   : > { %2833 = vmatmul.f32.gmra.mxu2 %v2832_v17 }
 0x378   : > { %3096 = vmatmul.f32.gmra.mxu3 %v5760_v0  ;;  %v2847_v59 = vsub.f32 %v2845_v44, %v2846_v13 }
 0x37a   : > { %v5776_v50 = vpop.f32.mrf.mxu0  ;;  %v2706_v27 = vpop.f32.mrf.mxu2 }
 0x37b   : > { %v3033_v62 = vpop.f32.mrf.mxu3  ;;  %v5778_v60 = vadd.f32 %v3029_v41, %v2706_v27  ;;  %v2848_v41 = vand.u32 4294901760, %v2847_v59 }
 0x37c   : > { %v5780_v63 = vpop.f32.mrf.mxu1 }
 0x37d   : > { %3290 = vmatmul.f32.gmra.mxu0 %v2821_v61 }
 0x37e   : > { %3530 = vmatmul.f32.gmra.mxu1 %v2822_v49 }
 0x37f   : > { %2841 = vmatmul.f32.gmra.mxu2 %v2840_v15 }
 0x380   : > { %3100 = vmatmul.f32.gmra.mxu3 %v5772_v40 }
 0x382   : > { %v5783_v42 = vpop.f32.mrf.mxu0  ;;  %v2714_v11 = vpop.f32.mrf.mxu2 }
 0x383   : > { %6615 = vst [vmem:[#allocation20_spill] sm:$0xff] %v5783_v42  ;;  %v3037_v2 = vpop.f32.mrf.mxu3  ;;  %v5785_v23 = vadd.f32 %v3033_v62, %v2714_v11  ;;  %v2280_v32 = vpop.trf.xlu0 }
 0x384   : > { %v5787_v34 = vpop.f32.mrf.mxu1  ;;  %v2595_v1 = vsel %vm324_vm0, %v2280_v32, 0 }
 0x385   : > { %6616 = vst [vmem:[#allocation16_spill] sm:$0xff] %v5785_v23  ;;  %3295 = vmatmul.f32.gmra.mxu0 %v2829_v5  ;;  %v5790_v61 = vand.u32 4294901760, %v2595_v1 }
 0x386   : > { %6617 = vst [vmem:[#allocation22_spill] sm:$0xff] %v5787_v34  ;;  %3536 = vmatmul.f32.gmra.mxu1 %v2830_v47 }
 0x387   : > { %6618 = vst [vmem:[#allocation17_spill] sm:$0xff] %v5790_v61  ;;  %v2853_v49 = vsub.f32 %v2595_v1, %v5790_v61  ;;  %2849 = vmatmul.f32.gmra.mxu2 %v2848_v41 }
 0x388   : > { %3104 = vmatmul.f32.gmra.mxu3 %v5790_v61 }
 0x389   : > { %v2854_v4 = vand.u32 4294901760, %v2853_v49 }
 0x38a   : > { %v5794_v10 = vpop.f32.mrf.mxu0  ;;  %v2722_v17 = vpop.f32.mrf.mxu2 }
 0x38b   : > { %6619 = vst [vmem:[#allocation24_spill] sm:$0xff] %v5794_v10  ;;  %v3041_v54 = vpop.f32.mrf.mxu3  ;;  %v5796_v27 = vadd.f32 %v3037_v2, %v2722_v17  ;;  %v2281_v62 = vpop.trf.xlu0  ;;  %v2855_v5 = vsub.f32 %v2853_v49, %v2854_v4 }
 0x38c   : > { %v5798_v15 = vpop.f32.mrf.mxu1  ;;  %v2598_v11 = vsel %vm324_vm0, %v2281_v62, 0 }
 0x38d   : > { %6620 = vst [vmem:[#allocation19_spill] sm:$0xff] %v5796_v27  ;;  %3300 = vmatmul.f32.gmra.mxu0 %v2837_v8  ;;  %v5801_v47 = vand.u32 4294901760, %v2598_v11  ;;  %v2856_v59 = vand.u32 4294901760, %v2855_v5 }
 0x38e   : > { %6621 = vst [vmem:[#allocation26_spill] sm:$0xff] %v5798_v15  ;;  %3542 = vmatmul.f32.gmra.mxu1 %v2838_v22 }
 0x38f   : > { %6622 = vst [vmem:[#allocation21_spill] sm:$0xff] %v5801_v47  ;;  %v2861_v32 = vsub.f32 %v2598_v11, %v5801_v47  ;;  %2857 = vmatmul.f32.gmra.mxu2 %v2856_v59 }
 0x390   : > { %3108 = vmatmul.f32.gmra.mxu3 %v5801_v47 }
 0x391   : > { %v2862_v1 = vand.u32 4294901760, %v2861_v32 }
 0x392   : > { %v5805_v41 = vpop.f32.mrf.mxu0  ;;  %v2730_v2 = vpop.f32.mrf.mxu2 }
 0x393   : > { %6623 = vst [vmem:[#allocation27_spill] sm:$0xff] %v5805_v41  ;;  %v3045_v17 = vpop.f32.mrf.mxu3  ;;  %v5807_v61 = vadd.f32 %v3041_v54, %v2730_v2  ;;  %v2312_v27 = vpop.trf.xlu1  ;;  %v2863_v8 = vsub.f32 %v2861_v32, %v2862_v1 }
 0x394   : > { %v5809_v15 = vpop.f32.mrf.mxu1  ;;  %v2601_v62 = vsel %vm324_vm0, %v2312_v27, 0 }
 0x395   : > { %6624 = vst [vmem:[#allocation23_spill] sm:$0xff] %v5807_v61  ;;  %3305 = vmatmul.f32.gmra.mxu0 %v2845_v44  ;;  %v5812_v22 = vand.u32 4294901760, %v2601_v62  ;;  %v2864_v5 = vand.u32 4294901760, %v2863_v8 }
 0x396   : > { %6625 = vst [vmem:[#allocation28_spill] sm:$0xff] %v5809_v15  ;;  %3548 = vmatmul.f32.gmra.mxu1 %v2846_v13 }
 0x397   : > { %6626 = vst [vmem:[#allocation25_spill] sm:$0xff] %v5812_v22  ;;  %v2869_v11 = vsub.f32 %v2601_v62, %v5812_v22  ;;  %2865 = vmatmul.f32.gmra.mxu2 %v2864_v5 }
 0x398   : > { %3112 = vmatmul.f32.gmra.mxu3 %v5812_v22  ;;  %v2344_v59 = vpop.trf.xlu2 }
 0x399   : > { %v2870_v47 = vand.u32 4294901760, %v2869_v11  ;;  %v2607_v15 = vsel %vm324_vm0, %v2344_v59, 0 }
 0x39a   : > { %v5816_v54 = vpop.f32.mrf.mxu0  ;;  %v2738_v2 = vpop.f32.mrf.mxu2  ;;  %v5826_v5 = vand.u32 4294901760, %v2607_v15 }
 0x39b   : > { %6627 = vst [vmem:[#allocation31_spill] sm:$0xff] %v5816_v54  ;;  %v3049_v61 = vpop.f32.mrf.mxu3  ;;  %v5819_v41 = vadd.f32 %v3045_v17, %v2738_v2  ;;  %v2313_v44 = vpop.trf.xlu1  ;;  %v2871_v8 = vsub.f32 %v2869_v11, %v2870_v47 }
 0x39c   : > { %v5821_v27 = vpop.f32.mrf.mxu1  ;;  %v2604_v13 = vsel %vm324_vm0, %v2313_v44, 0  ;;  %6631 = vst [vmem:[#allocation33_spill] sm:$0xff] %v5826_v5  ;;  %v2885_v2 = vsub.f32 %v2607_v15, %v5826_v5 }
 0x39d   : > { %6628 = vst [vmem:[#allocation32_spill] sm:$0xff] %v5819_v41  ;;  %3310 = vmatmul.f32.gmra.mxu0 %v2853_v49  ;;  %v5824_v62 = vand.u32 4294901760, %v2604_v13  ;;  %v2872_v22 = vand.u32 4294901760, %v2871_v8 }
 0x39e   : > { %6629 = vst [vmem:[#allocation29_spill] sm:$0xff] %v5821_v27  ;;  %3554 = vmatmul.f32.gmra.mxu1 %v2854_v4  ;;  %v2886_v8 = vand.u32 4294901760, %v2885_v2 }
 0x39f   : > { %6630 = vst [vmem:[#allocation30_spill] sm:$0xff] %v5824_v62  ;;  %v2877_v54 = vsub.f32 %v2604_v13, %v5824_v62  ;;  %2873 = vmatmul.f32.gmra.mxu2 %v2872_v22 }
 0x3a0   : > { %3116 = vmatmul.f32.gmra.mxu3 %v5824_v62  ;;  %v2345_v17 = vpop.trf.xlu2 }
 0x3a1   : > { %v2878_v59 = vand.u32 4294901760, %v2877_v54  ;;  %v2610_v49 = vsel %vm324_vm0, %v2345_v17, 0 }
 0x3a2   : > { %v5831_v41 = vpop.f32.mrf.mxu0  ;;  %v2746_v27 = vpop.f32.mrf.mxu2  ;;  %v5838_v22 = vand.u32 4294901760, %v2610_v49 }
 0x3a3   : > { %6632 = vst [vmem:[#allocation34_spill] sm:$0xff] %v5831_v41  ;;  %v3053_v44 = vpop.f32.mrf.mxu3  ;;  %v5834_v40 = vadd.f32 %v3049_v61, %v2746_v27  ;;  %v2879_v4 = vsub.f32 %v2877_v54, %v2878_v59  ;;  %v2887_v41 = vsub.f32 %v2885_v2, %v2886_v8 }
 0x3a4   : > { %v5836_v10 = vpop.f32.mrf.mxu1  ;;  %6635 = vst [vmem:[#allocation37_spill] sm:$0xff] %v5838_v22  ;;  %v2893_v15 = vsub.f32 %v2610_v49, %v5838_v22 }
 0x3a5   : > { %6633 = vst [vmem:[#allocation35_spill] sm:$0xff] %v5834_v40  ;;  %3315 = vmatmul.f32.gmra.mxu0 %v2861_v32  ;;  %v2880_v13 = vand.u32 4294901760, %v2879_v4 }
 0x3a6   : > { %6634 = vst [vmem:[#allocation36_spill] sm:$0xff] %v5836_v10  ;;  %3560 = vmatmul.f32.gmra.mxu1 %v2862_v1  ;;  %v2894_v32 = vand.u32 4294901760, %v2893_v15  ;;  %v2888_v10 = vand.u32 4294901760, %v2887_v41 }
 0x3a7   : > { %2881 = vmatmul.f32.gmra.mxu2 %v2880_v13 }
 0x3a8   : > { %3120 = vmatmul.f32.gmra.mxu3 %v5826_v5  ;;  %v2895_v4 = vsub.f32 %v2893_v15, %v2894_v32 }
 0x3aa   : > { %v5842_v62 = vpop.f32.mrf.mxu0  ;;  %v2754_v17 = vpop.f32.mrf.mxu2  ;;  %v2896_v41 = vand.u32 4294901760, %v2895_v4 }
 0x3ab   : > { %6636 = vst [vmem:[#allocation38_spill] sm:$0xff] %v5842_v62  ;;  %v3057_v61 = vpop.f32.mrf.mxu3  ;;  %v5844_v27 = vadd.f32 %v3053_v44, %v2754_v17 }
 0x3ac   : > { %v5846_v40 = vpop.f32.mrf.mxu1 }
 0x3ad   : > { %6637 = vst [vmem:[#allocation39_spill] sm:$0xff] %v5844_v27  ;;  %3320 = vmatmul.f32.gmra.mxu0 %v2869_v11 }
 0x3ae   : > { %6638 = vst [vmem:[#allocation40_spill] sm:$0xff] %v5846_v40  ;;  %3566 = vmatmul.f32.gmra.mxu1 %v2870_v47 }
 0x3af   : > { %2889 = vmatmul.f32.gmra.mxu2 %v2888_v10 }
 0x3b0   : > { %3124 = vmatmul.f32.gmra.mxu3 %v5838_v22 }
 0x3b2   : > { %v5849_v1 = vpop.f32.mrf.mxu0  ;;  %v2762_v49 = vpop.f32.mrf.mxu2 }
 0x3b3   : > { %6639 = vst [vmem:[#allocation41_spill] sm:$0xff] %v5849_v1  ;;  %v3061_v13 = vpop.f32.mrf.mxu3  ;;  %v5851_v5 = vadd.f32 %v3057_v61, %v2762_v49  ;;  %v2376_v62 = vpop.trf.xlu0 }
 0x3b4   : > { %v5853_v23 = vpop.f32.mrf.mxu1  ;;  %v2613_v44 = vsel %vm324_vm0, %v2376_v62, 0 }
 0x3b5   : > { %6640 = vst [vmem:[#allocation42_spill] sm:$0xff] %v5851_v5  ;;  %3325 = vmatmul.f32.gmra.mxu0 %v2877_v54  ;;  %v5856_v11 = vand.u32 4294901760, %v2613_v44 }
 0x3b6   : > { %6641 = vst [vmem:[#allocation43_spill] sm:$0xff] %v5853_v23  ;;  %3572 = vmatmul.f32.gmra.mxu1 %v2878_v59 }
 0x3b7   : > { %6642 = vst [vmem:[#allocation44_spill] sm:$0xff] %v5856_v11  ;;  %v2901_v10 = vsub.f32 %v2613_v44, %v5856_v11  ;;  %2897 = vmatmul.f32.gmra.mxu2 %v2896_v41 }
 0x3b8   : > { %3128 = vmatmul.f32.gmra.mxu3 %v5856_v11 }
 0x3b9   : > { %v2902_v47 = vand.u32 4294901760, %v2901_v10 }
 0x3ba   : > { %v5860_v17 = vpop.f32.mrf.mxu0  ;;  %v2770_v61 = vpop.f32.mrf.mxu2 }
 0x3bb   : > { %6643 = vst [vmem:[#allocation45_spill] sm:$0xff] %v5860_v17  ;;  %v3065_v49 = vpop.f32.mrf.mxu3  ;;  %v5862_v22 = vadd.f32 %v3061_v13, %v2770_v61  ;;  %v2377_v5 = vpop.trf.xlu0  ;;  %v2903_v54 = vsub.f32 %v2901_v10, %v2902_v47 }
 0x3bc   : > { %v5864_v23 = vpop.f32.mrf.mxu1  ;;  %v2616_v62 = vsel %vm324_vm0, %v2377_v5, 0 }
 0x3bd   : > { %6644 = vst [vmem:[#allocation46_spill] sm:$0xff] %v5862_v22  ;;  %3330 = vmatmul.f32.gmra.mxu0 %v2885_v2  ;;  %v5867_v59 = vand.u32 4294901760, %v2616_v62  ;;  %v2904_v4 = vand.u32 4294901760, %v2903_v54 }
 0x3be   : > { %6645 = vst [vmem:[#allocation47_spill] sm:$0xff] %v5864_v23  ;;  %3578 = vmatmul.f32.gmra.mxu1 %v2886_v8 }
 0x3bf   : > { %6646 = vst [vmem:[#allocation48_spill] sm:$0xff] %v5867_v59  ;;  %v2909_v44 = vsub.f32 %v2616_v62, %v5867_v59  ;;  %2905 = vmatmul.f32.gmra.mxu2 %v2904_v4 }
 0x3c0   : > { %3132 = vmatmul.f32.gmra.mxu3 %v5867_v59 }
 0x3c1   : > { %v2910_v41 = vand.u32 4294901760, %v2909_v44 }
 0x3c2   : > { %v5871_v11 = vpop.f32.mrf.mxu0  ;;  %v2778_v13 = vpop.f32.mrf.mxu2 }
 0x3c3   : > { %6647 = vst [vmem:[#allocation49_spill] sm:$0xff] %v5871_v11  ;;  %v3069_v61 = vpop.f32.mrf.mxu3  ;;  %v5873_v22 = vadd.f32 %v3065_v49, %v2778_v13  ;;  %v2408_v23 = vpop.trf.xlu1  ;;  %v2911_v5 = vsub.f32 %v2909_v44, %v2910_v41 }
 0x3c4   : > { %v5875_v17 = vpop.f32.mrf.mxu1  ;;  %v2619_v2 = vsel %vm324_vm0, %v2408_v23, 0 }
 0x3c5   : > { %6648 = vst [vmem:[#allocation50_spill] sm:$0xff] %v5873_v22  ;;  %3335 = vmatmul.f32.gmra.mxu0 %v2893_v15  ;;  %v5878_v8 = vand.u32 4294901760, %v2619_v2  ;;  %v2912_v54 = vand.u32 4294901760, %v2911_v5 }
 0x3c6   : > { %6649 = vst [vmem:[#allocation51_spill] sm:$0xff] %v5875_v17  ;;  %3584 = vmatmul.f32.gmra.mxu1 %v2894_v32 }
 0x3c7   : > { %6650 = vst [vmem:[#allocation52_spill] sm:$0xff] %v5878_v8  ;;  %v2917_v62 = vsub.f32 %v2619_v2, %v5878_v8  ;;  %2913 = vmatmul.f32.gmra.mxu2 %v2912_v54 }
 0x3c8   : > { %3136 = vmatmul.f32.gmra.mxu3 %v5878_v8  ;;  %v2440_v4 = vpop.trf.xlu2 }
 0x3c9   : > { %v2918_v59 = vand.u32 4294901760, %v2917_v62  ;;  %v2625_v17 = vsel %vm324_vm0, %v2440_v4, 0 }
 0x3ca   : > { %v5882_v49 = vpop.f32.mrf.mxu0  ;;  %v2786_v13 = vpop.f32.mrf.mxu2  ;;  %v5892_v54 = vand.u32 4294901760, %v2625_v17 }
 0x3cb   : > { %6651 = vst [vmem:[#allocation53_spill] sm:$0xff] %v5882_v49  ;;  %v3073_v22 = vpop.f32.mrf.mxu3  ;;  %v5885_v11 = vadd.f32 %v3069_v61, %v2786_v13  ;;  %v2409_v23 = vpop.trf.xlu1  ;;  %v2919_v5 = vsub.f32 %v2917_v62, %v2918_v59 }
 0x3cc   : > { %v5887_v15 = vpop.f32.mrf.mxu1  ;;  %v2622_v32 = vsel %vm324_vm0, %v2409_v23, 0  ;;  %6655 = vst [vmem:[#allocation57_spill] sm:$0xff] %v5892_v54  ;;  %v2933_v13 = vsub.f32 %v2625_v17, %v5892_v54 }
 0x3cd   : > { %6652 = vst [vmem:[#allocation54_spill] sm:$0xff] %v5885_v11  ;;  %3340 = vmatmul.f32.gmra.mxu0 %v2901_v10  ;;  %v5890_v2 = vand.u32 4294901760, %v2622_v32  ;;  %v2920_v8 = vand.u32 4294901760, %v2919_v5 }
 0x3ce   : > { %6653 = vst [vmem:[#allocation55_spill] sm:$0xff] %v5887_v15  ;;  %3590 = vmatmul.f32.gmra.mxu1 %v2902_v47  ;;  %v2934_v47 = vand.u32 4294901760, %v2933_v13 }
 0x3cf   : > { %6654 = vst [vmem:[#allocation56_spill] sm:$0xff] %v5890_v2  ;;  %v2925_v49 = vsub.f32 %v2622_v32, %v5890_v2  ;;  %2921 = vmatmul.f32.gmra.mxu2 %v2920_v8 }
 0x3d0   : > { %3140 = vmatmul.f32.gmra.mxu3 %v5890_v2  ;;  %v2441_v61 = vpop.trf.xlu2 }
 0x3d1   : > { %v2926_v4 = vand.u32 4294901760, %v2925_v49  ;;  %v2628_v10 = vsel %vm324_vm0, %v2441_v61, 0 }
 0x3d2   : > { %v5897_v11 = vpop.f32.mrf.mxu0  ;;  %v2794_v15 = vpop.f32.mrf.mxu2  ;;  %v5902_v32 = vand.u32 4294901760, %v2628_v10 }
 0x3d3   : > { %6656 = vst [vmem:[#allocation58_spill] sm:$0xff] %v5897_v11  ;;  %v3077_v23 = vpop.f32.mrf.mxu3  ;;  %v3074_v1 = vadd.f32 %v3073_v22, %v2794_v15  ;;  %v2927_v5 = vsub.f32 %v2925_v49, %v2926_v4  ;;  %v2935_v11 = vsub.f32 %v2933_v13, %v2934_v47 }
 0x3d4   : > { %v5900_v27 = vpop.f32.mrf.mxu1  ;;  %6658 = vst [vmem:[#allocation60_spill] sm:$0xff] %v5902_v32  ;;  %v5906_v17 = vsub.f32 %v2628_v10, %v5902_v32 }
 0x3d5   : > { %6657 = vst [vmem:[#allocation59_spill] sm:$0xff] %v5900_v27  ;;  %3345 = vmatmul.f32.gmra.mxu0 %v2909_v44  ;;  %v2928_v8 = vand.u32 4294901760, %v2927_v5  ;;  %v2936_v5 = vand.u32 4294901760, %v2935_v11 }
 0x3d6   : > { %3596 = vmatmul.f32.gmra.mxu1 %v2910_v41  ;;  %v2942_v44 = vand.u32 4294901760, %v5906_v17 }
 0x3d7   : > { %2929 = vmatmul.f32.gmra.mxu2 %v2928_v8 }
 0x3d8   : > { %3144 = vmatmul.f32.gmra.mxu3 %v5892_v54  ;;  %v2943_v10 = vsub.f32 %v5906_v17, %v2942_v44 }
 0x3da   : > { %v3271_v2 = vpop.f32.mrf.mxu0  ;;  %v2802_v40 = vpop.f32.mrf.mxu2  ;;  %v2944_v11 = vand.u32 4294901760, %v2943_v10 }
 0x3db   : > { %v3081_v61 = vpop.f32.mrf.mxu3  ;;  %v3272_v22 = vadd.f32 %v3271_v2, %v3074_v1  ;;  %v3078_v15 = vadd.f32 %v3077_v23, %v2802_v40 }
 0x3dc   : > { %v3507_v27 = vpop.f32.mrf.mxu1 }
 0x3dd   : > { %v5908_v34 = vadd.f32 %v3507_v27, %v3272_v22  ;;  %3350 = vmatmul.f32.gmra.mxu0 %v2917_v62 }
 0x3de   : > { %3602 = vmatmul.f32.gmra.mxu1 %v2918_v59 }
 0x3df   : > { %2937 = vmatmul.f32.gmra.mxu2 %v2936_v5 }
 0x3e0   : > { %3148 = vmatmul.f32.gmra.mxu3 %v5902_v32 }
 0x3e2   : > { %v3276_v41 = vpop.f32.mrf.mxu0  ;;  %v2810_v8 = vpop.f32.mrf.mxu2 }
 0x3e3   : > { %v3085_v54 = vpop.f32.mrf.mxu3  ;;  %v3277_v0 = vadd.f32 %v3276_v41, %v3078_v15  ;;  %v3082_v42 = vadd.f32 %v3081_v61, %v2810_v8  ;;  %v2472_v1 = vpop.trf.xlu0 }
 0x3e4   : > { %v3513_v40 = vpop.f32.mrf.mxu1  ;;  %v2631_v27 = vsel %vm324_vm0, %v2472_v1, 0 }
 0x3e5   : > { %v5914_v2 = vadd.f32 %v3513_v40, %v3277_v0  ;;  %3355 = vmatmul.f32.gmra.mxu0 %v2925_v49  ;;  %v5916_v62 = vand.u32 4294901760, %v2631_v27 }
 0x3e6   : > { %3608 = vmatmul.f32.gmra.mxu1 %v2926_v4 }
 0x3e7   : > { %6659 = vst [vmem:[#allocation61_spill] sm:$0xff] %v5916_v62  ;;  %v2949_v59 = vsub.f32 %v2631_v27, %v5916_v62  ;;  %2945 = vmatmul.f32.gmra.mxu2 %v2944_v11 }
 0x3e8   : > { %3152 = vmatmul.f32.gmra.mxu3 %v5916_v62 }
 0x3e9   : > { %v2950_v23 = vand.u32 4294901760, %v2949_v59 }
 0x3ea   : > { %v3281_v22 = vpop.f32.mrf.mxu0  ;;  %v2818_v15 = vpop.f32.mrf.mxu2 }
 0x3eb   : > { %v3089_v61 = vpop.f32.mrf.mxu3  ;;  %v3282_v5 = vadd.f32 %v3281_v22, %v3082_v42  ;;  %v3086_v41 = vadd.f32 %v3085_v54, %v2818_v15  ;;  %v2473_v8 = vpop.trf.xlu0  ;;  %v2951_v0 = vsub.f32 %v2949_v59, %v2950_v23 }
 0x3ec   : > { %v3519_v1 = vpop.f32.mrf.mxu1  ;;  %v2634_v49 = vsel %vm324_vm0, %v2473_v8, 0 }
 0x3ed   : > { %v5921_v40 = vadd.f32 %v3519_v1, %v3282_v5  ;;  %3360 = vmatmul.f32.gmra.mxu0 %v2933_v13  ;;  %v5923_v4 = vand.u32 4294901760, %v2634_v49  ;;  %v2952_v10 = vand.u32 4294901760, %v2951_v0 }
 0x3ee   : > { %3614 = vmatmul.f32.gmra.mxu1 %v2934_v47 }
 0x3ef   : > { %6660 = vst [vmem:[#allocation62_spill] sm:$0xff] %v5921_v40  ;;  %v2957_v27 = vsub.f32 %v2634_v49, %v5923_v4  ;;  %2953 = vmatmul.f32.gmra.mxu2 %v2952_v10 }
 0x3f0   : > { %6661 = vst [vmem:[#allocation63_spill] sm:$0xff] %v5923_v4  ;;  %3156 = vmatmul.f32.gmra.mxu3 %v5923_v4 }
 0x3f1   : > { %v2958_v11 = vand.u32 4294901760, %v2957_v27 }
 0x3f2   : > { %v3286_v42 = vpop.f32.mrf.mxu0  ;;  %v2826_v54 = vpop.f32.mrf.mxu2 }
 0x3f3   : > { %v3093_v22 = vpop.f32.mrf.mxu3  ;;  %v3287_v15 = vadd.f32 %v3286_v42, %v3086_v41  ;;  %v3090_v62 = vadd.f32 %v3089_v61, %v2826_v54  ;;  %v2504_v32 = vpop.trf.xlu1  ;;  %v2959_v5 = vsub.f32 %v2957_v27, %v2958_v11 }
 0x3f4   : > { %v3525_v8 = vpop.f32.mrf.mxu1  ;;  %v2637_v13 = vsel %vm324_vm0, %v2504_v32, 0 }
 0x3f5   : > { %v5928_v1 = vadd.f32 %v3525_v8, %v3287_v15  ;;  %3365 = vmatmul.f32.gmra.mxu0 %v5906_v17  ;;  %v5931_v47 = vand.u32 4294901760, %v2637_v13  ;;  %v2960_v0 = vand.u32 4294901760, %v2959_v5 }
 0x3f6   : > { %3620 = vmatmul.f32.gmra.mxu1 %v2942_v44 }
 0x3f7   : > { %6662 = vst [vmem:[#allocation64_spill] sm:$0xff] %v5928_v1  ;;  %v2965_v49 = vsub.f32 %v2637_v13, %v5931_v47  ;;  %2961 = vmatmul.f32.gmra.mxu2 %v2960_v0 }
 0x3f8   : > { %6663 = vst [vmem:[#allocation65_spill] sm:$0xff] %v5931_v47  ;;  %3160 = vmatmul.f32.gmra.mxu3 %v5931_v47 }
 0x3f9   : > { %v2966_v41 = vand.u32 4294901760, %v2965_v49 }
 0x3fa   : > { %v3291_v61 = vpop.f32.mrf.mxu0  ;;  %v2834_v10 = vpop.f32.mrf.mxu2 }
 0x3fb   : > { %v3097_v42 = vpop.f32.mrf.mxu3  ;;  %v3292_v54 = vadd.f32 %v3291_v61, %v3090_v62  ;;  %v3094_v4 = vadd.f32 %v3093_v22, %v2834_v10  ;;  %v2505_v32 = vpop.trf.xlu1  ;;  %v2967_v8 = vsub.f32 %v2965_v49, %v2966_v41 }
 0x3fc   : > { %v3531_v15 = vpop.f32.mrf.mxu1  ;;  %v2640_v17 = vsel %vm324_vm0, %v2505_v32, 0 }
 0x3fd   : > { %v5936_v1 = vadd.f32 %v3531_v15, %v3292_v54  ;;  %3370 = vmatmul.f32.gmra.mxu0 %v2949_v59  ;;  %v5938_v44 = vand.u32 4294901760, %v2640_v17  ;;  %v2968_v5 = vand.u32 4294901760, %v2967_v8 }
 0x3fe   : > { %3626 = vmatmul.f32.gmra.mxu1 %v2950_v23 }
 0x3ff   : > { %6664 = vst [vmem:[#allocation66_spill] sm:$0xff] %v5936_v1  ;;  %v2973_v13 = vsub.f32 %v2640_v17, %v5938_v44  ;;  %2969 = vmatmul.f32.gmra.mxu2 %v2968_v5 }
 0x400   : > { %6665 = vst [vmem:[#allocation67_spill] sm:$0xff] %v5938_v44  ;;  %3164 = vmatmul.f32.gmra.mxu3 %v5938_v44 }
 0x401   : > { %v2974_v0 = vand.u32 4294901760, %v2973_v13 }
 0x402   : > { %v3296_v62 = vpop.f32.mrf.mxu0  ;;  %v2842_v22 = vpop.f32.mrf.mxu2 }
 0x403   : > { %v3101_v61 = vpop.f32.mrf.mxu3  ;;  %v3297_v10 = vadd.f32 %v3296_v62, %v3094_v4  ;;  %v3098_v47 = vadd.f32 %v3097_v42, %v2842_v22  ;;  %v2975_v32 = vsub.f32 %v2973_v13, %v2974_v0 }
 0x404   : > { %v3537_v40 = vpop.f32.mrf.mxu1 }
 0x405   : > { %v5942_v54 = vadd.f32 %v3537_v40, %v3297_v10  ;;  %3375 = vmatmul.f32.gmra.mxu0 %v2957_v27  ;;  %v2976_v59 = vand.u32 4294901760, %v2975_v32 }
 0x406   : > { %3632 = vmatmul.f32.gmra.mxu1 %v2958_v11 }
 0x407   : > { %2977 = vmatmul.f32.gmra.mxu2 %v2976_v59 }
 0x408   : > { %3850 = vmatmul.f32.vlgmr.msra.gmra.mxu3 %v5477_v24 }
 0x40a   : > { %v3301_v23 = vpop.f32.mrf.mxu0  ;;  %v2850_v15 = vpop.f32.mrf.mxu2 }
 0x40b   : > { %v3105_v8 = vpop.f32.mrf.mxu3  ;;  %v3302_v17 = vadd.f32 %v3301_v23, %v3098_v47  ;;  %v3102_v5 = vadd.f32 %v3101_v61, %v2850_v15 }
 0x40c   : > { %v3543_v44 = vpop.f32.mrf.mxu1 }
 0x40d   : > { %v5945_v1 = vadd.f32 %v3543_v44, %v3302_v17  ;;  %3380 = vmatmul.f32.gmra.mxu0 %v2965_v49 }
 0x40e   : > { %3638 = vmatmul.f32.gmra.mxu1 %v2966_v41 }
 0x40f   : > { %3671 = vmatmul.f32.vlgmr.msra.gmra.mxu2 %v5477_v24 }
 0x410   : > { %3854 = vmatmul.f32.gmra.mxu3 %v5495_v37 }
 0x412   : > { %v3306_v40 = vpop.f32.mrf.mxu0  ;;  %v2858_v4 = vpop.f32.mrf.mxu2 }
 0x413   : > { %v3109_v27 = vpop.f32.mrf.mxu3  ;;  %v3307_v11 = vadd.f32 %v3306_v40, %v3102_v5  ;;  %v3106_v42 = vadd.f32 %v3105_v8, %v2858_v4 }
 0x414   : > { %v3549_v62 = vpop.f32.mrf.mxu1 }
 0x415   : > { %v5949_v22 = vadd.f32 %v3549_v62, %v3307_v11  ;;  %3385 = vmatmul.f32.gmra.mxu0 %v2973_v13 }
 0x416   : > { %3644 = vmatmul.f32.gmra.mxu1 %v2974_v0 }
 0x417   : > { %3675 = vmatmul.f32.gmra.mxu2 %v5495_v37 }
 0x418   : > { %3858 = vmatmul.f32.gmra.mxu3 %v5514_v38 }
 0x41a   : > { %v3311_v47 = vpop.f32.mrf.mxu0  ;;  %v2866_v49 = vpop.f32.mrf.mxu2 }
 0x41b   : > { %v3113_v41 = vpop.f32.mrf.mxu3  ;;  %v3312_v24 = vadd.f32 %v3311_v47, %v3106_v42  ;;  %v3110_v44 = vadd.f32 %v3109_v27, %v2866_v49 }
 0x41c   : > { %v3555_v61 = vpop.f32.mrf.mxu1 }
 0x41d   : > { %v5953_v10 = vadd.f32 %v3555_v61, %v3312_v24 }
 0x41f   : > { %3679 = vmatmul.f32.gmra.mxu2 %v5514_v38 }
 0x420   : > { %3862 = vmatmul.f32.gmra.mxu3 %v5532_v52 }
 0x422   : > { %v3316_v32 = vpop.f32.mrf.mxu0  ;;  %v2874_v59 = vpop.f32.mrf.mxu2 }
 0x423   : > { %v3117_v13 = vpop.f32.mrf.mxu3  ;;  %v3317_v0 = vadd.f32 %v3316_v32, %v3110_v44  ;;  %v3114_v23 = vadd.f32 %v3113_v41, %v2874_v59 }
 0x424   : > { %v3561_v37 = vpop.f32.mrf.mxu1 }
 0x425   : > { %v5957_v15 = vadd.f32 %v3561_v37, %v3317_v0 }
 0x427   : > { %3683 = vmatmul.f32.gmra.mxu2 %v5532_v52 }
 0x428   : > { %3866 = vmatmul.f32.gmra.mxu3 %v5535_v45 }
 0x42a   : > { %v3321_v8 = vpop.f32.mrf.mxu0  ;;  %v2882_v17 = vpop.f32.mrf.mxu2 }
 0x42b   : > { %v3121_v5 = vpop.f32.mrf.mxu3  ;;  %v3322_v40 = vadd.f32 %v3321_v8, %v3114_v23  ;;  %v3118_v4 = vadd.f32 %v3117_v13, %v2882_v17 }
 0x42c   : > { %v3567_v38 = vpop.f32.mrf.mxu1 }
 0x42d   : > { %v5961_v27 = vadd.f32 %v3567_v38, %v3322_v40 }
 0x42f   : > { %3687 = vmatmul.f32.gmra.mxu2 %v5535_v45 }
 0x430   : > { %3870 = vmatmul.f32.gmra.mxu3 %v5551_v30 }
 0x432   : > { %v3326_v11 = vpop.f32.mrf.mxu0  ;;  %v2890_v42 = vpop.f32.mrf.mxu2 }
 0x433   : > { %v3125_v62 = vpop.f32.mrf.mxu3  ;;  %v3327_v47 = vadd.f32 %v3326_v11, %v3118_v4  ;;  %v3122_v49 = vadd.f32 %v3121_v5, %v2890_v42 }
 0x434   : > { %v3573_v52 = vpop.f32.mrf.mxu1 }
 0x435   : > { %v5965_v41 = vadd.f32 %v3573_v52, %v3327_v47 }
 0x437   : > { %3691 = vmatmul.f32.gmra.mxu2 %v5551_v30 }
 0x438   : > { %3874 = vmatmul.f32.gmra.mxu3 %v5577_v14 }
 0x43a   : > { %v3331_v24 = vpop.f32.mrf.mxu0  ;;  %v2898_v44 = vpop.f32.mrf.mxu2 }
 0x43b   : > { %v3129_v61 = vpop.f32.mrf.mxu3  ;;  %v3332_v32 = vadd.f32 %v3331_v24, %v3122_v49  ;;  %v5969_v59 = vadd.f32 %v3125_v62, %v2898_v44 }
 0x43c   : > { %v3579_v45 = vpop.f32.mrf.mxu1 }
 0x43d   : > { %v5971_v13 = vadd.f32 %v3579_v45, %v3332_v32 }
 0x43f   : > { %3695 = vmatmul.f32.gmra.mxu2 %v5577_v14 }
 0x440   : > { %3878 = vmatmul.f32.gmra.mxu3 %v5591_v39 }
 0x442   : > { %v2906_v0 = vpop.f32.mrf.mxu2 }
 0x443   : > { %v3133_v23 = vpop.f32.mrf.mxu3  ;;  %v5975_v37 = vadd.f32 %v3129_v61, %v2906_v0 }
 0x447   : > { %3699 = vmatmul.f32.gmra.mxu2 %v5591_v39 }
 0x448   : > { %3882 = vmatmul.f32.gmra.mxu3 %v5604_v56 }
 0x44a   : > { %v2914_v30 = vpop.f32.mrf.mxu2 }
 0x44b   : > { %v3137_v8 = vpop.f32.mrf.mxu3  ;;  %v5979_v17 = vadd.f32 %v3133_v23, %v2914_v30  ;;  %v3192_v23 = vadd.f32 %v5727_v48, %v5720_v3 }
 0x44f   : > { %3703 = vmatmul.f32.gmra.mxu2 %v5604_v56 }
 0x450   : > { %3886 = vmatmul.f32.gmra.mxu3 %v5622_v55 }
 0x452   : > { %v2922_v5 = vpop.f32.mrf.mxu2 }
 0x453   : > { %v3141_v14 = vpop.f32.mrf.mxu3  ;;  %v5983_v40 = vadd.f32 %v3137_v8, %v2922_v5 }
 0x457   : > { %3707 = vmatmul.f32.gmra.mxu2 %v5622_v55 }
 0x458   : > { %3890 = vmatmul.f32.gmra.mxu3 %v5625_v35 }
 0x45a   : > { %v2930_v4 = vpop.f32.mrf.mxu2 }
 0x45b   : > { %v3145_v39 = vpop.f32.mrf.mxu3  ;;  %v5987_v38 = vadd.f32 %v3141_v14, %v2930_v4 }
 0x45f   : > { %3711 = vmatmul.f32.gmra.mxu2 %v5625_v35 }
 0x460   : > { %3894 = vmatmul.f32.gmra.mxu3 %v5638_v18 }
 0x462   : > { %v2938_v11 = vpop.f32.mrf.mxu2 }
 0x463   : > { %v3149_v56 = vpop.f32.mrf.mxu3  ;;  %v5991_v42 = vadd.f32 %v3145_v39, %v2938_v11 }
 0x467   : > { %3715 = vmatmul.f32.gmra.mxu2 %v5638_v18 }
 0x468   : > { %3898 = vmatmul.f32.gmra.mxu3 %v5658_v21 }
 0x46a   : > { %v2946_v62 = vpop.f32.mrf.mxu2 }
 0x46b   : > { %v3153_v55 = vpop.f32.mrf.mxu3  ;;  %v5995_v47 = vadd.f32 %v3149_v56, %v2946_v62 }
 0x46f   : > { %3719 = vmatmul.f32.gmra.mxu2 %v5658_v21 }
 0x470   : > { %3902 = vmatmul.f32.gmra.mxu3 %v5669_v7 }
 0x472   : > { %v2954_v49 = vpop.f32.mrf.mxu2 }
 0x473   : > { %v3157_v35 = vpop.f32.mrf.mxu3  ;;  %v5999_v52 = vadd.f32 %v3153_v55, %v2954_v49 }
 0x477   : > { %3723 = vmatmul.f32.gmra.mxu2 %v5669_v7 }
 0x478   : > { %3906 = vmatmul.f32.gmra.mxu3 %v5681_v58 }
 0x47a   : > { %v2962_v24 = vpop.f32.mrf.mxu2 }
 0x47b   : > { %v3161_v18 = vpop.f32.mrf.mxu3  ;;  %v6003_v44 = vadd.f32 %v3157_v35, %v2962_v24  ;;  %v6669_v35 = vld [vmem:[#allocation20_spill] sm:$0xff] }
 0x47d   : > { %6666 = vst [vmem:[#allocation68_spill] sm:$0xff] %v6003_v44 }
 0x47f   : > { %3727 = vmatmul.f32.gmra.mxu2 %v5681_v58  ;;  %v3412_v58 = vadd.f32 %v5731_v36, %v3192_v23  ;;  %v3202_v36 = vadd.f32 %v5750_v53, %v5741_v46 }
 0x480   : > { %3910 = vmatmul.f32.gmra.mxu3 %v5696_v9 }
 0x482   : > { %v2970_v61 = vpop.f32.mrf.mxu2 }
 0x483   : > { %v3165_v21 = vpop.f32.mrf.mxu3  ;;  %v6007_v32 = vadd.f32 %v3161_v18, %v2970_v61  ;;  %v6670_v18 = vld [vmem:[#allocation18_spill] sm:$0xff] }
 0x485   : > { %6667 = vst [vmem:[#allocation69_spill] sm:$0xff] %v6007_v32 }
 0x487   : > { %3731 = vmatmul.f32.gmra.mxu2 %v5696_v9  ;;  %v3197_v9 = vadd.f32 %v5739_v26, %v5729_v12  ;;  %v3424_v12 = vadd.f32 %v5755_v57, %v3202_v36  ;;  %v3212_v57 = vadd.f32 %v5776_v50, %v5768_v51  ;;  %v6671_v51 = vld [vmem:[#allocation22_spill] sm:$0xff]  ;;  %v6679_v36 = vld [vmem:[#allocation28_spill] sm:$0xff] }
 0x488   : > { %3914 = vmatmul.f32.gmra.mxu3 %v5699_v43 }
 0x489   : > { %v3418_v3 = vadd.f32 %v5743_v28, %v3197_v9  ;;  %v3207_v28 = vadd.f32 %v5765_v25, %v5753_v16  ;;  %v3436_v16 = vadd.f32 %v5780_v63, %v3212_v57  ;;  %v6676_v9 = vld [vmem:[#allocation19_spill] sm:$0xff]  ;;  %v6683_v57 = vld [vmem:[#allocation29_spill] sm:$0xff] }
 0x48a   : > { %v2978_v45 = vpop.f32.mrf.mxu2 }
 0x48b   : > { %v3851_v7 = vpop.f32.mrf.mxu3  ;;  %v6011_v0 = vadd.f32 %v3165_v21, %v2978_v45  ;;  %v3430_v46 = vadd.f32 %v5770_v19, %v3207_v28  ;;  %v3217_v19 = vadd.f32 %v6669_v35, %v5778_v60  ;;  %v6672_v45 = vld [vmem:[#allocation16_spill] sm:$0xff]  ;;  %v6675_v60 = vld [vmem:[#allocation26_spill] sm:$0xff]  ;;  %v6680_v28 = vld [vmem:[#allocation23_spill] sm:$0xff] }
 0x48c   : > { %v6684_v35 = vld [vmem:[#allocation32_spill] sm:$0xff] }
 0x48d   : > { %6668 = vst [vmem:[#allocation70_spill] sm:$0xff] %v6011_v0  ;;  %v3442_v50 = vadd.f32 %v6671_v51, %v3217_v19  ;;  %v6685_v19 = vld [vmem:[#allocation34_spill] sm:$0xff]  ;;  %v6718_v0 = vld [vmem:[#allocation60_spill] sm:$0xff] }
 0x48f   : > { %3735 = vmatmul.f32.gmra.mxu2 %v5699_v43 }
 0x490   : > { %3918 = vmatmul.f32.gmra.mxu3 %v5711_v29 }
 0x492   : > { %v3672_v30 = vpop.f32.mrf.mxu2 }
 0x493   : > { %v3855_v8 = vpop.f32.mrf.mxu3  ;;  %v3673_v5 = vadd.f32 %v3672_v30, %v3412_v58  ;;  %v6674_v58 = vld [vmem:[#allocation15_spill] sm:$0xff] }
 0x495   : > { %v6020_v14 = vadd.f32 %v3851_v7, %v3673_v5  ;;  %v6673_v7 = vld [vmem:[#allocation24_spill] sm:$0xff] }
 0x496   : > { %v3222_v63 = vadd.f32 %v6673_v7, %v6672_v45  ;;  %v6687_v45 = vld [vmem:[#allocation36_spill] sm:$0xff] }
 0x497   : > { %3739 = vmatmul.f32.gmra.mxu2 %v5711_v29 }
 0x498   : > { %3922 = vmatmul.f32.gmra.mxu3 %v5723_v33  ;;  %v3448_v30 = vadd.f32 %v6675_v60, %v3222_v63 }
 0x49a   : > { %v3676_v48 = vpop.f32.mrf.mxu2 }
 0x49b   : > { %v3859_v43 = vpop.f32.mrf.mxu3  ;;  %v3677_v4 = vadd.f32 %v3676_v48, %v3418_v3  ;;  %v6677_v3 = vld [vmem:[#allocation27_spill] sm:$0xff] }
 0x49c   : > { %v3227_v48 = vadd.f32 %v6677_v3, %v6676_v9 }
 0x49d   : > { %v6027_v39 = vadd.f32 %v3855_v8, %v3677_v4  ;;  %v6678_v4 = vld [vmem:[#allocation17_spill] sm:$0xff] }
 0x49f   : > { %3743 = vmatmul.f32.gmra.mxu2 %v5723_v33 }
 0x4a0   : > { %3926 = vmatmul.f32.gmra.mxu3 %v5735_v6 }
 0x4a2   : > { %v3680_v26 = vpop.f32.mrf.mxu2 }
 0x4a3   : > { %v3863_v29 = vpop.f32.mrf.mxu3  ;;  %v3681_v11 = vadd.f32 %v3680_v26, %v3424_v12  ;;  %v3454_v12 = vadd.f32 %v6679_v36, %v3227_v48  ;;  %v6691_v36 = vld [vmem:[#allocation40_spill] sm:$0xff] }
 0x4a5   : > { %v6034_v56 = vadd.f32 %v3859_v43, %v3681_v11 }
 0x4a7   : > { %3747 = vmatmul.f32.gmra.mxu2 %v5735_v6 }
 0x4a8   : > { %3930 = vmatmul.f32.gmra.mxu3 %v5746_v20 }
 0x4aa   : > { %v3684_v53 = vpop.f32.mrf.mxu2 }
 0x4ab   : > { %v3867_v33 = vpop.f32.mrf.mxu3  ;;  %v3685_v62 = vadd.f32 %v3684_v53, %v3430_v46  ;;  %v6681_v46 = vld [vmem:[#allocation31_spill] sm:$0xff] }
 0x4ac   : > { %v3232_v53 = vadd.f32 %v6681_v46, %v6680_v28  ;;  %v6692_v46 = vld [vmem:[#allocation39_spill] sm:$0xff] }
 0x4ad   : > { %v6041_v55 = vadd.f32 %v3863_v29, %v3685_v62  ;;  %v6682_v62 = vld [vmem:[#allocation21_spill] sm:$0xff] }
 0x4af   : > { %3751 = vmatmul.f32.gmra.mxu2 %v5746_v20 }
 0x4b0   : > { %3934 = vmatmul.f32.gmra.mxu3 %v5758_v31 }
 0x4b2   : > { %v3688_v25 = vpop.f32.mrf.mxu2 }
 0x4b3   : > { %v3871_v6 = vpop.f32.mrf.mxu3  ;;  %v3689_v49 = vadd.f32 %v3688_v25, %v3436_v16  ;;  %v3460_v16 = vadd.f32 %v6683_v57, %v3232_v53  ;;  %v6693_v53 = vld [vmem:[#allocation41_spill] sm:$0xff] }
 0x4b5   : > { %v6048_v24 = vadd.f32 %v3867_v33, %v3689_v49 }
 0x4b7   : > { %3755 = vmatmul.f32.gmra.mxu2 %v5758_v31 }
 0x4b8   : > { %3938 = vmatmul.f32.gmra.mxu3 %v6670_v18 }
 0x4ba   : > { %v3692_v61 = vpop.f32.mrf.mxu2 }
 0x4bb   : > { %v3875_v20 = vpop.f32.mrf.mxu3  ;;  %v3693_v21 = vadd.f32 %v3692_v61, %v3442_v50  ;;  %v6078_v50 = vmul.f32 %v6020_v14, %v6020_v14 }
 0x4bd   : > { %v6055_v23 = vadd.f32 %v3871_v6, %v3693_v21  ;;  %v6686_v21 = vld [vmem:[#allocation25_spill] sm:$0xff] }
 0x4bf   : > { %3759 = vmatmul.f32.gmra.mxu2 %v6670_v18  ;;  %v3237_v18 = vadd.f32 %v6685_v19, %v6684_v35 }
 0x4c0   : > { %3942 = vmatmul.f32.gmra.mxu3 %v6674_v58 }
 0x4c1   : > { %v3466_v7 = vadd.f32 %v6687_v45, %v3237_v18  ;;  %v6696_v45 = vld [vmem:[#allocation42_spill] sm:$0xff] }
 0x4c2   : > { %v3696_v8 = vpop.f32.mrf.mxu2 }
 0x4c3   : > { %v3879_v31 = vpop.f32.mrf.mxu3  ;;  %v3697_v5 = vadd.f32 %v3696_v8, %v3448_v30  ;;  %v6688_v8 = vld [vmem:[#allocation35_spill] sm:$0xff] }
 0x4c5   : > { %v6062_v43 = vadd.f32 %v3875_v20, %v3697_v5 }
 0x4c7   : > { %3763 = vmatmul.f32.gmra.mxu2 %v6674_v58 }
 0x4c8   : > { %3946 = vmatmul.f32.gmra.mxu3 %v6678_v4 }
 0x4ca   : > { %v3700_v26 = vpop.f32.mrf.mxu2 }
 0x4cb   : > { %v3883_v29 = vpop.f32.mrf.mxu3  ;;  %v3701_v11 = vadd.f32 %v3700_v26, %v3454_v12 }
 0x4cd   : > { %v6069_v33 = vadd.f32 %v3879_v31, %v3701_v11  ;;  %v6689_v31 = vld [vmem:[#allocation38_spill] sm:$0xff] }
 0x4ce   : > { %v3242_v5 = vadd.f32 %v6689_v31, %v6688_v8  ;;  %v6698_v31 = vld [vmem:[#allocation37_spill] sm:$0xff] }
 0x4cf   : > { %3767 = vmatmul.f32.gmra.mxu2 %v6678_v4  ;;  %v6690_v4 = vld [vmem:[#allocation30_spill] sm:$0xff] }
 0x4d0   : > { %3950 = vmatmul.f32.gmra.mxu3 %v6682_v62  ;;  %v3472_v12 = vadd.f32 %v6691_v36, %v3242_v5  ;;  %v6699_v5 = vld [vmem:[#allocation47_spill] sm:$0xff] }
 0x4d2   : > { %v3704_v25 = vpop.f32.mrf.mxu2 }
 0x4d3   : > { %v3887_v6 = vpop.f32.mrf.mxu3  ;;  %v3705_v49 = vadd.f32 %v3704_v25, %v3460_v16 }
 0x4d5   : > { %v3884_v51 = vadd.f32 %v3883_v29, %v3705_v49  ;;  %v6695_v49 = vld [vmem:[#allocation43_spill] sm:$0xff] }
 0x4d7   : > { %v6080_v61 = vmul.f32 %v3884_v51, %v3884_v51  ;;  %v6083_v20 = vmul.f32 %v3884_v51, %v6020_v14  ;;  %3771 = vmatmul.f32.gmra.mxu2 %v6682_v62  ;;  %v6096_v14 = vmul.f32 %v6027_v39, %v6027_v39  ;;  %v3247_v62 = vadd.f32 %v6693_v53, %v6692_v46 }
 0x4d8   : > { %3954 = vmatmul.f32.gmra.mxu3 %v6686_v21 }
 0x4d9   : > { %v6090_v63 = vadd.f32 %v6080_v61, %v6078_v50  ;;  %v3478_v35 = vadd.f32 %v6695_v49, %v3247_v62  ;;  %v6704_v49 = vld [vmem:[#allocation51_spill] sm:$0xff] }
 0x4da   : > { %v3708_v58 = vpop.f32.mrf.mxu2 }
 0x4db   : > { %v3891_v60 = vpop.f32.mrf.mxu3  ;;  %v3709_v30 = vadd.f32 %v3708_v58, %v3466_v7  ;;  %v6697_v7 = vld [vmem:[#allocation45_spill] sm:$0xff] }
 0x4dc   : > { %v3252_v58 = vadd.f32 %v6697_v7, %v6696_v45  ;;  %v6705_v7 = vld [vmem:[#allocation50_spill] sm:$0xff] }
 0x4dd   : > { %v3888_v9 = vadd.f32 %v3887_v6, %v3709_v30  ;;  %v6694_v6 = vld [vmem:[#allocation33_spill] sm:$0xff] }
 0x4df   : > { %v6098_v3 = vmul.f32 %v3888_v9, %v3888_v9  ;;  %v6101_v48 = vmul.f32 %v3888_v9, %v6027_v39  ;;  %3775 = vmatmul.f32.gmra.mxu2 %v6686_v21  ;;  %v6114_v39 = vmul.f32 %v6034_v56, %v6034_v56  ;;  %v3484_v9 = vadd.f32 %v6699_v5, %v3252_v58  ;;  %v6706_v58 = vld [vmem:[#allocation53_spill] sm:$0xff] }
 0x4e0   : > { %3958 = vmatmul.f32.gmra.mxu3 %v6690_v4 }
 0x4e1   : > { %v6108_v26 = vadd.f32 %v6098_v3, %v6096_v14 }
 0x4e2   : > { %v3712_v29 = vpop.f32.mrf.mxu2 }
 0x4e3   : > { %v3895_v11 = vpop.f32.mrf.mxu3  ;;  %v3713_v28 = vadd.f32 %v3712_v29, %v3472_v12 }
 0x4e5   : > { %v3892_v57 = vadd.f32 %v3891_v60, %v3713_v28  ;;  %v6701_v28 = vld [vmem:[#allocation49_spill] sm:$0xff] }
 0x4e7   : > { %v6116_v16 = vmul.f32 %v3892_v57, %v3892_v57  ;;  %v6119_v25 = vmul.f32 %v3892_v57, %v6034_v56  ;;  %3779 = vmatmul.f32.gmra.mxu2 %v6690_v4  ;;  %v6132_v56 = vmul.f32 %v6041_v55, %v6041_v55 }
 0x4e8   : > { %3962 = vmatmul.f32.gmra.mxu3 %v6694_v6 }
 0x4e9   : > { %v6126_v19 = vadd.f32 %v6116_v16, %v6114_v39 }
 0x4ea   : > { %v3716_v18 = vpop.f32.mrf.mxu2 }
 0x4eb   : > { %v3899_v51 = vpop.f32.mrf.mxu3  ;;  %v3717_v21 = vadd.f32 %v3716_v18, %v3478_v35 }
 0x4ed   : > { %v3896_v60 = vadd.f32 %v3895_v11, %v3717_v21  ;;  %v6700_v11 = vld [vmem:[#allocation46_spill] sm:$0xff] }
 0x4ee   : > { %v3257_v46 = vadd.f32 %v6701_v28, %v6700_v11 }
 0x4ef   : > { %v6134_v30 = vmul.f32 %v3896_v60, %v3896_v60  ;;  %v6137_v8 = vmul.f32 %v3896_v60, %v6041_v55  ;;  %3783 = vmatmul.f32.gmra.mxu2 %v6694_v6  ;;  %v6150_v55 = vmul.f32 %v6048_v24, %v6048_v24  ;;  %v6703_v6 = vld [vmem:[#allocation44_spill] sm:$0xff]  ;;  %v3262_v60 = vadd.f32 %v6706_v58, %v6705_v7 }
 0x4f0   : > { %3966 = vmatmul.f32.gmra.mxu3 %v6698_v31  ;;  %v3490_v35 = vadd.f32 %v6704_v49, %v3257_v46  ;;  %v6710_v49 = vld [vmem:[#allocation54_spill] sm:$0xff]  ;;  %v6713_v58 = vld [vmem:[#allocation52_spill] sm:$0xff] }
 0x4f1   : > { %v6144_v4 = vadd.f32 %v6134_v30, %v6132_v56 }
 0x4f2   : > { %v3720_v36 = vpop.f32.mrf.mxu2 }
 0x4f3   : > { %v3903_v12 = vpop.f32.mrf.mxu3  ;;  %v3721_v29 = vadd.f32 %v3720_v36, %v3484_v9  ;;  %v6708_v36 = vld [vmem:[#allocation48_spill] sm:$0xff] }
 0x4f5   : > { %v3900_v53 = vadd.f32 %v3899_v51, %v3721_v29  ;;  %v6709_v29 = vld [vmem:[#allocation55_spill] sm:$0xff] }
 0x4f6   : > { %v3496_v11 = vadd.f32 %v6709_v29, %v3262_v60  ;;  %v6714_v60 = vld [vmem:[#allocation59_spill] sm:$0xff] }
 0x4f7   : > { %v6152_v62 = vmul.f32 %v3900_v53, %v3900_v53  ;;  %v6155_v57 = vmul.f32 %v3900_v53, %v6048_v24  ;;  %3787 = vmatmul.f32.gmra.mxu2 %v6698_v31  ;;  %v6168_v24 = vmul.f32 %v6055_v23, %v6055_v23 }
 0x4f8   : > { %3970 = vmatmul.f32.gmra.mxu3 %v6703_v6 }
 0x4f9   : > { %6702 = vst [vmem:[#allocation20_spill] sm:$0xff] %v6155_v57  ;;  %v6162_v18 = vadd.f32 %v6152_v62, %v6150_v55  ;;  %v3585_v57 = vpop.f32.mrf.mxu1 }
 0x4fa   : > { %v3724_v51 = vpop.f32.mrf.mxu2 }
 0x4fb   : > { %v3907_v21 = vpop.f32.mrf.mxu3  ;;  %v3725_v45 = vadd.f32 %v3724_v51, %v3490_v35  ;;  %v6711_v35 = vld [vmem:[#allocation58_spill] sm:$0xff] }
 0x4fc   : > { %v3267_v51 = vadd.f32 %v6711_v35, %v6710_v49  ;;  %v6202_v49 = vmul.f32 %v6069_v33, %v6069_v33  ;;  %v6716_v35 = vld [vmem:[#allocation56_spill] sm:$0xff] }
 0x4fd   : > { %v3904_v5 = vadd.f32 %v3903_v12, %v3725_v45 }
 0x4ff   : > { %v6170_v31 = vmul.f32 %v3904_v5, %v3904_v5  ;;  %v6173_v9 = vmul.f32 %v3904_v5, %v6055_v23  ;;  %3791 = vmatmul.f32.gmra.mxu2 %v6703_v6  ;;  %v6186_v23 = vmul.f32 %v6062_v43, %v6062_v43  ;;  %v3502_v5 = vadd.f32 %v6714_v60, %v3267_v51 }
 0x500   : > { %3974 = vmatmul.f32.gmra.mxu3 %v6708_v36 }
 0x501   : > { %6707 = vst [vmem:[#allocation18_spill] sm:$0xff] %v6173_v9  ;;  %v6180_v28 = vadd.f32 %v6170_v31, %v6168_v24 }
 0x502   : > { %v3728_v12 = vpop.f32.mrf.mxu2 }
 0x503   : > { %v3911_v46 = vpop.f32.mrf.mxu3  ;;  %v3729_v53 = vadd.f32 %v3728_v12, %v3496_v11 }
 0x505   : > { %v3908_v45 = vadd.f32 %v3907_v21, %v3729_v53 }
 0x507   : > { %v6188_v6 = vmul.f32 %v3908_v45, %v3908_v45  ;;  %v6191_v7 = vmul.f32 %v3908_v45, %v6062_v43  ;;  %3795 = vmatmul.f32.gmra.mxu2 %v6708_v36 }
 0x508   : > { %3978 = vmatmul.f32.gmra.mxu3 %v6713_v58 }
 0x509   : > { %6712 = vst [vmem:[#allocation22_spill] sm:$0xff] %v6191_v7  ;;  %v6198_v29 = vadd.f32 %v6188_v6, %v6186_v23 }
 0x50a   : > { %v3732_v21 = vpop.f32.mrf.mxu2 }
 0x50b   : > { %v3915_v11 = vpop.f32.mrf.mxu3  ;;  %v3733_v12 = vadd.f32 %v3732_v21, %v3502_v5 }
 0x50d   : > { %v3912_v53 = vadd.f32 %v3911_v46, %v3733_v12  ;;  %v6717_v12 = vld [vmem:[#allocation57_spill] sm:$0xff] }
 0x50f   : > { %v6204_v43 = vmul.f32 %v3912_v53, %v3912_v53  ;;  %v6207_v36 = vmul.f32 %v3912_v53, %v6069_v33  ;;  %3799 = vmatmul.f32.gmra.mxu2 %v6713_v58 }
 0x510   : > { %3982 = vmatmul.f32.gmra.mxu3 %v6716_v35 }
 0x511   : > { %6715 = vst [vmem:[#allocation16_spill] sm:$0xff] %v6207_v36  ;;  %v6213_v51 = vadd.f32 %v6204_v43, %v6202_v49 }
 0x512   : > { %v3736_v45 = vpop.f32.mrf.mxu2 }
 0x513   : > { %v3919_v60 = vpop.f32.mrf.mxu3  ;;  %v3737_v46 = vadd.f32 %v3736_v45, %v5908_v34 }
 0x515   : > { %v3916_v5 = vadd.f32 %v3915_v11, %v3737_v46  ;;  %v6719_v11 = vld [vmem:[#allocation62_spill] sm:$0xff]  ;;  %v6720_v46 = vld [vmem:[#allocation61_spill] sm:$0xff] }
 0x517   : > { %v4098_v21 = vsub.f32 %v3916_v5, %v6078_v50  ;;  %3803 = vmatmul.f32.gmra.mxu2 %v6716_v35 }
 0x518   : > { %3986 = vmatmul.f32.gmra.mxu3 %v6717_v12 }
 0x51a   : > { %v3740_v33 = vpop.f32.mrf.mxu2 }
 0x51b   : > { %v3923_v53 = vpop.f32.mrf.mxu3  ;;  %v3741_v58 = vadd.f32 %v3740_v33, %v5914_v2 }
 0x51d   : > { %v3920_v36 = vadd.f32 %v3919_v60, %v3741_v58 }
 0x51f   : > { %v4099_v7 = vsub.f32 %v3920_v36, %v6096_v14  ;;  %3807 = vmatmul.f32.gmra.mxu2 %v6717_v12  ;;  %v6721_v14 = vld [vmem:[#allocation64_spill] sm:$0xff] }
 0x520   : > { %3990 = vmatmul.f32.gmra.mxu3 %v6718_v0 }
 0x522   : > { %v3744_v9 = vpop.f32.mrf.mxu2 }
 0x523   : > { %v3927_v34 = vpop.f32.mrf.mxu3  ;;  %v3745_v45 = vadd.f32 %v3744_v9, %v6719_v11  ;;  %v6722_v9 = vld [vmem:[#allocation63_spill] sm:$0xff] }
 0x525   : > { %v6224_v50 = vadd.f32 %v3923_v53, %v3745_v45 }
 0x527   : > { %v4100_v35 = vsub.f32 %v6224_v50, %v6114_v39  ;;  %3811 = vmatmul.f32.gmra.mxu2 %v6718_v0  ;;  %v6723_v39 = vld [vmem:[#allocation66_spill] sm:$0xff] }
 0x528   : > { %3994 = vmatmul.f32.gmra.mxu3 %v6720_v46 }
 0x52a   : > { %v3748_v2 = vpop.f32.mrf.mxu2 }
 0x52b   : > { %v3931_v60 = vpop.f32.mrf.mxu3  ;;  %v3749_v36 = vadd.f32 %v3748_v2, %v6721_v14 }
 0x52d   : > { %v6231_v5 = vadd.f32 %v3927_v34, %v3749_v36  ;;  %v6724_v34 = vld [vmem:[#allocation65_spill] sm:$0xff] }
 0x52f   : > { %3815 = vmatmul.f32.gmra.mxu2 %v6720_v46 }
 0x530   : > { %3998 = vmatmul.f32.gmra.mxu3 %v6722_v9 }
 0x532   : > { %v3752_v33 = vpop.f32.mrf.mxu2 }
 0x533   : > { %v3935_v53 = vpop.f32.mrf.mxu3  ;;  %v3753_v58 = vadd.f32 %v3752_v33, %v6723_v39 }
 0x535   : > { %v6238_v0 = vadd.f32 %v3931_v60, %v3753_v58  ;;  %v6725_v60 = vld [vmem:[#allocation67_spill] sm:$0xff] }
 0x537   : > { %3819 = vmatmul.f32.gmra.mxu2 %v6722_v9 }
 0x538   : > { %4002 = vmatmul.f32.gmra.mxu3 %v6724_v34 }
 0x53a   : > { %v3756_v45 = vpop.f32.mrf.mxu2 }
 0x53b   : > { %v3939_v50 = vpop.f32.mrf.mxu3  ;;  %v3757_v2 = vadd.f32 %v3756_v45, %v5942_v54 }
 0x53d   : > { %v6245_v46 = vadd.f32 %v3935_v53, %v3757_v2 }
 0x53f   : > { %3823 = vmatmul.f32.gmra.mxu2 %v6724_v34 }
 0x540   : > { %4006 = vmatmul.f32.gmra.mxu3 %v6725_v60 }
 0x542   : > { %v3760_v36 = vpop.f32.mrf.mxu2 }
 0x543   : > { %v3943_v33 = vpop.f32.mrf.mxu3  ;;  %v3761_v39 = vadd.f32 %v3760_v36, %v5945_v1 }
 0x545   : > { %v6252_v9 = vadd.f32 %v3939_v50, %v3761_v39 }
 0x547   : > { %3827 = vmatmul.f32.gmra.mxu2 %v6725_v60  ;;  %v4090_v60 = vadd.f32 0.0001, %v6090_v63 }
 0x54a   : > { %v3764_v54 = vpop.f32.mrf.mxu2 }
 0x54b   : > { %v3947_v53 = vpop.f32.mrf.mxu3  ;;  %v3765_v45 = vadd.f32 %v3764_v54, %v5949_v22 }
 0x54d   : > { %v6258_v2 = vadd.f32 %v3943_v33, %v3765_v45  ;;  %v3336_v33 = vpop.f32.mrf.mxu0 }
 0x552   : > { %v3768_v14 = vpop.f32.mrf.mxu2 }
 0x553   : > { %v3951_v11 = vpop.f32.mrf.mxu3  ;;  %v3769_v1 = vadd.f32 %v3768_v14, %v5953_v10 }
 0x555   : > { %v3948_v50 = vadd.f32 %v3947_v53, %v3769_v1 }
 0x557   : > { %v4106_v36 = vsub.f32 %v3948_v50, %v6080_v61  ;;  %v4091_v61 = vadd.f32 0.0001, %v6108_v26  ;;  %v3341_v50 = vpop.f32.mrf.mxu0 }
 0x559   : > { %v4114_v39 = vadd.f32 %v4106_v36, %v4098_v21  ;;  %v3591_v36 = vpop.f32.mrf.mxu1 }
 0x55a   : > { %v3772_v58 = vpop.f32.mrf.mxu2 }
 0x55b   : > { %v3955_v12 = vpop.f32.mrf.mxu3  ;;  %v4122_v32 = vadd.f32 0.0009, %v4114_v39  ;;  %v3773_v22 = vadd.f32 %v3772_v58, %v5957_v15 }
 0x55d   : > { %v6266_v54 = vmul.f32 %v4122_v32, %v4090_v60  ;;  %v3952_v45 = vadd.f32 %v3951_v11, %v3773_v22  ;;  %v4093_v22 = vadd.f32 0.0001, %v6144_v4  ;;  %v4094_v4 = vadd.f32 0.0001, %v6162_v18 }
 0x55f   : > { %v4107_v34 = vsub.f32 %v3952_v45, %v6098_v3  ;;  %v4092_v3 = vadd.f32 0.0001, %v6126_v19  ;;  %v3346_v26 = vpop.f32.mrf.mxu0  ;;  %4455 = vrcp.f32 %v6266_v54 }
 0x561   : > { %v4115_v44 = vadd.f32 %v4107_v34, %v4099_v7 }
 0x562   : > { %v3776_v10 = vpop.f32.mrf.mxu2 }
 0x563   : > { %v3959_v14 = vpop.f32.mrf.mxu3  ;;  %v4123_v21 = vadd.f32 0.0009, %v4115_v44  ;;  %v3777_v53 = vadd.f32 %v3776_v10, %v5961_v27  ;;  %v3337_v10 = vadd.f32 %v3336_v33, %v5969_v59  ;;  %v3342_v59 = vadd.f32 %v3341_v50, %v5975_v37 }
 0x565   : > { %v6271_v1 = vmul.f32 %v4123_v21, %v4091_v61  ;;  %v3956_v63 = vadd.f32 %v3955_v12, %v3777_v53  ;;  %v6726_v12 = vsub.f32 %v6231_v5, %v6132_v56  ;;  %v3586_v21 = vadd.f32 %v3585_v57, %v3337_v10 }
 0x566   : > { %v6727_v56 = vsub.f32 %v6238_v0, %v6150_v55  ;;  %v3592_v57 = vadd.f32 %v3591_v36, %v3342_v59  ;;  %v6728_v55 = vsub.f32 %v6245_v46, %v6168_v24  ;;  %v6729_v24 = vsub.f32 %v6252_v9, %v6186_v23 }
 0x567   : > { %v4108_v15 = vsub.f32 %v3956_v63, %v6116_v16  ;;  %v6730_v23 = vsub.f32 %v6258_v2, %v6202_v49  ;;  %4457 = vrcp.f32 %v6271_v1  ;;  %v4034_v49 = vmul.f32 2.0, %v6083_v20 }
 0x569   : > { %v4116_v32 = vadd.f32 %v4108_v15, %v4100_v35  ;;  %v3351_v15 = vpop.f32.mrf.mxu0 }
 0x56a   : > { %v3780_v58 = vpop.f32.mrf.mxu2 }
 0x56b   : > { %v3963_v11 = vpop.f32.mrf.mxu3  ;;  %v4124_v7 = vadd.f32 0.0009, %v4116_v32  ;;  %v3781_v34 = vadd.f32 %v3780_v58, %v5965_v41  ;;  %v3597_v41 = vpop.f32.mrf.mxu1 }
 0x56d   : > { %v6276_v39 = vmul.f32 %v4124_v7, %v4092_v3  ;;  %v3960_v44 = vadd.f32 %v3959_v14, %v3781_v34  ;;  %v4095_v34 = vadd.f32 0.0001, %v6180_v28  ;;  %v4096_v28 = vadd.f32 0.0001, %v6198_v29 }
 0x56f   : > { %v4109_v27 = vsub.f32 %v3960_v44, %v6134_v30  ;;  %4459 = vrcp.f32 %v6276_v39 }
 0x571   : > { %v4117_v60 = vadd.f32 %v4109_v27, %v6726_v12  ;;  %v3347_v27 = vadd.f32 %v3346_v26, %v5979_v17  ;;  %v3356_v37 = vpop.f32.mrf.mxu0  ;;  %v3352_v26 = vadd.f32 %v3351_v15, %v5983_v40 }
 0x572   : > { %v3784_v16 = vpop.f32.mrf.mxu2 }
 0x573   : > { %v3967_v35 = vpop.f32.mrf.mxu3  ;;  %v4125_v45 = vadd.f32 0.0009, %v4117_v60  ;;  %v3785_v19 = vadd.f32 %v3784_v16, %v5971_v13 }
 0x575   : > { %v6285_v61 = vmul.f32 %v4125_v45, %v4093_v22  ;;  %v3964_v14 = vadd.f32 %v3963_v11, %v3785_v19  ;;  %v3603_v11 = vpop.f32.mrf.mxu1 }
 0x577   : > { %v4110_v30 = vsub.f32 %v3964_v14, %v6152_v62  ;;  %v3604_v14 = vadd.f32 %v3603_v11, %v3352_v26  ;;  %4461 = vrcp.f32 %v6285_v61 }
 0x579   : > { %v4118_v5 = vadd.f32 %v4110_v30, %v6727_v56 }
 0x57a   : > { %v3788_v53 = vpop.f32.mrf.mxu2 }
 0x57b   : > { %v3971_v63 = vpop.f32.mrf.mxu3  ;;  %v4126_v32 = vadd.f32 0.0009, %v4118_v5  ;;  %v3789_v13 = vadd.f32 %v3788_v53, %v3586_v21  ;;  %v4097_v21 = vadd.f32 0.0001, %v6213_v51 }
 0x57d   : > { %v6293_v33 = vmul.f32 %v4126_v32, %v4094_v4  ;;  %v3968_v58 = vadd.f32 %v3967_v35, %v3789_v13  ;;  %v3609_v36 = vpop.f32.mrf.mxu1 }
 0x57f   : > { %v4111_v62 = vsub.f32 %v3968_v58, %v6170_v31  ;;  %v3598_v31 = vadd.f32 %v3597_v41, %v3347_v27  ;;  %v4456_v41 = vpop.eup %4455  ;;  %v4472_v27 = vld [vmem:[%s4951_s21] sm:$0xff]  ;;  %4463 = vrcp.f32 %v6293_v33 }
 0x580   : > { %v4146_v40 = vmul.f32 %v4456_v41, %v6266_v54  ;;  %v4458_v59 = vpop.eup %4457 }
 0x581   : > { %v4119_v0 = vadd.f32 %v4111_v62, %v6728_v55  ;;  %v4147_v55 = vmul.f32 %v4458_v59, %v6271_v1 }
 0x582   : > { %v3792_v3 = vpop.f32.mrf.mxu2  ;;  %v4154_v4 = vsub.f32 2.0, %v4146_v40 }
 0x583   : > { %v3975_v7 = vpop.f32.mrf.mxu3  ;;  %v4127_v18 = vadd.f32 0.0009, %v4119_v0  ;;  %v3793_v44 = vadd.f32 %v3792_v3, %v3592_v57 }
 0x585   : > { %v6301_v50 = vmul.f32 %v4127_v18, %v4095_v34  ;;  %v3972_v12 = vadd.f32 %v3971_v63, %v3793_v44  ;;  %v3615_v53 = vpop.f32.mrf.mxu1  ;;  %v4035_v18 = vmul.f32 2.0, %v6101_v48  ;;  %v4471_v44 = vld [vmem:[%s4875_s5] sm:$0xff] }
 0x587   : > { %v4112_v60 = vsub.f32 %v3972_v12, %v6188_v6  ;;  %v3361_v6 = vpop.f32.mrf.mxu0  ;;  %v4473_v12 = vld [vmem:[%s4875_s5 + $0x8] sm:$0xff]  ;;  %v4043_v26 = vadd.f32 0.0001, %v4035_v18  ;;  %4465 = vrcp.f32 %v6301_v50 }
 0x588   : > { %v3362_v57 = vadd.f32 %v3361_v6, %v5991_v42 }
 0x589   : > { %v4120_v46 = vadd.f32 %v4112_v60, %v6729_v24  ;;  %v4474_v60 = vld [vmem:[%s4951_s21 + $0x8] sm:$0xff]  ;;  %v4475_v24 = vld [vmem:[%s4875_s5 + $0x10] sm:$0xff] }
 0x58a   : > { %v3796_v16 = vpop.f32.mrf.mxu2  ;;  %v309_v42 = vsub.f32 %v4473_v12, %v4474_v60 }
 0x58b   : > { %v3979_v35 = vpop.f32.mrf.mxu3  ;;  %v4128_v22 = vadd.f32 0.0009, %v4120_v46  ;;  %v3797_v17 = vadd.f32 %v3796_v16, %v3598_v31  ;;  %v4476_v46 = vld [vmem:[%s4951_s21 + $0x10] sm:$0xff] }
 0x58c   : > { %v310_v16 = vsub.f32 %v4475_v24, %v4476_v46 }
 0x58d   : > { %v6310_v45 = vmul.f32 %v4128_v22, %v4096_v28  ;;  %v3976_v19 = vadd.f32 %v3975_v7, %v3797_v17  ;;  %v6328_v7 = vstv %s4363_s6  ;;  %v3621_v34 = vpop.f32.mrf.mxu1  ;;  %v3616_v28 = vadd.f32 %v3615_v53, %v3362_v57 }
 0x58e   : > { %vm354_vm1 = vcmp.lt.s32.totalorder %v6328_v7, 8  ;;  %v4155_v22 = vsub.f32 2.0, %v4147_v55 }
 0x58f   : > { %v4113_v10 = vsub.f32 %v3976_v19, %v6204_v43  ;;  %v3357_v43 = vadd.f32 %v3356_v37, %v5987_v38  ;;  %v3366_v51 = vpop.f32.mrf.mxu0  ;;  %v4042_v38 = vadd.f32 0.0001, %v4034_v49  ;;  %v308_v37 = vsub.f32 %v4471_v44, %v4472_v27 }
 0x590   : > { %v4036_v19 = vmul.f32 2.0, %v6119_v25  ;;  %v4163_v40 = vmul.f32 %v4458_v59, %v4155_v22  ;;  %4467 = vrcp.f32 %v6310_v45 }
 0x591   : > { %v4121_v9 = vadd.f32 %v4113_v10, %v6730_v23  ;;  %v3610_v32 = vadd.f32 %v3609_v36, %v3357_v43  ;;  %v6337_v36 = vpop.eup %4459  ;;  %v4687_v23 = vmov 0.0  }
 0x592   : > { %v3800_v30 = vpop.f32.mrf.mxu2  ;;  %v4044_v49 = vadd.f32 0.0001, %v4036_v19 }
 0x593   : > { %v3983_v29 = vpop.f32.mrf.mxu3  ;;  %v4129_v56 = vadd.f32 0.0009, %v4121_v9  ;;  %v3801_v5 = vadd.f32 %v3800_v30, %v3604_v14  ;;  %v4364_v9 = vsel %vm354_vm1, 1.0, %v4687_v23  ;;  %v6347_v30 = vpop.eup %4461 }
 0x594   : > { %v6371_v19 = vpop.eup %4463 }
 0x595   : > { %v6320_v63 = vmul.f32 %v4129_v56, %v4097_v21  ;;  %v3980_v15 = vadd.f32 %v3979_v35, %v3801_v5  ;;  %v3367_v35 = vadd.f32 %v3366_v51, %v5995_v47  ;;  %v316_v47 = vand.u32 2147483647, %v308_v37  ;;  %v3627_v59 = vpop.f32.mrf.mxu1 }
 0x596   : > { %v318_v21 = vand.u32 2147483647, %v310_v16  ;;  %v6354_v51 = vmul.f32 %v6347_v30, %v6285_v61 }
 0x597   : > { %v4050_v2 = vsub.f32 %v3980_v15, %v6083_v20  ;;  %v4162_v20 = vmul.f32 %v4456_v41, %v4154_v4  ;;  %v3371_v10 = vpop.f32.mrf.mxu0  ;;  %v3622_v56 = vadd.f32 %v3621_v34, %v3367_v35  ;;  %v351_v15 = vadd.s32 1, %v6328_v7 }
 0x598   : > { %v328_v18 = vsel %vm324_vm0, %v318_v21, 0.0  ;;  %4469 = vrcp.f32 %v6320_v63 }
 0x599   : > { %v4058_v13 = vmul.f32 2.0, %v4050_v2  ;;  %v4037_v2 = vmul.f32 2.0, %v6137_v8  ;;  %vm355_vm2 = vcmp.lt.s32.totalorder %v351_v15, 8 }
 0x59a   : > { %v3804_v54 = vpop.f32.mrf.mxu2 }
 0x59b   : > { %v3987_v58 = vpop.f32.mrf.mxu3  ;;  %v4066_v11 = vadd.f32 0.0009, %v4058_v13  ;;  %v3805_v62 = vadd.f32 %v3804_v54, %v3610_v32 }
 0x59d   : > { %v4074_v0 = vmul.f32 %v4066_v11, %v4042_v38  ;;  %v3984_v3 = vadd.f32 %v3983_v29, %v3805_v62  ;;  %v317_v29 = vand.u32 2147483647, %v309_v42  ;;  %v4478_v38 = vld [vmem:[%s4951_s21 + $0x18] sm:$0xff]  ;;  %v325_v11 = vsel %vm324_vm0, %v316_v47, 0.0  ;;  %v4481_v42 = vld [vmem:[%s4875_s5 + $0x28] sm:$0xff]  ;;  %v3633_v15 = vpop.f32.mrf.mxu1 }
 0x59e   : > { %v4365_v47 = vsel %vm355_vm2, 1.0, %v4687_v23 }
 0x59f   : > { %v4170_v31 = vmul.f32 %v4162_v20, %v4074_v0  ;;  %v4051_v1 = vsub.f32 %v3984_v3, %v6101_v48  ;;  %v4148_v48 = vmul.f32 %v6337_v36, %v6276_v39  ;;  %v3372_v39 = vadd.f32 %v3371_v10, %v5999_v52  ;;  %v4479_v0 = vld [vmem:[%s4875_s5 + $0x20] sm:$0xff]  ;;  %v3376_v35 = vpop.f32.mrf.mxu0  ;;  %v4483_v10 = vld [vmem:[%s4875_s5 + $0x30] sm:$0xff] }
 0x5a0   : > { %v326_v62 = vsel %vm324_vm0, %v317_v29, 0.0  ;;  %v4480_v3 = vld [vmem:[%s4951_s21 + $0x20] sm:$0xff] }
 0x5a1   : > { %v4059_v17 = vmul.f32 2.0, %v4051_v1  ;;  %v4178_v4 = vmul.f32 %v4364_v9, %v4170_v31  ;;  %v4156_v32 = vsub.f32 2.0, %v4148_v48  ;;  %v327_v20 = vadd.f32 %v326_v62, %v325_v11  ;;  %v4482_v31 = vld [vmem:[%s4951_s21 + $0x28] sm:$0xff]  ;;  %v4484_v48 = vld [vmem:[%s4951_s21 + $0x30] sm:$0xff] }
 0x5a2   : > { %v3808_v6 = vpop.f32.mrf.mxu2  ;;  %v313_v1 = vsub.f32 %v4481_v42, %v4482_v31 }
 0x5a3   : > { %v4067_v41 = vadd.f32 0.0009, %v4059_v17  ;;  %v3809_v14 = vadd.f32 %v3808_v6, %v3616_v28  ;;  %v3991_v5 = vpop.f32.mrf.mxu3  ;;  %v4186_v44 = vsel %vm324_vm0, %v4178_v4, 0.0  ;;  %v329_v12 = vadd.f32 %v328_v18, %v327_v20 }
 0x5a4   : > { %v4164_v22 = vmul.f32 %v6337_v36, %v4156_v32  ;;  %v4157_v36 = vsub.f32 2.0, %v6354_v51  ;;  %v3628_v4 = vadd.f32 %v3627_v59, %v3372_v39 }
 0x5a5   : > { %v4075_v53 = vmul.f32 %v4067_v41, %v4043_v26  ;;  %v3988_v43 = vadd.f32 %v3987_v58, %v3809_v14  ;;  %v4477_v58 = vld [vmem:[%s4875_s5 + $0x18] sm:$0xff]  ;;  %v314_v41 = vsub.f32 %v4483_v10, %v4484_v48  ;;  %v321_v14 = vand.u32 2147483647, %v313_v1 }
 0x5a6   : > { %v311_v52 = vsub.f32 %v4477_v58, %v4478_v38  ;;  %v6731_v58 = vld [vmem:[#allocation68_spill] sm:$0xff]  ;;  %v4165_v39 = vmul.f32 %v6347_v30, %v4157_v36 }
 0x5a7   : > { %v4171_v13 = vmul.f32 %v4163_v40, %v4075_v53  ;;  %v4052_v54 = vsub.f32 %v3988_v43, %v6119_v25  ;;  %v312_v25 = vsub.f32 %v4479_v0, %v4480_v3  ;;  %v4486_v53 = vld [vmem:[%s4951_s21 + $0x38] sm:$0xff]  ;;  %v322_v43 = vand.u32 2147483647, %v314_v41 }
 0x5a8   : > { %v319_v34 = vand.u32 2147483647, %v311_v52  ;;  %v3377_v38 = vadd.f32 %v3376_v35, %v6731_v58  ;;  %v4045_v52 = vadd.f32 0.0001, %v4037_v2  ;;  %v4150_v0 = vmul.f32 %v6371_v19, %v6293_v33  ;;  %v6735_v58 = vld [vmem:[#allocation70_spill] sm:$0xff] }
 0x5a9   : > { %v4060_v57 = vmul.f32 2.0, %v4052_v54  ;;  %v4179_v61 = vmul.f32 %v4364_v9, %v4171_v13  ;;  %v320_v24 = vand.u32 2147483647, %v312_v25 }
 0x5aa   : > { %v3812_v55 = vpop.f32.mrf.mxu2  ;;  %v330_v46 = vsel %vm324_vm0, %v319_v34, 0.0  ;;  %v6732_v34 = vld [vmem:[#allocation20_spill] sm:$0xff]  ;;  %v3634_v30 = vadd.f32 %v3633_v15, %v3377_v38  ;;  %v4158_v42 = vsub.f32 2.0, %v4150_v0 }
 0x5ab   : > { %v4068_v27 = vadd.f32 0.0009, %v4060_v57  ;;  %v3813_v37 = vadd.f32 %v3812_v55, %v3622_v56  ;;  %v4187_v60 = vsel %vm324_vm0, %v4179_v61, 0.0  ;;  %v331_v26 = vadd.f32 %v330_v46, %v329_v12  ;;  %v3995_v6 = vpop.f32.mrf.mxu3 }
 0x5ac   : > { %v4188_v16 = vadd.f32 %v4187_v60, %v4186_v44  ;;  %v332_v9 = vsel %vm324_vm0, %v320_v24, 0.0  ;;  %v4038_v18 = vmul.f32 2.0, %v6732_v34  ;;  %v3381_v44 = vpop.f32.mrf.mxu0  ;;  %v352_v12 = vadd.s32 2, %v6328_v7  ;;  %v4466_v24 = vpop.eup %4465 }
 0x5ad   : > { %v4076_v28 = vmul.f32 %v4068_v27, %v4044_v49  ;;  %v3992_v17 = vadd.f32 %v3991_v5, %v3813_v37  ;;  %v333_v56 = vadd.f32 %v332_v9, %v331_v26  ;;  %v4485_v5 = vld [vmem:[%s4875_s5 + $0x38] sm:$0xff]  ;;  %v334_v49 = vsel %vm324_vm0, %v321_v14, 0.0  ;;  %v3639_v26 = vpop.f32.mrf.mxu1 }
 0x5ae   : > { %v315_v40 = vsub.f32 %v4485_v5, %v4486_v53  ;;  %v4046_v46 = vadd.f32 0.0001, %v4038_v18  ;;  %vm356_vm3 = vcmp.lt.s32.totalorder %v352_v12, 8  ;;  %v4151_v10 = vmul.f32 %v4466_v24, %v6301_v50 }
 0x5af   : > { %v4172_v29 = vmul.f32 %v4164_v22, %v4076_v28  ;;  %v4053_v21 = vsub.f32 %v3992_v17, %v6137_v8  ;;  %v335_v13 = vadd.f32 %v334_v49, %v333_v56  ;;  %v336_v8 = vsel %vm324_vm0, %v322_v43, 0.0  ;;  %v6733_v22 = vld [vmem:[#allocation69_spill] sm:$0xff]  ;;  %v4468_v49 = vpop.eup %4467 }
 0x5b0   : > { %v323_v62 = vand.u32 2147483647, %v315_v40  ;;  %v3382_v17 = vadd.f32 %v3381_v44, %v6733_v22  ;;  %v4166_v41 = vmul.f32 %v6371_v19, %v4158_v42  ;;  %v4366_v9 = vsel %vm356_vm3, 1.0, %v4687_v23 }
 0x5b1   : > { %v4061_v32 = vmul.f32 2.0, %v4053_v21  ;;  %v4180_v54 = vmul.f32 %v4365_v47, %v4172_v29  ;;  %v337_v20 = vadd.f32 %v336_v8, %v335_v13  ;;  %v4159_v53 = vsub.f32 2.0, %v4151_v10 }
 0x5b2   : > { %v3816_v11 = vpop.f32.mrf.mxu2  ;;  %v338_v59 = vsel %vm324_vm0, %v323_v62, 0.0  ;;  %v3640_v36 = vadd.f32 %v3639_v26, %v3382_v17 }
 0x5b3   : > { %v4069_v57 = vadd.f32 0.0009, %v4061_v32  ;;  %v3817_v51 = vadd.f32 %v3816_v11, %v3628_v4  ;;  %v4189_v61 = vsel %vm324_vm0, %v4180_v54, 0.0  ;;  %v339_v25 = vadd.f32 %v338_v59, %v337_v20  ;;  %v3999_v60 = vpop.f32.mrf.mxu3 }
 0x5b4   : > { %v4190_v55 = vadd.f32 %v4189_v61, %v4188_v16  ;;  %v3386_v5 = vpop.f32.mrf.mxu0  ;;  %v4167_v62 = vmul.f32 %v4466_v24, %v4159_v53  ;;  %v353_v59 = vadd.s32 3, %v6328_v7 }
 0x5b5   : > { %v4077_v2 = vmul.f32 %v4069_v57, %v4045_v52  ;;  %v3996_v3 = vadd.f32 %v3995_v6, %v3817_v51  ;;  %340 = vadd.xlane.f32.xlu2 %v339_v25  ;;  %v3387_v38 = vadd.f32 %v3386_v5, %v6735_v58  ;;  %v4152_v52 = vmul.f32 %v4468_v49, %v6310_v45  ;;  %v3645_v57 = vpop.f32.mrf.mxu1  ;;  %v6736_v51 = vld [vmem:[#allocation22_spill] sm:$0xff]  ;;  %v4470_v25 = vpop.eup %4469 }
 0x5b6   : > { %v4040_v20 = vmul.f32 2.0, %v6736_v51  ;;  %vm357_vm4 = vcmp.lt.s32.totalorder %v353_v59, 8  ;;  %v4153_v42 = vmul.f32 %v4470_v25, %v6320_v63 }
 0x5b7   : > { %v4173_v27 = vmul.f32 %v4165_v39, %v4077_v2  ;;  %v4054_v37 = vsub.f32 %v3996_v3, %v6732_v34  ;;  %v4160_v0 = vsub.f32 2.0, %v4152_v52  ;;  %v4367_v7 = vsel %vm357_vm4, 1.0, %v4687_v23 }
 0x5b8   : > { %v4048_v34 = vadd.f32 0.0001, %v4040_v20 }
 0x5b9   : > { %v4062_v31 = vmul.f32 2.0, %v4054_v37  ;;  %v4181_v1 = vmul.f32 %v4365_v47, %v4173_v27  ;;  %v6734_v47 = vld [vmem:[#allocation18_spill] sm:$0xff] }
 0x5ba   : > { %v3820_v33 = vpop.f32.mrf.mxu2  ;;  %v4039_v29 = vmul.f32 2.0, %v6734_v47 }
 0x5bb   : > { %v4070_v16 = vadd.f32 0.0009, %v4062_v31  ;;  %v3821_v35 = vadd.f32 %v3820_v33, %v3634_v30  ;;  %v4191_v28 = vsel %vm324_vm0, %v4181_v1, 0.0  ;;  %v4003_v4 = vpop.f32.mrf.mxu3  ;;  %v4168_v31 = vmul.f32 %v4468_v49, %v4160_v0  ;;  %v6737_v1 = vld [vmem:[#allocation16_spill] sm:$0xff] }
 0x5bc   : > { %v4192_v6 = vadd.f32 %v4191_v28, %v4190_v55  ;;  %v4047_v50 = vadd.f32 0.0001, %v4039_v29  ;;  %v3646_v55 = vadd.f32 %v3645_v57, %v3387_v38  ;;  %v4041_v24 = vmul.f32 2.0, %v6737_v1 }
 0x5bd   : > { %v4078_v48 = vmul.f32 %v4070_v16, %v4046_v46  ;;  %v4000_v14 = vadd.f32 %v3999_v60, %v3821_v35  ;;  %v4161_v35 = vsub.f32 2.0, %v4153_v42 }
 0x5be   : > { %v4049_v22 = vadd.f32 0.0001, %v4041_v24 }
 0x5bf   : > { %v4174_v21 = vmul.f32 %v4166_v41, %v4078_v48  ;;  %v4055_v56 = vsub.f32 %v4000_v14, %v6734_v47  ;;  %v4169_v48 = vmul.f32 %v4470_v25, %v4161_v35 }
 0x5c1   : > { %v4063_v40 = vmul.f32 2.0, %v4055_v56  ;;  %v4182_v43 = vmul.f32 %v4366_v9, %v4174_v21 }
 0x5c2   : > { %v3824_v32 = vpop.f32.mrf.mxu2 }
 0x5c3   : > { %v4071_v13 = vadd.f32 0.0009, %v4063_v40  ;;  %v3825_v54 = vadd.f32 %v3824_v32, %v3640_v36  ;;  %v4193_v19 = vsel %vm324_vm0, %v4182_v43, 0.0  ;;  %v4007_v37 = vpop.f32.mrf.mxu3 }
 0x5c4   : > { %v4194_v15 = vadd.f32 %v4193_v19, %v4192_v6 }
 0x5c5   : > { %v4079_v11 = vmul.f32 %v4071_v13, %v4047_v50  ;;  %v4004_v8 = vadd.f32 %v4003_v4, %v3825_v54  ;;  %v4210_v13 = vlaneseq }
 0x5c7   : > { %v4175_v61 = vmul.f32 %v4167_v62, %v4079_v11  ;;  %v4056_v39 = vsub.f32 %v4004_v8, %v6736_v51  ;;  %v4211_v54 = vshrl.u32 %v4210_v13, 7 }
 0x5c9   : > { %v4064_v2 = vmul.f32 2.0, %v4056_v39  ;;  %v4183_v3 = vmul.f32 %v4366_v9, %v4175_v61  ;;  %vm4213_vm5 = vcmp.eq.s32.totalorder %v4211_v54, 1  ;;  %vm4212_vm6 = vcmp.eq.s32.totalorder %v4211_v54, 0 }
 0x5ca   : > { %v3828_v18 = vpop.f32.mrf.mxu2 }
 0x5cb   : > { %v4072_v44 = vadd.f32 0.0009, %v4064_v2  ;;  %v3829_v45 = vadd.f32 %v3828_v18, %v3646_v55  ;;  %v4195_v27 = vsel %vm324_vm0, %v4183_v3, 0.0 }
 0x5cc   : > { %v4196_v12 = vadd.f32 %v4195_v27, %v4194_v15 }
 0x5cd   : > { %v4080_v60 = vmul.f32 %v4072_v44, %v4048_v34  ;;  %v4008_v30 = vadd.f32 %v4007_v37, %v3829_v45 }
 0x5cf   : > { %v4057_v46 = vsub.f32 %v4008_v30, %v6737_v1  ;;  %v4176_v33 = vmul.f32 %v4168_v31, %v4080_v60 }
 0x5d1   : > { %v4065_v16 = vmul.f32 2.0, %v4057_v46  ;;  %v4184_v28 = vmul.f32 %v4367_v7, %v4176_v33 }
 0x5d3   : > { %v4073_v17 = vadd.f32 0.0009, %v4065_v16  ;;  %v4197_v26 = vsel %vm324_vm0, %v4184_v28, 0.0 }
 0x5d4   : > { %v4198_v6 = vadd.f32 %v4197_v26, %v4196_v12 }
 0x5d5   : > { %v4081_v10 = vmul.f32 %v4073_v17, %v4049_v22 }
 0x5d7   : > { %v4177_v41 = vmul.f32 %v4169_v48, %v4081_v10 }
 0x5d9   : > { %v4185_v63 = vmul.f32 %v4367_v7, %v4177_v41 }
 0x5db   : > { %v4199_v14 = vsel %vm324_vm0, %v4185_v63, 0.0 }
 0x5dc   : > { %v4200_v23 = vadd.f32 %v4199_v14, %v4198_v6 }
 0x5de   : > { %4201 = vadd.xlane.f32.xlu0 %v4200_v23 }
 0x628   : > { %v341_v9 = vpop.xlane.xlu2 %340 }
 0x629   : > { %v342_v47 = vrot.slane %v341_v9, 4 }
 0x62b   : > { %v343_v29 = vadd.f32 %v342_v47, %v341_v9 }
 0x62d   : > { %v344_v21 = vrot.slane %v343_v29, 2 }
 0x62f   : > { %v345_v56 = vadd.f32 %v344_v21, %v343_v29 }
 0x631   : > { %v346_v36 = vrot.slane %v345_v56, 1 }
 0x633   : > { %v347_v5 = vadd.f32 %v346_v36, %v345_v56 }
 0x635   : > { %4376 = vpush %v347_v5 }
 0x651   : > { %v4202_v53 = vpop.xlane.xlu0 %4201 }
 0x652   : > { %v4203_v40 = vrot.slane %v4202_v53, 4 }
 0x654   : > { %v4204_v43 = vadd.f32 %v4203_v40, %v4202_v53 }
 0x656   : > { %v4205_v49 = vrot.slane %v4204_v43, 2 }
 0x658   : > { %v4206_v4 = vadd.f32 %v4205_v49, %v4204_v43 }
 0x65a   : > { %v4207_v32 = vrot.slane %v4206_v4, 1 }
 0x65c   : > { %v4208_v50 = vadd.f32 %v4207_v32, %v4206_v4 }
 0x65e   : > { %4378 = vpush %v4208_v50 }
 0x666   : > { %s4377_s7 = spop %4376 }
 0x667   : > { %v4214_v19 = vstv %s4377_s7 }
 0x668   : > { %v4215_v58 = vsel %vm4213_vm5, %v4214_v19, 0.0 }
 0x68f   : > { %s4379_s28 = spop %4378 }
 0x690   : > { %v4216_v38 = vstv %s4379_s28 }
 0x691   : > { %v4217_v15 = vsel %vm4212_vm6, %v4216_v38, %v4215_v58 }
 0x692   : > { %4218 = vst [vmem:[%s289_s8] sm:$0xff] %v4217_v15 }
 0x693   : > { %4634 = shalt.err (!%p4631_p0)
}
 0x694   : > { %4392 = dma.vmem_to_hbm [thread:$0]  (%p4789_p7), %s4233_s12, 128, %s4235_s27, %s4220_s19  }
 0x695 PF: > { %s4246_s0 = sand.u32 1, %s4669_s15   ;;  %p6738_p3 = scmp.ge.s32.totalorder %s4681_s18, 2 }
 0x696   : > { %s4247_s5 = scalar_lea.sflag [#allocation4], %s4246_s0 }
 0x697   : > { %p4409_p12 = pnand %p6738_p3, %p4748_p6 }
 0x699   : > { %p4410_p5 = pneg %p4409_p12 }
 0x69b   : > { %4664 = dma.done.wait (%p4410_p5), %s4247_s5, 128  }
 0x69c   : > { %4666 = vsyncadd (%p4410_p5), %s4247_s5, 4294967168  ;;  %s6739_s21 = sld [smem:[#allocation14_spill]]  ;;  %p16_p1 = scmp.ge.s32.totalorder %s4770_s30, 4  }
 0x69d   : > { %s6740_s15 = smov %s4673_s16  ;;  %s6741_s16 = smov %s4677_s17 }
 0x69e   : > { %s6743_s18 = smov %s4770_s30  ;;  %18 = sbr.rel (!%p16_p1) target bundleno = 9 (0x9), region = 99 }
 0x6a2   : > { %s6742_s17 = smov %s6739_s21 }
 0x6a3   :  { %4253 = vsyncpa [#allocation3], 1 }
 0x6a4   :  { %4255 = vsyncpa [#allocation3 + $0x1], 1 }
 0x6a5   :  { %4256 = vsyncpa [#allocation6], 1 }
 0x6a6   :  { %4257 = vsyncpa [#allocation4], 1 }
 0x6a7   :  { %4259 = vsyncpa [#allocation4 + $0x1], 1 }

</bundles_post_ra>
